<compile_context>
chip_gen: v6e
topology: v6e:2x2x1
jax: 0.10.0
libtpu: 0.0.40
codegen_flags: <defaults>
</compile_context>

<pallas_src>
import functools

import jax
import jax.numpy as jnp
from jax.experimental import pallas as pl
from jax.experimental.pallas import tpu as pltpu

IN_FEATS = 28 * 28 + 10          # 794
IN_PAD = 896                     # 7 * 128, lane-aligned K for layer 1
H1, H2, H3 = 512, 512, 1024
OUT = 1
OUT_PAD = 128                    # lane-dense output tile


def _round_up(n, m):
    return ((n + m - 1) // m) * m


def _leaky_relu(x, slope=0.2):
    return jnp.where(x > 0, x, slope * x)


def disc_kernel(x_ref, w1_ref, b1_ref, w2_ref, b2_ref,
                w3_ref, b3_ref, w4_ref, b4_ref, o_ref):
    # layer1: Linear(794->512) + LeakyReLU(0.2)   (Dropout = identity in eval)
    h = jnp.dot(x_ref[...], w1_ref[...],
                preferred_element_type=jnp.float32) + b1_ref[...]
    h = _leaky_relu(h)
    # layer2: Linear(512->512) + LeakyReLU(0.2)
    h = jnp.dot(h.astype(jnp.bfloat16), w2_ref[...],
                preferred_element_type=jnp.float32) + b2_ref[...]
    h = _leaky_relu(h)
    # layer3: Linear(512->1024) + LeakyReLU(0.2)
    h = jnp.dot(h.astype(jnp.bfloat16), w3_ref[...],
                preferred_element_type=jnp.float32) + b3_ref[...]
    h = _leaky_relu(h)
    # layer4: Linear(1024->1, lane-padded to 128) + Sigmoid
    logits = jnp.dot(h.astype(jnp.bfloat16), w4_ref[...],
                     preferred_element_type=jnp.float32) + b4_ref[...]
    o_ref[...] = jax.nn.sigmoid(logits)


def prep_params(params):
    """One-time parameter prep: pad + cast. Hoisted out of the hot path."""
    emb, w1, b1, w2, b2, w3, b3, w4, b4 = params
    w1_pad = jnp.pad(w1, ((0, IN_PAD - IN_FEATS), (0, 0))).astype(jnp.bfloat16)
    w4_pad = jnp.pad(w4, ((0, 0), (0, OUT_PAD - OUT))).astype(jnp.bfloat16)
    b4_pad = jnp.pad(b4, ((0, OUT_PAD - OUT),))
    return (emb.astype(jnp.float32),
            w1_pad, b1.reshape(1, H1).astype(jnp.float32),
            w2.astype(jnp.bfloat16), b2.reshape(1, H2).astype(jnp.float32),
            w3.astype(jnp.bfloat16), b3.reshape(1, H3).astype(jnp.float32),
            w4_pad, b4_pad.reshape(1, OUT_PAD).astype(jnp.float32))


@functools.partial(jax.jit, static_argnames=("block_b",))
def discriminator_forward(x, labels, prepped, *, block_b=256):
    """x: (B, 1, 28, 28) or (B, 784) float; labels: (B,) int32 in [0, 10)."""
    (emb, w1_pad, b1, w2, b2, w3, b3, w4_pad, b4) = prepped
    B = x.shape[0]

    # Batch tiling: block is a multiple of 8 (sublane), capped at block_b.
    bb = min(block_b, _round_up(B, 8))
    bb = _round_up(bb, 8)
    B_pad = _round_up(B, bb)
    grid = (B_pad // bb,)

    # --- glue: flatten + embedding gather + concat + pad, single buffer ---
    x_flat = x.reshape(B, 28 * 28)
    c = emb[labels]                                            # (B, 10)
    xc_pad = jnp.zeros((B_pad, IN_PAD), jnp.bfloat16)
    xc_pad = xc_pad.at[:B, :28 * 28].set(x_flat.astype(jnp.bfloat16))
    xc_pad = xc_pad.at[:B, 28 * 28:IN_FEATS].set(c.astype(jnp.bfloat16))

    const = lambda i: (0, 0)     # weights / biases: resident across batch blocks
    batched = lambda i: (i, 0)   # x / out: march over batch blocks

    out = pl.pallas_call(
        disc_kernel,
        out_shape=jax.ShapeDtypeStruct((B_pad, OUT_PAD), jnp.float32),
        grid_spec=pltpu.PrefetchScalarGridSpec(
            num_scalar_prefetch=0,
            grid=grid,
            in_specs=[
                pl.BlockSpec((bb, IN_PAD), batched),       # x
                pl.BlockSpec((IN_PAD, H1), const),         # w1
                pl.BlockSpec((1, H1), const),              # b1
                pl.BlockSpec((H1, H2), const),             # w2
                pl.BlockSpec((1, H2), const),              # b2
                pl.BlockSpec((H2, H3), const),             # w3
                pl.BlockSpec((1, H3), const),              # b3
                pl.BlockSpec((H3, OUT_PAD), const),        # w4 (lane-padded)
                pl.BlockSpec((1, OUT_PAD), const),         # b4 (lane-padded)
            ],
            out_specs=pl.BlockSpec((bb, OUT_PAD), batched),
        ),
        compiler_params=pltpu.CompilerParams(
            dimension_semantics=("parallel",)),
    )(xc_pad, w1_pad, b1, w2, b2, w3, b3, w4_pad, b4)

    return out[:B, :OUT]


def init_params(key):
    """Deterministic init mimicking PyTorch defaults (shapes from __init__)."""
    ks = jax.random.split(key, 9)

    def linear(kw, kb, fan_in, fan_out):
        bound = 1.0 / jnp.sqrt(fan_in)
        w = jax.random.uniform(kw, (fan_in, fan_out), jnp.float32, -bound, bound)
        b = jax.random.uniform(kb, (fan_out,), jnp.float32, -bound, bound)
        return w, b

    emb = jax.random.normal(ks[0], (10, 10), jnp.float32)      # nn.Embedding(10, 10)
    w1, b1 = linear(ks[1], ks[2], IN_FEATS, H1)                 # Linear(794, 512)
    w2, b2 = linear(ks[3], ks[4], H1, H2)                       # Linear(512, 512)
    w3, b3 = linear(ks[5], ks[6], H2, H3)                       # Linear(512, 1024)
    w4, b4 = linear(ks[7], ks[8], H3, OUT)                      # Linear(1024, 1)
    return (emb, w1, b1, w2, b2, w3, b3, w4, b4)


def _reference_forward(x, labels, params):
    """Pure-JAX reference, bf16 matmul inputs / f32 accumulation (matches kernel)."""
    emb, w1, b1, w2, b2, w3, b3, w4, b4 = params
    B = x.shape[0]

    def mm(a, w):
        return jnp.dot(a.astype(jnp.bfloat16), w.astype(jnp.bfloat16),
                       preferred_element_type=jnp.float32)

    xc = jnp.concatenate([x.reshape(B, 28 * 28), emb[labels]], axis=1)
    h = _leaky_relu(mm(xc, w1) + b1)
    h = _leaky_relu(mm(h, w2) + b2)
    h = _leaky_relu(mm(h, w3) + b3)
    return jax.nn.sigmoid(mm(h, w4) + b4)


if __name__ == "__main__":
    key = jax.random.PRNGKey(0)
    k_param, k_x, k_lbl = jax.random.split(key, 3)

    params = init_params(k_param)
    prepped = prep_params(params)       # one-time pad + bf16 cast

    B = 4
    x = jax.random.normal(k_x, (B, 1, 28, 28), jnp.float32)
    labels = jax.random.randint(k_lbl, (B,), 0, 10, jnp.int32)

    out = discriminator_forward(x, labels, prepped)
    out = jax.block_until_ready(out)

    ref = _reference_forward(x, labels, params)
    assert out.shape == (B, 1)
    max_diff = float(jnp.max(jnp.abs(out - ref)))
    assert jnp.allclose(out, ref, atol=2e-3, rtol=2e-3), f"max diff {max_diff}"

    print("KERNEL_OK")
</pallas_src>

<mosaic_0001>
module attributes {stable_mosaic.version = 11 : i64} {
  func.func @disc_kernel(%arg0: i32, %arg1: memref<8x896xbf16, #tpu.memory_space<vmem>>, %arg2: memref<896x512xbf16, #tpu.memory_space<vmem>>, %arg3: memref<1x512xf32, #tpu.memory_space<vmem>>, %arg4: memref<512x512xbf16, #tpu.memory_space<vmem>>, %arg5: memref<1x512xf32, #tpu.memory_space<vmem>>, %arg6: memref<512x1024xbf16, #tpu.memory_space<vmem>>, %arg7: memref<1x1024xf32, #tpu.memory_space<vmem>>, %arg8: memref<1024x128xbf16, #tpu.memory_space<vmem>>, %arg9: memref<1x128xf32, #tpu.memory_space<vmem>>, %arg10: memref<8x128xf32, #tpu.memory_space<vmem>>) attributes {dimension_semantics = [#tpu.dimension_semantics<parallel>], iteration_bounds = array<i64: 1>, scalar_prefetch = 0 : i64, scratch_operands = 0 : i64, tpu.core_type = #tpu.core_type<tc>, window_params = [{transform_indices = @transform_0, window_bounds = array<i64: 8, 896>}, {pipeline_mode = #tpu.pipeline_mode<synchronous>, transform_indices = @transform_1, window_bounds = array<i64: 896, 512>}, {pipeline_mode = #tpu.pipeline_mode<synchronous>, transform_indices = @transform_2, window_bounds = array<i64: 1, 512>}, {pipeline_mode = #tpu.pipeline_mode<synchronous>, transform_indices = @transform_3, window_bounds = array<i64: 512, 512>}, {pipeline_mode = #tpu.pipeline_mode<synchronous>, transform_indices = @transform_4, window_bounds = array<i64: 1, 512>}, {pipeline_mode = #tpu.pipeline_mode<synchronous>, transform_indices = @transform_5, window_bounds = array<i64: 512, 1024>}, {pipeline_mode = #tpu.pipeline_mode<synchronous>, transform_indices = @transform_6, window_bounds = array<i64: 1, 1024>}, {pipeline_mode = #tpu.pipeline_mode<synchronous>, transform_indices = @transform_7, window_bounds = array<i64: 1024, 128>}, {pipeline_mode = #tpu.pipeline_mode<synchronous>, transform_indices = @transform_8, window_bounds = array<i64: 1, 128>}, {transform_indices = @transform_9, window_bounds = array<i64: 8, 128>}]} {
    %c0 = arith.constant 0 : index
    %c0_0 = arith.constant 0 : index
    %0 = vector.load %arg1[%c0, %c0_0] : memref<8x896xbf16, #tpu.memory_space<vmem>>, vector<8x896xbf16>
    %c0_1 = arith.constant 0 : index
    %c0_2 = arith.constant 0 : index
    %1 = vector.load %arg2[%c0_1, %c0_2] : memref<896x512xbf16, #tpu.memory_space<vmem>>, vector<896x512xbf16>
    %cst = arith.constant dense<0.000000e+00> : vector<8x512xf32>
    %2 = tpu.matmul %0, %1, %cst {dimension_numbers = #tpu.dot_dimension_numbers<[1], [0], [0], [1], [0, 0, 1, 1], [], []>} : vector<8x896xbf16>, vector<896x512xbf16>, vector<8x512xf32> -> vector<8x512xf32>
    %c0_3 = arith.constant 0 : index
    %c0_4 = arith.constant 0 : index
    %3 = vector.load %arg3[%c0_3, %c0_4] : memref<1x512xf32, #tpu.memory_space<vmem>>, vector<1x512xf32>
    %4 = vector.broadcast %3 : vector<1x512xf32> to vector<8x512xf32>
    %5 = arith.addf %2, %4 : vector<8x512xf32>
    %cst_5 = arith.constant 0.000000e+00 : f32
    %6 = vector.broadcast %cst_5 : f32 to vector<8x512xf32>
    %7 = arith.cmpf ogt, %5, %6 : vector<8x512xf32>
    %cst_6 = arith.constant 2.000000e-01 : f32
    %8 = vector.broadcast %cst_6 : f32 to vector<8x512xf32>
    %9 = arith.mulf %8, %5 : vector<8x512xf32>
    %10 = arith.select %7, %5, %9 : vector<8x512xi1>, vector<8x512xf32>
    %11 = arith.truncf %10 : vector<8x512xf32> to vector<8x512xbf16>
    %c0_7 = arith.constant 0 : index
    %c0_8 = arith.constant 0 : index
    %12 = vector.load %arg4[%c0_7, %c0_8] : memref<512x512xbf16, #tpu.memory_space<vmem>>, vector<512x512xbf16>
    %cst_9 = arith.constant dense<0.000000e+00> : vector<8x512xf32>
    %13 = tpu.matmul %11, %12, %cst_9 {dimension_numbers = #tpu.dot_dimension_numbers<[1], [0], [0], [1], [0, 0, 1, 1], [], []>} : vector<8x512xbf16>, vector<512x512xbf16>, vector<8x512xf32> -> vector<8x512xf32>
    %c0_10 = arith.constant 0 : index
    %c0_11 = arith.constant 0 : index
    %14 = vector.load %arg5[%c0_10, %c0_11] : memref<1x512xf32, #tpu.memory_space<vmem>>, vector<1x512xf32>
    %15 = vector.broadcast %14 : vector<1x512xf32> to vector<8x512xf32>
    %16 = arith.addf %13, %15 : vector<8x512xf32>
    %cst_12 = arith.constant 0.000000e+00 : f32
    %17 = vector.broadcast %cst_12 : f32 to vector<8x512xf32>
    %18 = arith.cmpf ogt, %16, %17 : vector<8x512xf32>
    %cst_13 = arith.constant 2.000000e-01 : f32
    %19 = vector.broadcast %cst_13 : f32 to vector<8x512xf32>
    %20 = arith.mulf %19, %16 : vector<8x512xf32>
    %21 = arith.select %18, %16, %20 : vector<8x512xi1>, vector<8x512xf32>
    %22 = arith.truncf %21 : vector<8x512xf32> to vector<8x512xbf16>
    %c0_14 = arith.constant 0 : index
    %c0_15 = arith.constant 0 : index
    %23 = vector.load %arg6[%c0_14, %c0_15] : memref<512x1024xbf16, #tpu.memory_space<vmem>>, vector<512x1024xbf16>
    %cst_16 = arith.constant dense<0.000000e+00> : vector<8x1024xf32>
    %24 = tpu.matmul %22, %23, %cst_16 {dimension_numbers = #tpu.dot_dimension_numbers<[1], [0], [0], [1], [0, 0, 1, 1], [], []>} : vector<8x512xbf16>, vector<512x1024xbf16>, vector<8x1024xf32> -> vector<8x1024xf32>
    %c0_17 = arith.constant 0 : index
    %c0_18 = arith.constant 0 : index
    %25 = vector.load %arg7[%c0_17, %c0_18] : memref<1x1024xf32, #tpu.memory_space<vmem>>, vector<1x1024xf32>
    %26 = vector.broadcast %25 : vector<1x1024xf32> to vector<8x1024xf32>
    %27 = arith.addf %24, %26 : vector<8x1024xf32>
    %cst_19 = arith.constant 0.000000e+00 : f32
    %28 = vector.broadcast %cst_19 : f32 to vector<8x1024xf32>
    %29 = arith.cmpf ogt, %27, %28 : vector<8x1024xf32>
    %cst_20 = arith.constant 2.000000e-01 : f32
    %30 = vector.broadcast %cst_20 : f32 to vector<8x1024xf32>
    %31 = arith.mulf %30, %27 : vector<8x1024xf32>
    %32 = arith.select %29, %27, %31 : vector<8x1024xi1>, vector<8x1024xf32>
    %33 = arith.truncf %32 : vector<8x1024xf32> to vector<8x1024xbf16>
    %c0_21 = arith.constant 0 : index
    %c0_22 = arith.constant 0 : index
    %34 = vector.load %arg8[%c0_21, %c0_22] : memref<1024x128xbf16, #tpu.memory_space<vmem>>, vector<1024x128xbf16>
    %cst_23 = arith.constant dense<0.000000e+00> : vector<8x128xf32>
    %35 = tpu.matmul %33, %34, %cst_23 {dimension_numbers = #tpu.dot_dimension_numbers<[1], [0], [0], [1], [0, 0, 1, 1], [], []>} : vector<8x1024xbf16>, vector<1024x128xbf16>, vector<8x128xf32> -> vector<8x128xf32>
    %c0_24 = arith.constant 0 : index
    %c0_25 = arith.constant 0 : index
    %36 = vector.load %arg9[%c0_24, %c0_25] : memref<1x128xf32, #tpu.memory_space<vmem>>, vector<1x128xf32>
    %37 = vector.broadcast %36 : vector<1x128xf32> to vector<8x128xf32>
    %38 = arith.addf %35, %37 : vector<8x128xf32>
    %39 = arith.negf %38 : vector<8x128xf32>
    %40 = math.exp %39 : vector<8x128xf32>
    %cst_26 = arith.constant 1.000000e+00 : f32
    %41 = vector.broadcast %cst_26 : f32 to vector<8x128xf32>
    %42 = arith.addf %41, %40 : vector<8x128xf32>
    %43 = arith.divf %41, %42 : vector<8x128xf32>
    %c0_27 = arith.constant 0 : index
    %c0_28 = arith.constant 0 : index
    %44 = vector.load %arg10[%c0_27, %c0_28] : memref<8x128xf32, #tpu.memory_space<vmem>>, vector<8x128xf32>
    tpu.vector_store %arg10[%c0_27, %c0_28], %43 {strides = array<i32>} : memref<8x128xf32, #tpu.memory_space<vmem>>, vector<8x128xf32>,
    return
  }
  func.func @transform_0(%arg0: i32) -> (i32, i32) {
    %c0_i32 = arith.constant 0 : i32
    %c0_i32_0 = arith.constant 0 : i32
    return %arg0, %c0_i32 : i32, i32
  }
  func.func @transform_1(%arg0: i32) -> (i32, i32) {
    %c0_i32 = arith.constant 0 : i32
    %c0_i32_0 = arith.constant 0 : i32
    %c0_i32_1 = arith.constant 0 : i32
    return %c0_i32, %c0_i32_0 : i32, i32
  }
  func.func @transform_2(%arg0: i32) -> (i32, i32) {
    %c0_i32 = arith.constant 0 : i32
    %c0_i32_0 = arith.constant 0 : i32
    %c0_i32_1 = arith.constant 0 : i32
    return %c0_i32, %c0_i32_0 : i32, i32
  }
  func.func @transform_3(%arg0: i32) -> (i32, i32) {
    %c0_i32 = arith.constant 0 : i32
    %c0_i32_0 = arith.constant 0 : i32
    %c0_i32_1 = arith.constant 0 : i32
    return %c0_i32, %c0_i32_0 : i32, i32
  }
  func.func @transform_4(%arg0: i32) -> (i32, i32) {
    %c0_i32 = arith.constant 0 : i32
    %c0_i32_0 = arith.constant 0 : i32
    %c0_i32_1 = arith.constant 0 : i32
    return %c0_i32, %c0_i32_0 : i32, i32
  }
  func.func @transform_5(%arg0: i32) -> (i32, i32) {
    %c0_i32 = arith.constant 0 : i32
    %c0_i32_0 = arith.constant 0 : i32
    %c0_i32_1 = arith.constant 0 : i32
    return %c0_i32, %c0_i32_0 : i32, i32
  }
  func.func @transform_6(%arg0: i32) -> (i32, i32) {
    %c0_i32 = arith.constant 0 : i32
    %c0_i32_0 = arith.constant 0 : i32
    %c0_i32_1 = arith.constant 0 : i32
    return %c0_i32, %c0_i32_0 : i32, i32
  }
  func.func @transform_7(%arg0: i32) -> (i32, i32) {
    %c0_i32 = arith.constant 0 : i32
    %c0_i32_0 = arith.constant 0 : i32
    %c0_i32_1 = arith.constant 0 : i32
    return %c0_i32, %c0_i32_0 : i32, i32
  }
  func.func @transform_8(%arg0: i32) -> (i32, i32) {
    %c0_i32 = arith.constant 0 : i32
    %c0_i32_0 = arith.constant 0 : i32
    %c0_i32_1 = arith.constant 0 : i32
    return %c0_i32, %c0_i32_0 : i32, i32
  }
  func.func @transform_9(%arg0: i32) -> (i32, i32) {
    %c0_i32 = arith.constant 0 : i32
    %c0_i32_0 = arith.constant 0 : i32
    return %arg0, %c0_i32 : i32, i32
  }
}

</mosaic_0001>

<bundles_post_ra>
// kernel: discriminator_forward.1
= control target key start
LH: loop header
LB: loop body
LE: loop exit
PB: predicated region body
PF: predicated region fallthrough
CT: control target
= control target key end

     0   :  { %14 = vsyncpa [#allocation3], 0  ;;  %s7181_s0 = inlined_call_operand.vmem [shape: bf16[8,896], index: 0, kind: input, shape index: {}]   ;;  %s7182_s1 = inlined_call_operand.hbm [shape: bf16[896,512], index: 1, kind: input, shape index: {}]   ;;  %s7183_s2 = inlined_call_operand.vmem [shape: f32[1,512], index: 2, kind: input, shape index: {}]   ;;  %s7184_s3 = inlined_call_operand.hbm [shape: bf16[512,512], index: 3, kind: input, shape index: {}]   ;;  %s7185_s4 = inlined_call_operand.vmem [shape: f32[1,512], index: 4, kind: input, shape index: {}]   ;;  %s7186_s5 = inlined_call_operand.hbm [shape: bf16[512,1024], index: 5, kind: input, shape index: {}]   ;;  %s7187_s6 = inlined_call_operand.vmem [shape: f32[1,1024], index: 6, kind: input, shape index: {}]   ;;  %s7188_s7 = inlined_call_operand.hbm [shape: bf16[1024,128], index: 7, kind: input, shape index: {}]   ;;  %s7189_s8 = inlined_call_operand.vmem [shape: f32[1,128], index: 8, kind: input, shape index: {}]   ;;  %s7190_s9 = inlined_call_operand.vmem [shape: f32[8,128], index: 9, kind: output, shape index: {}]  }
   0x1   :  { %15 = vsyncpa [#allocation5], 0 }
   0x2   :  { %16 = vsyncpa [#allocation8], 0  ;;  %s6898_s30 = smov [#allocation4]   ;;  %s6899_s11 = smov [#allocation2]  }
   0x3   :  { %s38_s10 = sshll.u32 %s6898_s30, 4  ;;  %s24_s12 = sshll.u32 %s6899_s11, 4  ;;  %s39_s10 = int_to_ptr.vmem [resolvable:$true] %s38_s10  ;;  %s25_s12 = int_to_ptr.vmem [resolvable:$true] %s24_s12 }
   0x4   :  { %s6820_s13 = scalar_lea.vmem %s39_s10, 16384  ;;  %p6825_p1 = scmp.lt.s32.totalorder %s39_s10, %s39_s10 }
   0x5   :  { %p6821_p0 = scmp.ne.s32.totalorder %s39_s10, %s6820_s13  ;;  %p6826_p2 = scmp.lt.s32.totalorder %s6820_s13, %s6820_s13 }
   0x7   :  { %p6827_p3 = por %p6826_p2, %p6825_p1 }
   0x9   :  { %p6828_p4 = pnand %p6827_p3, %p6821_p0 }
   0xb   :  { %6831 = shalt.err (!%p6828_p4)
}
   0xc   :  { %s6900_s14 = smov 256   ;;  %s6901_s15 = smov 16  }
   0xd   :  { %44 = dma.hbm_to_vmem [thread:$0]  %s7184_s3, 16384, %s39_s10, [#allocation5], %s6900_s14, %s6900_s14, %s6901_s15  }
   0xe   :  { %s6840_s18 = scalar_lea.vmem %s25_s12, 28672  ;;  %p6845_p6 = scmp.lt.s32.totalorder %s25_s12, %s25_s12 }
   0xf   :  { %p6841_p5 = scmp.ne.s32.totalorder %s25_s12, %s6840_s18  ;;  %p6846_p7 = scmp.lt.s32.totalorder %s6840_s18, %s6840_s18 }
  0x11   :  { %p6847_p8 = por %p6846_p7, %p6845_p6 }
  0x13   :  { %p6848_p9 = pnand %p6847_p8, %p6841_p5 }
  0x15   :  { %6851 = shalt.err (!%p6848_p9)
}
  0x16   :  { %30 = dma.hbm_to_vmem [thread:$0]  %s7182_s1, 28672, %s25_s12, [#allocation3], %s6900_s14, %s6900_s14, %s6901_s15  }
  0x17   :  { %s6902_s21 = smov [#allocation6]  }
  0x18   :  { %s52_s22 = sshll.u32 %s6902_s21, 4  ;;  %s53_s22 = int_to_ptr.vmem [resolvable:$true] %s52_s22 }
  0x19   :  { %s6860_s23 = scalar_lea.vmem %s53_s22, 32768  ;;  %p6865_p11 = scmp.lt.s32.totalorder %s53_s22, %s53_s22 }
  0x1a   :  { %p6861_p10 = scmp.ne.s32.totalorder %s53_s22, %s6860_s23  ;;  %p6866_p12 = scmp.lt.s32.totalorder %s6860_s23, %s6860_s23 }
  0x1c   :  { %p6867_p13 = por %p6866_p12, %p6865_p11 }
  0x1e   :  { %p6868_p0 = pnand %p6867_p13, %p6861_p10 }
  0x20   :  { %6871 = shalt.err (!%p6868_p0)
}
  0x21   :  { %s6903_s3 = smov 512   ;;  %s6904_s24 = smov 32  }
  0x22   :  { %58 = dma.hbm_to_vmem [thread:$0]  %s7186_s5, 32768, %s53_s22, [#allocation5], %s6903_s3, %s6903_s3, %s6904_s24  }
  0x23   :  { %s6905_s27 = smov [#allocation7]  }
  0x24   :  { %s66_s28 = sshll.u32 %s6905_s27, 4  ;;  %s67_s28 = int_to_ptr.vmem [resolvable:$true] %s66_s28 }
  0x25   :  { %s6880_s1 = scalar_lea.vmem %s67_s28, 8192  ;;  %p6885_p2 = scmp.lt.s32.totalorder %s67_s28, %s67_s28 }
  0x26   :  { %p6881_p1 = scmp.ne.s32.totalorder %s67_s28, %s6880_s1  ;;  %p6886_p3 = scmp.lt.s32.totalorder %s6880_s1, %s6880_s1 }
  0x28   :  { %p6887_p4 = por %p6886_p3, %p6885_p2 }
  0x2a   :  { %p6888_p5 = pnand %p6887_p4, %p6881_p1 }
  0x2c   :  { %6891 = shalt.err (!%p6888_p5)
}
  0x2d   :  { %s6906_s29 = smov 64   ;;  %s6907_s30 = smov 4  }
  0x2e   :  { %72 = dma.hbm_to_vmem [thread:$0]  %s7188_s7, 8192, %s67_s28, [#allocation8], %s6906_s29, %s6906_s29, %s6907_s30  }
  0x2f   :  { %6892 = dma.done.wait [#allocation3], 28672  }
  0x30   :  { %6893 = vsyncadd [#allocation3], 4294938624 }
  0x31   :  { %6894 = dma.done.wait [#allocation5], 49152  }
  0x32   :  { %6895 = vsyncadd [#allocation5], 4294918144 }
  0x33   :  { %6896 = dma.done.wait [#allocation8], 8192  }
  0x34   :  { %6897 = vsyncadd [#allocation8], 4294959104  ;;  %v6208_v0 = vld [vmem:[#allocation2 + $0xe4] ss:$16 sps:$4 sm:$0xff]   ;;  %v6212_v2 = vld [vmem:[#allocation2 + $0xe0] ss:$16 sps:$4 sm:$0xff]  }
  0x35   :  { %v6210_v1 = vld [vmem:[#allocation2 + $0x2e4] ss:$16 sps:$4 sm:$0xff]   ;;  %1483 = vmatprep.subr.bf16.mxu0 %v6208_v0  ;;  %v6213_v3 = vld [vmem:[#allocation2 + $0x2e0] ss:$16 sps:$4 sm:$0xff]   ;;  %v89_v48 = vld [vmem:[%s7181_s0 + $0x8] sm:$0xff] }
  0x36   :  { %1524 = vmatprep.subr.bf16.mxu1 %v6210_v1  ;;  %v6214_v4 = vld [vmem:[#allocation2 + $0xc4] ss:$16 sps:$4 sm:$0xff]   ;;  %1484 = vmatpush1.bf16.msra.mxu0 %v6212_v2  ;;  %v6218_v6 = vld [vmem:[#allocation2 + $0xc0] ss:$16 sps:$4 sm:$0xff]   ;;  %v6979_v51 = vcombine.high %v89_v48, %v89_v48 }
  0x37   :  { %1525 = vmatpush1.bf16.msra.mxu1 %v6213_v3  ;;  %v6216_v5 = vld [vmem:[#allocation2 + $0x2c4] ss:$16 sps:$4 sm:$0xff]   ;;  %1485 = vmatprep.subr.bf16.mxu0 %v6214_v4  ;;  %v6219_v7 = vld [vmem:[#allocation2 + $0x2c0] ss:$16 sps:$4 sm:$0xff]  }
  0x38   :  { %1526 = vmatprep.subr.bf16.mxu1 %v6216_v5  ;;  %v6220_v8 = vld [vmem:[#allocation2 + $0xa4] ss:$16 sps:$4 sm:$0xff]   ;;  %v6224_v10 = vld [vmem:[#allocation2 + $0xa0] ss:$16 sps:$4 sm:$0xff]   ;;  %1556 = vmatprep.mubr.bf16.mxu1 %v6979_v51 }
  0x39   :  { %v6222_v9 = vld [vmem:[#allocation2 + $0x2a4] ss:$16 sps:$4 sm:$0xff]   ;;  %v6225_v11 = vld [vmem:[#allocation2 + $0x2a0] ss:$16 sps:$4 sm:$0xff]  }
  0x3a   :  { %1486 = vmatpush1.bf16.msra.mxu0 %v6218_v6  ;;  %v6226_v12 = vld [vmem:[#allocation2 + $0x84] ss:$16 sps:$4 sm:$0xff]   ;;  %v6230_v14 = vld [vmem:[#allocation2 + $0x80] ss:$16 sps:$4 sm:$0xff]  }
  0x3b   :  { %1527 = vmatpush1.bf16.msra.mxu1 %v6219_v7  ;;  %1487 = vmatprep.subr.bf16.mxu0 %v6220_v8  ;;  %v6228_v13 = vld [vmem:[#allocation2 + $0x284] ss:$16 sps:$4 sm:$0xff]   ;;  %v6231_v15 = vld [vmem:[#allocation2 + $0x280] ss:$16 sps:$4 sm:$0xff]   ;;  %v6985_v7 = vcombine.low %v89_v48, %v89_v48  ;;  %v6368_v48 = vld [vmem:[#allocation2 + $0xcc] ss:$16 sps:$4 sm:$0xff]  }
  0x3c   :  { %1528 = vmatprep.subr.bf16.mxu1 %v6222_v9  ;;  %v6232_v16 = vld [vmem:[#allocation2 + $0x64] ss:$16 sps:$4 sm:$0xff]   ;;  %v6236_v18 = vld [vmem:[#allocation2 + $0x60] ss:$16 sps:$4 sm:$0xff]  }
  0x3d   :  { %v6234_v17 = vld [vmem:[#allocation2 + $0x264] ss:$16 sps:$4 sm:$0xff]   ;;  %v6237_v19 = vld [vmem:[#allocation2 + $0x260] ss:$16 sps:$4 sm:$0xff]  }
  0x3e   :  { %1488 = vmatpush1.bf16.msra.mxu0 %v6224_v10  ;;  %v6238_v20 = vld [vmem:[#allocation2 + $0x44] ss:$16 sps:$4 sm:$0xff]   ;;  %v6242_v22 = vld [vmem:[#allocation2 + $0x40] ss:$16 sps:$4 sm:$0xff]  }
  0x3f   :  { %1529 = vmatpush1.bf16.msra.mxu1 %v6225_v11  ;;  %1489 = vmatprep.subr.bf16.mxu0 %v6226_v12  ;;  %v6240_v21 = vld [vmem:[#allocation2 + $0x244] ss:$16 sps:$4 sm:$0xff]   ;;  %v6243_v23 = vld [vmem:[#allocation2 + $0x240] ss:$16 sps:$4 sm:$0xff]  }
  0x40   :  { %1530 = vmatprep.subr.bf16.mxu1 %v6228_v13  ;;  %v6244_v24 = vld [vmem:[#allocation2 + $0x24] ss:$16 sps:$4 sm:$0xff]   ;;  %v6248_v26 = vld [vmem:[#allocation2 + $0x20] ss:$16 sps:$4 sm:$0xff]  }
  0x41   :  { %v6246_v25 = vld [vmem:[#allocation2 + $0x224] ss:$16 sps:$4 sm:$0xff]   ;;  %v6249_v27 = vld [vmem:[#allocation2 + $0x220] ss:$16 sps:$4 sm:$0xff]  }
  0x42   :  { %1490 = vmatpush1.bf16.msra.mxu0 %v6230_v14  ;;  %v6250_v28 = vld [vmem:[#allocation2 + $0x4] ss:$16 sps:$4 sm:$0xff]   ;;  %v6254_v30 = vld [vmem:[#allocation2] ss:$16 sps:$4 sm:$0xff]  }
  0x43   :  { %1531 = vmatpush1.bf16.msra.mxu1 %v6231_v15  ;;  %1491 = vmatprep.subr.bf16.mxu0 %v6232_v16  ;;  %v6252_v29 = vld [vmem:[#allocation2 + $0x204] ss:$16 sps:$4 sm:$0xff]   ;;  %v6255_v31 = vld [vmem:[#allocation2 + $0x200] ss:$16 sps:$4 sm:$0xff]   ;;  %v6908_v16 = vmov 0  }
  0x44   :  { %1532 = vmatprep.subr.bf16.mxu1 %v6234_v17  ;;  %v6256_v32 = vld [vmem:[#allocation2 + $0x1e4] ss:$16 sps:$4 sm:$0xff]   ;;  %v6260_v34 = vld [vmem:[#allocation2 + $0x1e0] ss:$16 sps:$4 sm:$0xff]  }
  0x45   :  { %v6258_v33 = vld [vmem:[#allocation2 + $0x3e4] ss:$16 sps:$4 sm:$0xff]   ;;  %v6261_v35 = vld [vmem:[#allocation2 + $0x3e0] ss:$16 sps:$4 sm:$0xff]  }
  0x46   :  { %1492 = vmatpush1.bf16.msra.mxu0 %v6236_v18  ;;  %v6262_v36 = vld [vmem:[#allocation2 + $0x1c4] ss:$16 sps:$4 sm:$0xff]   ;;  %v6266_v38 = vld [vmem:[#allocation2 + $0x1c0] ss:$16 sps:$4 sm:$0xff]  }
  0x47   :  { %1533 = vmatpush1.bf16.msra.mxu1 %v6237_v19  ;;  %1493 = vmatprep.subr.bf16.mxu0 %v6238_v20  ;;  %v6264_v37 = vld [vmem:[#allocation2 + $0x3c4] ss:$16 sps:$4 sm:$0xff]   ;;  %v6267_v39 = vld [vmem:[#allocation2 + $0x3c0] ss:$16 sps:$4 sm:$0xff]  }
  0x48   :  { %1534 = vmatprep.subr.bf16.mxu1 %v6240_v21  ;;  %v6268_v40 = vld [vmem:[#allocation2 + $0x1a4] ss:$16 sps:$4 sm:$0xff]   ;;  %v6272_v42 = vld [vmem:[#allocation2 + $0x1a0] ss:$16 sps:$4 sm:$0xff]  }
  0x49   :  { %v6270_v41 = vld [vmem:[#allocation2 + $0x3a4] ss:$16 sps:$4 sm:$0xff]   ;;  %v6273_v43 = vld [vmem:[#allocation2 + $0x3a0] ss:$16 sps:$4 sm:$0xff]  }
  0x4a   :  { %1494 = vmatpush1.bf16.msra.mxu0 %v6242_v22  ;;  %v6274_v44 = vld [vmem:[#allocation2 + $0x184] ss:$16 sps:$4 sm:$0xff]   ;;  %v6278_v49 = vld [vmem:[#allocation2 + $0x180] ss:$16 sps:$4 sm:$0xff]  }
  0x4b   :  { %1535 = vmatpush1.bf16.msra.mxu1 %v6243_v23  ;;  %1495 = vmatprep.subr.bf16.mxu0 %v6244_v24  ;;  %v6276_v45 = vld [vmem:[#allocation2 + $0x384] ss:$16 sps:$4 sm:$0xff]   ;;  %v6279_v50 = vld [vmem:[#allocation2 + $0x380] ss:$16 sps:$4 sm:$0xff]  }
  0x4c   :  { %1536 = vmatprep.subr.bf16.mxu1 %v6246_v25  ;;  %v88_v46 = vld [vmem:[%s7181_s0] sm:$0xff] }
  0x4d   :  { %v6974_v47 = vcombine.high %v88_v46, %v88_v46  ;;  %v6280_v52 = vld [vmem:[#allocation2 + $0x164] ss:$16 sps:$4 sm:$0xff]   ;;  %v6284_v54 = vld [vmem:[#allocation2 + $0x160] ss:$16 sps:$4 sm:$0xff]   ;;  %v6983_v6 = vcombine.low %v88_v46, %v88_v46 }
  0x4e   :  { %1496 = vmatpush1.bf16.msra.mxu0 %v6248_v26  ;;  %v6282_v53 = vld [vmem:[#allocation2 + $0x364] ss:$16 sps:$4 sm:$0xff]   ;;  %v6285_v55 = vld [vmem:[#allocation2 + $0x360] ss:$16 sps:$4 sm:$0xff]  }
  0x4f   :  { %1537 = vmatpush1.bf16.msra.mxu1 %v6249_v27  ;;  %1497 = vmatprep.subr.bf16.mxu0 %v6250_v28  ;;  %v6286_v56 = vld [vmem:[#allocation2 + $0x144] ss:$16 sps:$4 sm:$0xff]   ;;  %v6290_v58 = vld [vmem:[#allocation2 + $0x140] ss:$16 sps:$4 sm:$0xff]  }
  0x50   :  { %1538 = vmatprep.subr.bf16.mxu1 %v6252_v29  ;;  %1515 = vmatprep.mubr.bf16.mxu0 %v6974_v47  ;;  %v6288_v57 = vld [vmem:[#allocation2 + $0x344] ss:$16 sps:$4 sm:$0xff]   ;;  %v6291_v59 = vld [vmem:[#allocation2 + $0x340] ss:$16 sps:$4 sm:$0xff]  }
  0x51   :  { %v6292_v60 = vld [vmem:[#allocation2 + $0x124] ss:$16 sps:$4 sm:$0xff]   ;;  %v6296_v62 = vld [vmem:[#allocation2 + $0x120] ss:$16 sps:$4 sm:$0xff]  }
  0x52   :  { %1498 = vmatpush1.bf16.msra.mxu0 %v6254_v30  ;;  %v6294_v61 = vld [vmem:[#allocation2 + $0x324] ss:$16 sps:$4 sm:$0xff]   ;;  %v6297_v63 = vld [vmem:[#allocation2 + $0x320] ss:$16 sps:$4 sm:$0xff]  }
  0x53   :  { %1539 = vmatpush1.bf16.msra.mxu1 %v6255_v31  ;;  %1499 = vmatprep.subr.bf16.mxu0 %v6256_v32  ;;  %v6298_v0 = vld [vmem:[#allocation2 + $0x104] ss:$16 sps:$4 sm:$0xff]   ;;  %v6302_v2 = vld [vmem:[#allocation2 + $0x100] ss:$16 sps:$4 sm:$0xff]  }
  0x54   :  { %1540 = vmatprep.subr.bf16.mxu1 %v6258_v33  ;;  %v6300_v1 = vld [vmem:[#allocation2 + $0x304] ss:$16 sps:$4 sm:$0xff]   ;;  %v6303_v3 = vld [vmem:[#allocation2 + $0x300] ss:$16 sps:$4 sm:$0xff]  }
  0x55   :  { %v6310_v4 = vld [vmem:[#allocation2 + $0x4e4] ss:$16 sps:$4 sm:$0xff]   ;;  %v6308_v8 = vld [vmem:[#allocation2 + $0x4e0] ss:$16 sps:$4 sm:$0xff]  }
  0x56   :  { %1500 = vmatpush2.bf16.msra.mxu0 %v6260_v34  ;;  %v6313_v5 = vld [vmem:[#allocation2 + $0x6e4] ss:$16 sps:$4 sm:$0xff]   ;;  %v6311_v9 = vld [vmem:[#allocation2 + $0x6e0] ss:$16 sps:$4 sm:$0xff]  }
  0x57   :  { %1541 = vmatpush2.bf16.msra.mxu1 %v6261_v35  ;;  %1501 = vmatprep.subr.bf16.mxu0 %v6262_v36  ;;  %v6316_v10 = vld [vmem:[#allocation2 + $0x4c4] ss:$16 sps:$4 sm:$0xff]   ;;  %v6314_v12 = vld [vmem:[#allocation2 + $0x4c0] ss:$16 sps:$4 sm:$0xff]  }
  0x58   :  { %1542 = vmatprep.subr.bf16.mxu1 %v6264_v37  ;;  %v6319_v11 = vld [vmem:[#allocation2 + $0x6c4] ss:$16 sps:$4 sm:$0xff]   ;;  %v6317_v13 = vld [vmem:[#allocation2 + $0x6c0] ss:$16 sps:$4 sm:$0xff]  }
  0x59   :  { %v6322_v14 = vld [vmem:[#allocation2 + $0x4a4] ss:$16 sps:$4 sm:$0xff]   ;;  %v6320_v17 = vld [vmem:[#allocation2 + $0x4a0] ss:$16 sps:$4 sm:$0xff]  }
  0x5a   :  { %1502 = vmatpush2.bf16.msra.mxu0 %v6266_v38  ;;  %v6325_v15 = vld [vmem:[#allocation2 + $0x6a4] ss:$16 sps:$4 sm:$0xff]   ;;  %v6323_v18 = vld [vmem:[#allocation2 + $0x6a0] ss:$16 sps:$4 sm:$0xff]  }
  0x5b   :  { %1543 = vmatpush2.bf16.msra.mxu1 %v6267_v39  ;;  %1503 = vmatprep.subr.bf16.mxu0 %v6268_v40  ;;  %v6328_v19 = vld [vmem:[#allocation2 + $0x484] ss:$16 sps:$4 sm:$0xff]   ;;  %v6326_v21 = vld [vmem:[#allocation2 + $0x480] ss:$16 sps:$4 sm:$0xff]  }
  0x5c   :  { %1544 = vmatprep.subr.bf16.mxu1 %v6270_v41  ;;  %v6331_v20 = vld [vmem:[#allocation2 + $0x684] ss:$16 sps:$4 sm:$0xff]   ;;  %v6329_v22 = vld [vmem:[#allocation2 + $0x680] ss:$16 sps:$4 sm:$0xff]  }
  0x5d   :  { %v6334_v23 = vld [vmem:[#allocation2 + $0x464] ss:$16 sps:$4 sm:$0xff]   ;;  %v6332_v25 = vld [vmem:[#allocation2 + $0x460] ss:$16 sps:$4 sm:$0xff]  }
  0x5e   :  { %1504 = vmatpush2.bf16.msra.mxu0 %v6272_v42  ;;  %v6337_v24 = vld [vmem:[#allocation2 + $0x664] ss:$16 sps:$4 sm:$0xff]   ;;  %v6335_v26 = vld [vmem:[#allocation2 + $0x660] ss:$16 sps:$4 sm:$0xff]   ;;  %v6362_v42 = vld [vmem:[#allocation2 + $0xec] ss:$16 sps:$4 sm:$0xff]  }
  0x5f   :  { %1545 = vmatpush2.bf16.msra.mxu1 %v6273_v43  ;;  %1505 = vmatprep.subr.bf16.mxu0 %v6274_v44  ;;  %v6340_v27 = vld [vmem:[#allocation2 + $0x444] ss:$16 sps:$4 sm:$0xff]   ;;  %v6338_v29 = vld [vmem:[#allocation2 + $0x440] ss:$16 sps:$4 sm:$0xff]   ;;  %v6359_v44 = vld [vmem:[%s7181_s0 + $0x18] ss:$0 sps:$4 sm:$0xff]  }
  0x60   :  { %1546 = vmatprep.subr.bf16.mxu1 %v6276_v45  ;;  %v6343_v28 = vld [vmem:[#allocation2 + $0x644] ss:$16 sps:$4 sm:$0xff]   ;;  %v6341_v30 = vld [vmem:[#allocation2 + $0x640] ss:$16 sps:$4 sm:$0xff]   ;;  %v6360_v45 = vld [vmem:[#allocation2 + $0xe8] ss:$16 sps:$4 sm:$0xff]  }
  0x61   :  { %v6346_v31 = vld [vmem:[#allocation2 + $0x424] ss:$16 sps:$4 sm:$0xff]   ;;  %v6344_v34 = vld [vmem:[#allocation2 + $0x420] ss:$16 sps:$4 sm:$0xff]  }
  0x62   :  { %1506 = vmatpush2.bf16.msra.mxu0 %v6278_v49  ;;  %v6349_v32 = vld [vmem:[#allocation2 + $0x624] ss:$16 sps:$4 sm:$0xff]   ;;  %v6347_v36 = vld [vmem:[#allocation2 + $0x620] ss:$16 sps:$4 sm:$0xff]  }
  0x63   :  { %1547 = vmatpush2.bf16.msra.mxu1 %v6279_v50  ;;  %1507 = vmatprep.subr.bf16.mxu0 %v6280_v52  ;;  %v6993_v33 = vld [vmem:[%s7181_s0 + $0x10] sm:$0xff]  ;;  %v6366_v50 = vld [vmem:[#allocation2 + $0xc8] ss:$16 sps:$4 sm:$0xff]  }
  0x64   :  { %1548 = vmatprep.subr.bf16.mxu1 %v6282_v53  ;;  %v6997_v35 = vcombine.high %v6993_v33, %v6993_v33  ;;  %v6352_v37 = vld [vmem:[#allocation2 + $0x404] ss:$16 sps:$4 sm:$0xff]   ;;  %v6350_v39 = vld [vmem:[#allocation2 + $0x400] ss:$16 sps:$4 sm:$0xff]   ;;  %v6374_v53 = vld [vmem:[#allocation2 + $0xac] ss:$16 sps:$4 sm:$0xff]  }
  0x65   :  { %v6355_v38 = vld [vmem:[#allocation2 + $0x604] ss:$16 sps:$4 sm:$0xff]   ;;  %v6353_v40 = vld [vmem:[#allocation2 + $0x600] ss:$16 sps:$4 sm:$0xff]  }
  0x66   :  { %1508 = vmatpush2.bf16.msra.mxu0 %v6284_v54  ;;  %v6358_v41 = vld [vmem:[#allocation2 + $0x5e4] ss:$16 sps:$4 sm:$0xff]   ;;  %v6356_v43 = vld [vmem:[#allocation2 + $0x5e0] ss:$16 sps:$4 sm:$0xff]  }
  0x67   :  { %1549 = vmatpush2.bf16.msra.mxu1 %v6285_v55  ;;  %1509 = vmatprep.subr.bf16.mxu0 %v6286_v56  ;;  %v6365_v46 = vld [vmem:[#allocation2 + $0x5c4] ss:$16 sps:$4 sm:$0xff]   ;;  %v6363_v49 = vld [vmem:[#allocation2 + $0x5c0] ss:$16 sps:$4 sm:$0xff]   ;;  %v6372_v55 = vld [vmem:[#allocation2 + $0xa8] ss:$16 sps:$4 sm:$0xff]  }
  0x68   :  { %1550 = vmatprep.subr.bf16.mxu1 %v6288_v57  ;;  %v6371_v52 = vld [vmem:[#allocation2 + $0x5a4] ss:$16 sps:$4 sm:$0xff]   ;;  %v6369_v54 = vld [vmem:[#allocation2 + $0x5a0] ss:$16 sps:$4 sm:$0xff]   ;;  %v6380_v57 = vld [vmem:[#allocation2 + $0x8c] ss:$16 sps:$4 sm:$0xff]  }
  0x69   :  { %v6377_v56 = vld [vmem:[#allocation2 + $0x584] ss:$16 sps:$4 sm:$0xff]  }
  0x6a   :  { %1510 = vmatpush2.bf16.msra.mxu0 %v6290_v58  ;;  %v6375_v58 = vld [vmem:[#allocation2 + $0x580] ss:$16 sps:$4 sm:$0xff]  }
  0x6b   :  { %1551 = vmatpush2.bf16.msra.mxu1 %v6291_v59  ;;  %1511 = vmatprep.subr.bf16.mxu0 %v6292_v60  ;;  %v6378_v59 = vld [vmem:[#allocation2 + $0x88] ss:$16 sps:$4 sm:$0xff]   ;;  %v6383_v60 = vld [vmem:[#allocation2 + $0x564] ss:$16 sps:$4 sm:$0xff]  }
  0x6c   :  { %1552 = vmatprep.subr.bf16.mxu1 %v6294_v61  ;;  %v6386_v61 = vld [vmem:[#allocation2 + $0x6c] ss:$16 sps:$4 sm:$0xff]  }
  0x6e   :  { %1512 = vmatpush2.bf16.msra.mxu0 %v6296_v62  ;;  %v6381_v62 = vld [vmem:[#allocation2 + $0x560] ss:$16 sps:$4 sm:$0xff]  }
  0x6f   :  { %1553 = vmatpush2.bf16.msra.mxu1 %v6297_v63  ;;  %1513 = vmatprep.subr.bf16.mxu0 %v6298_v0  ;;  %v6389_v63 = vld [vmem:[#allocation2 + $0x544] ss:$16 sps:$4 sm:$0xff]   ;;  %v6392_v0 = vld [vmem:[#allocation2 + $0x4c] ss:$16 sps:$4 sm:$0xff]  }
  0x70   :  { %1554 = vmatprep.subr.bf16.mxu1 %v6300_v1  ;;  %v6387_v1 = vld [vmem:[#allocation2 + $0x540] ss:$16 sps:$4 sm:$0xff]  }
  0x72   :  { %1514 = vmatpush2.bf16.msra.mxu0 %v6302_v2  ;;  %v6390_v2 = vld [vmem:[#allocation2 + $0x48] ss:$16 sps:$4 sm:$0xff]  }
  0x73   :  { %1555 = vmatpush2.bf16.msra.mxu1 %v6303_v3  ;;  %1565 = vmatprep.subr.bf16.mxu0 %v6310_v4  ;;  %v6395_v3 = vld [vmem:[#allocation2 + $0x524] ss:$16 sps:$4 sm:$0xff]   ;;  %v6398_v4 = vld [vmem:[#allocation2 + $0x2c] ss:$16 sps:$4 sm:$0xff]  }
  0x74   :  { %1606 = vmatprep.subr.bf16.mxu1 %v6313_v5  ;;  %v6393_v5 = vld [vmem:[#allocation2 + $0x520] ss:$16 sps:$4 sm:$0xff]  }
  0x75   :  { %1516 = vmatmul.mubr.bf16.vlgmr.msra.gmra.mxu0 %v6983_v6 }
  0x76   :  { %1557 = vmatmul.mubr.bf16.vlgmr.msra.gmra.mxu1 %v6985_v7  ;;  %1566 = vmatpush1.bf16.msra.mxu0 %v6308_v8  ;;  %v6396_v8 = vld [vmem:[#allocation2 + $0x28] ss:$16 sps:$4 sm:$0xff]  }
  0x77   :  { %1607 = vmatpush1.bf16.msra.mxu1 %v6311_v9  ;;  %1567 = vmatprep.subr.bf16.mxu0 %v6316_v10  ;;  %v6401_v9 = vld [vmem:[#allocation2 + $0x504] ss:$16 sps:$4 sm:$0xff]   ;;  %v6404_v10 = vld [vmem:[#allocation2 + $0xc] ss:$16 sps:$4 sm:$0xff]  }
  0x78   :  { %1608 = vmatprep.subr.bf16.mxu1 %v6319_v11  ;;  %1638 = vmatprep.mubr.bf16.mxu1 %v6908_v16  ;;  %v6399_v11 = vld [vmem:[#allocation2 + $0x500] ss:$16 sps:$4 sm:$0xff]  }
  0x79   :  { %1597 = vmatprep.mubr.bf16.mxu0 %v6997_v35 }
  0x7a   :  { %1568 = vmatpush1.bf16.msra.mxu0 %v6314_v12  ;;  %v6402_v12 = vld [vmem:[#allocation2 + $0x8] ss:$16 sps:$4 sm:$0xff]  }
  0x7b   :  { %1609 = vmatpush1.bf16.msra.mxu1 %v6317_v13  ;;  %1569 = vmatprep.subr.bf16.mxu0 %v6322_v14  ;;  %v6409_v13 = vld [vmem:[#allocation2 + $0x1ec] ss:$16 sps:$4 sm:$0xff]  }
  0x7c   :  { %1610 = vmatprep.subr.bf16.mxu1 %v6325_v15  ;;  %v6412_v14 = vld [vmem:[#allocation2 + $0x2ec] ss:$16 sps:$4 sm:$0xff]   ;;  %v7006_v15 = vcombine.low %v6993_v33, %v6993_v33  ;;  %v6431_v33 = vld [vmem:[#allocation2 + $0x168] ss:$16 sps:$4 sm:$0xff]  }
  0x7e   :  { %1570 = vmatpush1.bf16.msra.mxu0 %v6320_v17  ;;  %v6407_v17 = vld [vmem:[#allocation2 + $0x1e8] ss:$16 sps:$4 sm:$0xff]  }
  0x7f   :  { %1611 = vmatpush1.bf16.msra.mxu1 %v6323_v18  ;;  %1571 = vmatprep.subr.bf16.mxu0 %v6328_v19  ;;  %v6410_v18 = vld [vmem:[#allocation2 + $0x2e8] ss:$16 sps:$4 sm:$0xff]   ;;  %v6415_v19 = vld [vmem:[#allocation2 + $0x1cc] ss:$16 sps:$4 sm:$0xff]  }
  0x80   :  { %1612 = vmatprep.subr.bf16.mxu1 %v6331_v20  ;;  %v6418_v20 = vld [vmem:[#allocation2 + $0x2cc] ss:$16 sps:$4 sm:$0xff]  }
  0x82   :  { %1572 = vmatpush1.bf16.msra.mxu0 %v6326_v21  ;;  %v6413_v21 = vld [vmem:[#allocation2 + $0x1c8] ss:$16 sps:$4 sm:$0xff]  }
  0x83   :  { %1613 = vmatpush1.bf16.msra.mxu1 %v6329_v22  ;;  %1573 = vmatprep.subr.bf16.mxu0 %v6334_v23  ;;  %v6416_v22 = vld [vmem:[#allocation2 + $0x2c8] ss:$16 sps:$4 sm:$0xff]   ;;  %v6421_v23 = vld [vmem:[#allocation2 + $0x1ac] ss:$16 sps:$4 sm:$0xff]  }
  0x84   :  { %1614 = vmatprep.subr.bf16.mxu1 %v6337_v24  ;;  %v6424_v24 = vld [vmem:[#allocation2 + $0x2ac] ss:$16 sps:$4 sm:$0xff]  }
  0x86   :  { %1574 = vmatpush1.bf16.msra.mxu0 %v6332_v25  ;;  %v6419_v25 = vld [vmem:[#allocation2 + $0x1a8] ss:$16 sps:$4 sm:$0xff]  }
  0x87   :  { %1615 = vmatpush1.bf16.msra.mxu1 %v6335_v26  ;;  %1575 = vmatprep.subr.bf16.mxu0 %v6340_v27  ;;  %v6422_v26 = vld [vmem:[#allocation2 + $0x2a8] ss:$16 sps:$4 sm:$0xff]   ;;  %v6427_v27 = vld [vmem:[#allocation2 + $0x18c] ss:$16 sps:$4 sm:$0xff]  }
  0x88   :  { %1616 = vmatprep.subr.bf16.mxu1 %v6343_v28  ;;  %v6430_v28 = vld [vmem:[#allocation2 + $0x28c] ss:$16 sps:$4 sm:$0xff]  }
  0x8a   :  { %1576 = vmatpush1.bf16.msra.mxu0 %v6338_v29  ;;  %v6425_v29 = vld [vmem:[#allocation2 + $0x188] ss:$16 sps:$4 sm:$0xff]  }
  0x8b   :  { %1617 = vmatpush1.bf16.msra.mxu1 %v6341_v30  ;;  %1577 = vmatprep.subr.bf16.mxu0 %v6346_v31  ;;  %v6428_v30 = vld [vmem:[#allocation2 + $0x288] ss:$16 sps:$4 sm:$0xff]   ;;  %v6433_v31 = vld [vmem:[#allocation2 + $0x16c] ss:$16 sps:$4 sm:$0xff]  }
  0x8c   :  { %1618 = vmatprep.subr.bf16.mxu1 %v6349_v32  ;;  %v6436_v32 = vld [vmem:[#allocation2 + $0x26c] ss:$16 sps:$4 sm:$0xff]  }
  0x8e   :  { %1578 = vmatpush1.bf16.msra.mxu0 %v6344_v34  ;;  %v6439_v34 = vld [vmem:[#allocation2 + $0x14c] ss:$16 sps:$4 sm:$0xff]  }
  0x8f   :  { %1619 = vmatpush1.bf16.msra.mxu1 %v6347_v36  ;;  %1579 = vmatprep.subr.bf16.mxu0 %v6352_v37  ;;  %v6442_v36 = vld [vmem:[#allocation2 + $0x24c] ss:$16 sps:$4 sm:$0xff]   ;;  %v6437_v37 = vld [vmem:[#allocation2 + $0x148] ss:$16 sps:$4 sm:$0xff]  }
  0x90   :  { %1620 = vmatprep.subr.bf16.mxu1 %v6355_v38  ;;  %v6440_v38 = vld [vmem:[#allocation2 + $0x248] ss:$16 sps:$4 sm:$0xff]  }
  0x92   :  { %1580 = vmatpush1.bf16.msra.mxu0 %v6350_v39  ;;  %v6445_v39 = vld [vmem:[#allocation2 + $0x12c] ss:$16 sps:$4 sm:$0xff]  }
  0x93   :  { %1621 = vmatpush1.bf16.msra.mxu1 %v6353_v40  ;;  %1581 = vmatprep.subr.bf16.mxu0 %v6358_v41  ;;  %v6448_v40 = vld [vmem:[#allocation2 + $0x22c] ss:$16 sps:$4 sm:$0xff]   ;;  %v6443_v41 = vld [vmem:[#allocation2 + $0x128] ss:$16 sps:$4 sm:$0xff]  }
  0x94   :  { %1647 = vmatprep.subr.bf16.mxu1 %v6362_v42  ;;  %v6446_v42 = vld [vmem:[#allocation2 + $0x228] ss:$16 sps:$4 sm:$0xff]  }
  0x96   :  { %1639 = vmatmul.mubr.bf16.vlgmr.msra.gmra.mxu1 %v6359_v44  ;;  %1582 = vmatpush2.bf16.msra.mxu0 %v6356_v43  ;;  %v6451_v43 = vld [vmem:[#allocation2 + $0x10c] ss:$16 sps:$4 sm:$0xff]  }
  0x97   :  { %1648 = vmatpush1.bf16.msra.mxu1 %v6360_v45  ;;  %1583 = vmatprep.subr.bf16.mxu0 %v6365_v46  ;;  %v6454_v44 = vld [vmem:[#allocation2 + $0x20c] ss:$16 sps:$4 sm:$0xff]   ;;  %v6449_v45 = vld [vmem:[#allocation2 + $0x108] ss:$16 sps:$4 sm:$0xff]  }
  0x98   :  { %1649 = vmatprep.subr.bf16.mxu1 %v6368_v48  ;;  %1679 = vmatprep.mubr.bf16.mxu1 %v6974_v47  ;;  %v6384_v47 = vld [vmem:[#allocation2 + $0x68] ss:$16 sps:$4 sm:$0xff]   ;;  %v6457_v48 = vld [vmem:[#allocation2 + $0x3ec] ss:$16 sps:$4 sm:$0xff]  }
  0x99   :  { %v6452_v46 = vld [vmem:[#allocation2 + $0x208] ss:$16 sps:$4 sm:$0xff]  }
  0x9a   :  { %1584 = vmatpush2.bf16.msra.mxu0 %v6363_v49  ;;  %v6460_v49 = vld [vmem:[#allocation2 + $0x4ec] ss:$16 sps:$4 sm:$0xff]  }
  0x9b   :  { %1650 = vmatpush1.bf16.msra.mxu1 %v6366_v50  ;;  %1585 = vmatprep.subr.bf16.mxu0 %v6371_v52  ;;  %v6455_v50 = vld [vmem:[#allocation2 + $0x3e8] ss:$16 sps:$4 sm:$0xff]  }
  0x9c   :  { %1651 = vmatprep.subr.bf16.mxu1 %v6374_v53  ;;  %v6458_v52 = vld [vmem:[#allocation2 + $0x4e8] ss:$16 sps:$4 sm:$0xff]   ;;  %v6463_v53 = vld [vmem:[#allocation2 + $0x3cc] ss:$16 sps:$4 sm:$0xff]  }
  0x9e   :  { %1586 = vmatpush2.bf16.msra.mxu0 %v6369_v54  ;;  %v6466_v54 = vld [vmem:[#allocation2 + $0x4cc] ss:$16 sps:$4 sm:$0xff]  }
  0x9f   :  { %1652 = vmatpush1.bf16.msra.mxu1 %v6372_v55  ;;  %1587 = vmatprep.subr.bf16.mxu0 %v6377_v56  ;;  %v6461_v55 = vld [vmem:[#allocation2 + $0x3c8] ss:$16 sps:$4 sm:$0xff]  }
  0xa0   :  { %1653 = vmatprep.subr.bf16.mxu1 %v6380_v57  ;;  %v6464_v56 = vld [vmem:[#allocation2 + $0x4c8] ss:$16 sps:$4 sm:$0xff]   ;;  %v6469_v57 = vld [vmem:[#allocation2 + $0x3ac] ss:$16 sps:$4 sm:$0xff]  }
  0xa2   :  { %1588 = vmatpush2.bf16.msra.mxu0 %v6375_v58  ;;  %v6472_v58 = vld [vmem:[#allocation2 + $0x4ac] ss:$16 sps:$4 sm:$0xff]  }
  0xa3   :  { %1654 = vmatpush1.bf16.msra.mxu1 %v6378_v59  ;;  %1589 = vmatprep.subr.bf16.mxu0 %v6383_v60  ;;  %v6467_v59 = vld [vmem:[#allocation2 + $0x3a8] ss:$16 sps:$4 sm:$0xff]  }
  0xa4   :  { %1655 = vmatprep.subr.bf16.mxu1 %v6386_v61  ;;  %v6470_v60 = vld [vmem:[#allocation2 + $0x4a8] ss:$16 sps:$4 sm:$0xff]   ;;  %v6475_v61 = vld [vmem:[#allocation2 + $0x38c] ss:$16 sps:$4 sm:$0xff]  }
  0xa6   :  { %1590 = vmatpush2.bf16.msra.mxu0 %v6381_v62  ;;  %v6478_v62 = vld [vmem:[#allocation2 + $0x48c] ss:$16 sps:$4 sm:$0xff]  }
  0xa7   :  { %1656 = vmatpush1.bf16.msra.mxu1 %v6384_v47  ;;  %1591 = vmatprep.subr.bf16.mxu0 %v6389_v63  ;;  %v6473_v47 = vld [vmem:[#allocation2 + $0x388] ss:$16 sps:$4 sm:$0xff]   ;;  %v6481_v63 = vld [vmem:[#allocation2 + $0x36c] ss:$16 sps:$4 sm:$0xff]  }
  0xa8   :  { %1657 = vmatprep.subr.bf16.mxu1 %v6392_v0  ;;  %v6484_v0 = vld [vmem:[#allocation2 + $0x46c] ss:$16 sps:$4 sm:$0xff]  }
  0xaa   :  { %1592 = vmatpush2.bf16.msra.mxu0 %v6387_v1  ;;  %v6479_v1 = vld [vmem:[#allocation2 + $0x368] ss:$16 sps:$4 sm:$0xff]  }
  0xab   :  { %1658 = vmatpush1.bf16.msra.mxu1 %v6390_v2  ;;  %1593 = vmatprep.subr.bf16.mxu0 %v6395_v3  ;;  %v6482_v2 = vld [vmem:[#allocation2 + $0x468] ss:$16 sps:$4 sm:$0xff]   ;;  %v6487_v3 = vld [vmem:[#allocation2 + $0x34c] ss:$16 sps:$4 sm:$0xff]  }
  0xac   :  { %1659 = vmatprep.subr.bf16.mxu1 %v6398_v4  ;;  %v6490_v4 = vld [vmem:[#allocation2 + $0x44c] ss:$16 sps:$4 sm:$0xff]  }
  0xae   :  { %1594 = vmatpush2.bf16.msra.mxu0 %v6393_v5  ;;  %v6488_v5 = vld [vmem:[#allocation2 + $0x448] ss:$16 sps:$4 sm:$0xff]  }
  0xaf   :  { %1660 = vmatpush1.bf16.msra.mxu1 %v6396_v8  ;;  %1595 = vmatprep.subr.bf16.mxu0 %v6401_v9  ;;  %v6493_v8 = vld [vmem:[#allocation2 + $0x32c] ss:$16 sps:$4 sm:$0xff]  }
  0xb0   :  { %1661 = vmatprep.subr.bf16.mxu1 %v6404_v10  ;;  %v6496_v9 = vld [vmem:[#allocation2 + $0x42c] ss:$16 sps:$4 sm:$0xff]   ;;  %v6491_v10 = vld [vmem:[#allocation2 + $0x328] ss:$16 sps:$4 sm:$0xff]  }
  0xb2   :  { %1596 = vmatpush2.bf16.msra.mxu0 %v6399_v11  ;;  %v6494_v11 = vld [vmem:[#allocation2 + $0x428] ss:$16 sps:$4 sm:$0xff]  }
  0xb3   :  { %1662 = vmatpush1.bf16.msra.mxu1 %v6402_v12  ;;  %1688 = vmatprep.subr.bf16.mxu0 %v6412_v14  ;;  %v6499_v12 = vld [vmem:[#allocation2 + $0x30c] ss:$16 sps:$4 sm:$0xff]   ;;  %v6497_v14 = vld [vmem:[#allocation2 + $0x308] ss:$16 sps:$4 sm:$0xff]  }
  0xb4   :  { %1663 = vmatprep.subr.bf16.mxu1 %v6409_v13  ;;  %v6502_v13 = vld [vmem:[#allocation2 + $0x40c] ss:$16 sps:$4 sm:$0xff]  }
  0xb5   :  { %1598 = vmatmul.mubr.bf16.vlgmr.msra.gmra.mxu0 %v7006_v15 }
  0xb6   :  { %1689 = vmatpush1.bf16.msra.mxu0 %v6410_v18  ;;  %1720 = vmatprep.mubr.bf16.mxu0 %v6979_v51  ;;  %v6434_v51 = vld [vmem:[#allocation2 + $0x268] ss:$16 sps:$4 sm:$0xff]   ;;  %v6505_v18 = vld [vmem:[#allocation2 + $0x5ec] ss:$16 sps:$4 sm:$0xff]  }
  0xb7   :  { %1664 = vmatpush2.bf16.msra.mxu1 %v6407_v17  ;;  %1690 = vmatprep.subr.bf16.mxu0 %v6418_v20  ;;  %v6500_v17 = vld [vmem:[#allocation2 + $0x408] ss:$16 sps:$4 sm:$0xff]  }
  0xb8   :  { %1665 = vmatprep.subr.bf16.mxu1 %v6415_v19  ;;  %v6508_v19 = vld [vmem:[#allocation2 + $0x6ec] ss:$16 sps:$4 sm:$0xff]   ;;  %v6503_v20 = vld [vmem:[#allocation2 + $0x5e8] ss:$16 sps:$4 sm:$0xff]  }
  0xba   :  { %1691 = vmatpush1.bf16.msra.mxu0 %v6416_v22  ;;  %v6511_v22 = vld [vmem:[#allocation2 + $0x5cc] ss:$16 sps:$4 sm:$0xff]  }
  0xbb   :  { %1666 = vmatpush2.bf16.msra.mxu1 %v6413_v21  ;;  %1692 = vmatprep.subr.bf16.mxu0 %v6424_v24  ;;  %v6506_v21 = vld [vmem:[#allocation2 + $0x6e8] ss:$16 sps:$4 sm:$0xff]  }
  0xbc   :  { %1667 = vmatprep.subr.bf16.mxu1 %v6421_v23  ;;  %v6514_v23 = vld [vmem:[#allocation2 + $0x6cc] ss:$16 sps:$4 sm:$0xff]   ;;  %v6509_v24 = vld [vmem:[#allocation2 + $0x5c8] ss:$16 sps:$4 sm:$0xff]  }
  0xbe   :  { %1693 = vmatpush1.bf16.msra.mxu0 %v6422_v26  ;;  %v6517_v26 = vld [vmem:[#allocation2 + $0x5ac] ss:$16 sps:$4 sm:$0xff]  }
  0xbf   :  { %1668 = vmatpush2.bf16.msra.mxu1 %v6419_v25  ;;  %1694 = vmatprep.subr.bf16.mxu0 %v6430_v28  ;;  %v6512_v25 = vld [vmem:[#allocation2 + $0x6c8] ss:$16 sps:$4 sm:$0xff]  }
  0xc0   :  { %1669 = vmatprep.subr.bf16.mxu1 %v6427_v27  ;;  %v6520_v27 = vld [vmem:[#allocation2 + $0x6ac] ss:$16 sps:$4 sm:$0xff]   ;;  %v6515_v28 = vld [vmem:[#allocation2 + $0x5a8] ss:$16 sps:$4 sm:$0xff]  }
  0xc2   :  { %1695 = vmatpush1.bf16.msra.mxu0 %v6428_v30  ;;  %v6523_v30 = vld [vmem:[#allocation2 + $0x58c] ss:$16 sps:$4 sm:$0xff]  }
  0xc3   :  { %1670 = vmatpush2.bf16.msra.mxu1 %v6425_v29  ;;  %1696 = vmatprep.subr.bf16.mxu0 %v6436_v32  ;;  %v6518_v29 = vld [vmem:[#allocation2 + $0x6a8] ss:$16 sps:$4 sm:$0xff]  }
  0xc4   :  { %1671 = vmatprep.subr.bf16.mxu1 %v6433_v31  ;;  %v6526_v31 = vld [vmem:[#allocation2 + $0x68c] ss:$16 sps:$4 sm:$0xff]   ;;  %v6521_v32 = vld [vmem:[#allocation2 + $0x588] ss:$16 sps:$4 sm:$0xff]  }
  0xc6   :  { %1697 = vmatpush1.bf16.msra.mxu0 %v6434_v51  ;;  %v6529_v51 = vld [vmem:[#allocation2 + $0x56c] ss:$16 sps:$4 sm:$0xff]  }
  0xc7   :  { %1672 = vmatpush2.bf16.msra.mxu1 %v6431_v33  ;;  %1698 = vmatprep.subr.bf16.mxu0 %v6442_v36  ;;  %v6524_v33 = vld [vmem:[#allocation2 + $0x688] ss:$16 sps:$4 sm:$0xff]  }
  0xc8   :  { %1673 = vmatprep.subr.bf16.mxu1 %v6439_v34  ;;  %v6527_v34 = vld [vmem:[#allocation2 + $0x568] ss:$16 sps:$4 sm:$0xff]  }
  0xc9   :  { %v6530_v36 = vld [vmem:[#allocation2 + $0x668] ss:$16 sps:$4 sm:$0xff]  }
  0xca   :  { %1699 = vmatpush1.bf16.msra.mxu0 %v6440_v38  ;;  %v6533_v38 = vld [vmem:[#allocation2 + $0x548] ss:$16 sps:$4 sm:$0xff]  }
  0xcb   :  { %1674 = vmatpush2.bf16.msra.mxu1 %v6437_v37  ;;  %1700 = vmatprep.subr.bf16.mxu0 %v6448_v40  ;;  %v6538_v37 = vld [vmem:[#allocation2 + $0x64c] ss:$16 sps:$4 sm:$0xff]  }
  0xcc   :  { %1675 = vmatprep.subr.bf16.mxu1 %v6445_v39  ;;  %v6536_v39 = vld [vmem:[#allocation2 + $0x648] ss:$16 sps:$4 sm:$0xff]   ;;  %v6541_v40 = vld [vmem:[#allocation2 + $0x52c] ss:$16 sps:$4 sm:$0xff]  }
  0xce   :  { %1701 = vmatpush1.bf16.msra.mxu0 %v6446_v42  ;;  %v6539_v42 = vld [vmem:[#allocation2 + $0x528] ss:$16 sps:$4 sm:$0xff]  }
  0xcf   :  { %1676 = vmatpush2.bf16.msra.mxu1 %v6443_v41  ;;  %1702 = vmatprep.subr.bf16.mxu0 %v6454_v44  ;;  %v6544_v41 = vld [vmem:[#allocation2 + $0x62c] ss:$16 sps:$4 sm:$0xff]  }
  0xd0   :  { %1677 = vmatprep.subr.bf16.mxu1 %v6451_v43  ;;  %v6542_v43 = vld [vmem:[#allocation2 + $0x628] ss:$16 sps:$4 sm:$0xff]   ;;  %v6547_v44 = vld [vmem:[#allocation2 + $0x50c] ss:$16 sps:$4 sm:$0xff]  }
  0xd2   :  { %1703 = vmatpush1.bf16.msra.mxu0 %v6452_v46  ;;  %v6545_v46 = vld [vmem:[#allocation2 + $0x508] ss:$16 sps:$4 sm:$0xff]  }
  0xd3   :  { %1678 = vmatpush2.bf16.msra.mxu1 %v6449_v45  ;;  %1704 = vmatprep.subr.bf16.mxu0 %v6457_v48  ;;  %v6550_v45 = vld [vmem:[#allocation2 + $0x60c] ss:$16 sps:$4 sm:$0xff]   ;;  %v6548_v48 = vld [vmem:[#allocation2 + $0x608] ss:$16 sps:$4 sm:$0xff]  }
  0xd4   :  { %1729 = vmatprep.subr.bf16.mxu1 %v6460_v49  ;;  %v6553_v49 = vld [vmem:[#allocation4 + $0xe4] ss:$16 sps:$4 sm:$0xff]  }
  0xd6   :  { %1680 = vmatmul.mubr.bf16.vlgmr.msra.gmra.mxu1 %v6983_v6  ;;  %1705 = vmatpush2.bf16.msra.mxu0 %v6455_v50  ;;  %v6476_v6 = vld [vmem:[#allocation2 + $0x488] ss:$16 sps:$4 sm:$0xff]   ;;  %v6551_v50 = vld [vmem:[#allocation4 + $0xe0] ss:$16 sps:$4 sm:$0xff]  }
  0xd7   :  { %1730 = vmatpush1.bf16.msra.mxu1 %v6458_v52  ;;  %1706 = vmatprep.subr.bf16.mxu0 %v6463_v53  ;;  %v6556_v52 = vld [vmem:[#allocation4 + $0xc4] ss:$16 sps:$4 sm:$0xff]   ;;  %v6811_v53 = vld [vmem:[%s7181_s0 + $0x18] ss:$0 sps:$4 sm:$0xff]  }
  0xd8   :  { %1731 = vmatprep.subr.bf16.mxu1 %v6466_v54  ;;  %1761 = vmatprep.mubr.bf16.mxu1 %v6997_v35  ;;  %v6485_v35 = vld [vmem:[#allocation2 + $0x348] ss:$16 sps:$4 sm:$0xff]   ;;  %v6554_v54 = vld [vmem:[#allocation4 + $0xc0] ss:$16 sps:$4 sm:$0xff]  }
  0xda   :  { %1707 = vmatpush2.bf16.msra.mxu0 %v6461_v55  ;;  %v6559_v55 = vld [vmem:[#allocation4 + $0xa4] ss:$16 sps:$4 sm:$0xff]  }
  0xdb   :  { %1732 = vmatpush1.bf16.msra.mxu1 %v6464_v56  ;;  %1708 = vmatprep.subr.bf16.mxu0 %v6469_v57  ;;  %v6557_v56 = vld [vmem:[#allocation4 + $0xa0] ss:$16 sps:$4 sm:$0xff]   ;;  %v6562_v57 = vld [vmem:[#allocation4 + $0x84] ss:$16 sps:$4 sm:$0xff]  }
  0xdc   :  { %1733 = vmatprep.subr.bf16.mxu1 %v6472_v58  ;;  %v6560_v58 = vld [vmem:[#allocation4 + $0x80] ss:$16 sps:$4 sm:$0xff]  }
  0xde   :  { %1709 = vmatpush2.bf16.msra.mxu0 %v6467_v59  ;;  %v6565_v59 = vld [vmem:[#allocation4 + $0x64] ss:$16 sps:$4 sm:$0xff]  }
  0xdf   :  { %1734 = vmatpush1.bf16.msra.mxu1 %v6470_v60  ;;  %1710 = vmatprep.subr.bf16.mxu0 %v6475_v61  ;;  %v6623_v60 = vld [vmem:[#allocation4 + $0x2e0] ss:$16 sps:$4 sm:$0xff]   ;;  %v6625_v61 = vld [vmem:[#allocation4 + $0x2e4] ss:$16 sps:$4 sm:$0xff]  }
  0xe0   :  { %1735 = vmatprep.subr.bf16.mxu1 %v6478_v62  ;;  %v6568_v62 = vld [vmem:[#allocation4 + $0x44] ss:$16 sps:$4 sm:$0xff]  }
  0xe2   :  { %1711 = vmatpush2.bf16.msra.mxu0 %v6473_v47  ;;  %v6629_v47 = vld [vmem:[#allocation4 + $0x2c0] ss:$16 sps:$4 sm:$0xff]  }
  0xe3   :  { %1736 = vmatpush1.bf16.msra.mxu1 %v6476_v6  ;;  %1712 = vmatprep.subr.bf16.mxu0 %v6481_v63  ;;  %v6631_v6 = vld [vmem:[#allocation4 + $0x2c4] ss:$16 sps:$4 sm:$0xff]   ;;  %v6566_v63 = vld [vmem:[#allocation4 + $0x40] ss:$16 sps:$4 sm:$0xff]  }
  0xe4   :  { %1737 = vmatprep.subr.bf16.mxu1 %v6484_v0  ;;  %v6571_v0 = vld [vmem:[#allocation4 + $0x24] ss:$16 sps:$4 sm:$0xff]  }
  0xe6   :  { %1713 = vmatpush2.bf16.msra.mxu0 %v6479_v1  ;;  %v6635_v1 = vld [vmem:[#allocation4 + $0x2a0] ss:$16 sps:$4 sm:$0xff]  }
  0xe7   :  { %1738 = vmatpush1.bf16.msra.mxu1 %v6482_v2  ;;  %1714 = vmatprep.subr.bf16.mxu0 %v6487_v3  ;;  %v6637_v2 = vld [vmem:[#allocation4 + $0x2a4] ss:$16 sps:$4 sm:$0xff]   ;;  %v6569_v3 = vld [vmem:[#allocation4 + $0x20] ss:$16 sps:$4 sm:$0xff]  }
  0xe8   :  { %1739 = vmatprep.subr.bf16.mxu1 %v6490_v4  ;;  %v6574_v4 = vld [vmem:[#allocation4 + $0x4] ss:$16 sps:$4 sm:$0xff]  }
  0xea   :  { %1715 = vmatpush2.bf16.msra.mxu0 %v6485_v35  ;;  %v6641_v35 = vld [vmem:[#allocation4 + $0x280] ss:$16 sps:$4 sm:$0xff]  }
  0xeb   :  { %1740 = vmatpush1.bf16.msra.mxu1 %v6488_v5  ;;  %1716 = vmatprep.subr.bf16.mxu0 %v6493_v8  ;;  %v6643_v5 = vld [vmem:[#allocation4 + $0x284] ss:$16 sps:$4 sm:$0xff]   ;;  %v6572_v8 = vld [vmem:[#allocation4] ss:$16 sps:$4 sm:$0xff]  }
  0xec   :  { %1741 = vmatprep.subr.bf16.mxu1 %v6496_v9  ;;  %v6577_v9 = vld [vmem:[#allocation4 + $0x1e4] ss:$16 sps:$4 sm:$0xff]  }
  0xee   :  { %1717 = vmatpush2.bf16.msra.mxu0 %v6491_v10  ;;  %v6647_v10 = vld [vmem:[#allocation4 + $0x260] ss:$16 sps:$4 sm:$0xff]  }
  0xef   :  { %1742 = vmatpush1.bf16.msra.mxu1 %v6494_v11  ;;  %1718 = vmatprep.subr.bf16.mxu0 %v6499_v12  ;;  %v6649_v11 = vld [vmem:[#allocation4 + $0x264] ss:$16 sps:$4 sm:$0xff]   ;;  %v6575_v12 = vld [vmem:[#allocation4 + $0x1e0] ss:$16 sps:$4 sm:$0xff]  }
  0xf0   :  { %1743 = vmatprep.subr.bf16.mxu1 %v6502_v13  ;;  %v6580_v13 = vld [vmem:[#allocation4 + $0x1c4] ss:$16 sps:$4 sm:$0xff]  }
  0xf2   :  { %1719 = vmatpush2.bf16.msra.mxu0 %v6497_v14  ;;  %v6655_v14 = vld [vmem:[#allocation4 + $0x244] ss:$16 sps:$4 sm:$0xff]  }
  0xf3   :  { %1744 = vmatpush1.bf16.msra.mxu1 %v6500_v17  ;;  %1770 = vmatprep.subr.bf16.mxu0 %v6508_v19  ;;  %v6578_v19 = vld [vmem:[#allocation4 + $0x1c0] ss:$16 sps:$4 sm:$0xff]  }
  0xf4   :  { %1745 = vmatprep.subr.bf16.mxu1 %v6505_v18 }
  0xf5   :  { %1721 = vmatmul.mubr.bf16.vlgmr.msra.gmra.mxu0 %v6985_v7  ;;  %v6532_v7 = vld [vmem:[#allocation2 + $0x66c] ss:$16 sps:$4 sm:$0xff]  }
  0xf6   :  { %1771 = vmatpush1.bf16.msra.mxu0 %v6506_v21  ;;  %1802 = vmatprep.mubr.bf16.mxu0 %v6908_v16  ;;  %v6535_v16 = vld [vmem:[#allocation2 + $0x54c] ss:$16 sps:$4 sm:$0xff]  }
  0xf7   :  { %1746 = vmatpush2.bf16.msra.mxu1 %v6503_v20  ;;  %1772 = vmatprep.subr.bf16.mxu0 %v6514_v23  ;;  %v6653_v20 = vld [vmem:[#allocation4 + $0x240] ss:$16 sps:$4 sm:$0xff]   ;;  %v6583_v23 = vld [vmem:[#allocation4 + $0x1a4] ss:$16 sps:$4 sm:$0xff]  }
  0xf8   :  { %1747 = vmatprep.subr.bf16.mxu1 %v6511_v22 }
  0xfa   :  { %1773 = vmatpush1.bf16.msra.mxu0 %v6512_v25 }
  0xfb   :  { %1748 = vmatpush2.bf16.msra.mxu1 %v6509_v24  ;;  %1774 = vmatprep.subr.bf16.mxu0 %v6520_v27  ;;  %v6661_v24 = vld [vmem:[#allocation4 + $0x224] ss:$16 sps:$4 sm:$0xff]   ;;  %v6659_v27 = vld [vmem:[#allocation4 + $0x220] ss:$16 sps:$4 sm:$0xff]  }
  0xfc   :  { %1749 = vmatprep.subr.bf16.mxu1 %v6517_v26 }
  0xfe   :  { %1775 = vmatpush1.bf16.msra.mxu0 %v6518_v29 }
  0xff   :  { %1750 = vmatpush2.bf16.msra.mxu1 %v6515_v28  ;;  %1776 = vmatprep.subr.bf16.mxu0 %v6526_v31  ;;  %v6581_v28 = vld [vmem:[#allocation4 + $0x1a0] ss:$16 sps:$4 sm:$0xff]   ;;  %v6586_v31 = vld [vmem:[#allocation4 + $0x184] ss:$16 sps:$4 sm:$0xff]  }
 0x100   :  { %1751 = vmatprep.subr.bf16.mxu1 %v6523_v30 }
 0x102   :  { %1777 = vmatpush1.bf16.msra.mxu0 %v6524_v33  ;;  %v6667_v33 = vld [vmem:[#allocation4 + $0x204] ss:$16 sps:$4 sm:$0xff]  }
 0x103   :  { %1752 = vmatpush2.bf16.msra.mxu1 %v6521_v32  ;;  %1778 = vmatprep.subr.bf16.mxu0 %v6532_v7  ;;  %v6665_v32 = vld [vmem:[#allocation4 + $0x200] ss:$16 sps:$4 sm:$0xff]   ;;  %v6589_v7 = vld [vmem:[#allocation4 + $0x164] ss:$16 sps:$4 sm:$0xff]  }
 0x104   :  { %1753 = vmatprep.subr.bf16.mxu1 %v6529_v51  ;;  %v6584_v51 = vld [vmem:[#allocation4 + $0x180] ss:$16 sps:$4 sm:$0xff]  }
 0x106   :  { %1779 = vmatpush1.bf16.msra.mxu0 %v6530_v36  ;;  %v6673_v36 = vld [vmem:[#allocation4 + $0x3e4] ss:$16 sps:$4 sm:$0xff]  }
 0x107   :  { %1754 = vmatpush2.bf16.msra.mxu1 %v6527_v34  ;;  %1780 = vmatprep.subr.bf16.mxu0 %v6538_v37  ;;  %v6671_v34 = vld [vmem:[#allocation4 + $0x3e0] ss:$16 sps:$4 sm:$0xff]   ;;  %v6676_v37 = vld [vmem:[#allocation4 + $0x3c4] ss:$16 sps:$4 sm:$0xff]  }
 0x108   :  { %1755 = vmatprep.subr.bf16.mxu1 %v6535_v16  ;;  %v6587_v16 = vld [vmem:[#allocation4 + $0x160] ss:$16 sps:$4 sm:$0xff]  }
 0x10a   :  { %1781 = vmatpush1.bf16.msra.mxu0 %v6536_v39  ;;  %v6674_v39 = vld [vmem:[#allocation4 + $0x3c0] ss:$16 sps:$4 sm:$0xff]  }
 0x10b   :  { %1756 = vmatpush2.bf16.msra.mxu1 %v6533_v38  ;;  %1782 = vmatprep.subr.bf16.mxu0 %v6544_v41  ;;  %v6592_v38 = vld [vmem:[#allocation4 + $0x144] ss:$16 sps:$4 sm:$0xff]   ;;  %v6590_v41 = vld [vmem:[#allocation4 + $0x140] ss:$16 sps:$4 sm:$0xff]  }
 0x10c   :  { %1757 = vmatprep.subr.bf16.mxu1 %v6541_v40  ;;  %v6679_v40 = vld [vmem:[#allocation4 + $0x3a4] ss:$16 sps:$4 sm:$0xff]  }
 0x10e   :  { %1783 = vmatpush1.bf16.msra.mxu0 %v6542_v43  ;;  %v6677_v43 = vld [vmem:[#allocation4 + $0x3a0] ss:$16 sps:$4 sm:$0xff]  }
 0x10f   :  { %1758 = vmatpush2.bf16.msra.mxu1 %v6539_v42  ;;  %1784 = vmatprep.subr.bf16.mxu0 %v6550_v45  ;;  %v6595_v42 = vld [vmem:[#allocation4 + $0x124] ss:$16 sps:$4 sm:$0xff]   ;;  %v6593_v45 = vld [vmem:[#allocation4 + $0x120] ss:$16 sps:$4 sm:$0xff]  }
 0x110   :  { %1759 = vmatprep.subr.bf16.mxu1 %v6547_v44  ;;  %v6682_v44 = vld [vmem:[#allocation4 + $0x384] ss:$16 sps:$4 sm:$0xff]  }
 0x112   :  { %1785 = vmatpush1.bf16.msra.mxu0 %v6548_v48  ;;  %v6680_v48 = vld [vmem:[#allocation4 + $0x380] ss:$16 sps:$4 sm:$0xff]  }
 0x113   :  { %1760 = vmatpush2.bf16.msra.mxu1 %v6545_v46  ;;  %2617 = vmatprep.subr.bf16.mxu0 %v6553_v49  ;;  %v6598_v46 = vld [vmem:[#allocation4 + $0x104] ss:$16 sps:$4 sm:$0xff]  }
 0x114   :  { %2658 = vmatprep.subr.bf16.mxu1 %v6625_v61  ;;  %v6685_v49 = vld [vmem:[#allocation4 + $0x364] ss:$16 sps:$4 sm:$0xff]  }
 0x115   :  { %1803 = vmatmul.mubr.bf16.vlgmr.msra.gmra.mxu0 %v6811_v53  ;;  %v6683_v53 = vld [vmem:[#allocation4 + $0x360] ss:$16 sps:$4 sm:$0xff]  }
 0x116   :  { %1762 = vmatmul.mubr.bf16.vlgmr.msra.gmra.mxu1 %v7006_v15  ;;  %2618 = vmatpush1.bf16.msra.mxu0 %v6551_v50  ;;  %v6563_v15 = vld [vmem:[#allocation4 + $0x60] ss:$16 sps:$4 sm:$0xff]  }
 0x117   :  { %2619 = vmatprep.subr.bf16.mxu0 %v6556_v52  ;;  %2659 = vmatpush1.bf16.msra.mxu1 %v6623_v60  ;;  %v6596_v50 = vld [vmem:[#allocation4 + $0x100] ss:$16 sps:$4 sm:$0xff]   ;;  %v6601_v52 = vld [vmem:[#allocation4 + $0xec] ss:$16 sps:$4 sm:$0xff]  }
 0x118   :  { %2660 = vmatprep.subr.bf16.mxu1 %v6631_v6  ;;  %v6689_v60 = vld [vmem:[#allocation4 + $0x320] ss:$16 sps:$4 sm:$0xff]   ;;  %v6697_v6 = vld [vmem:[#allocation4 + $0x2ec] ss:$16 sps:$4 sm:$0xff]  }
 0x11a   :  { %2620 = vmatpush1.bf16.msra.mxu0 %v6554_v54  ;;  %v6688_v54 = vld [vmem:[#allocation4 + $0x344] ss:$16 sps:$4 sm:$0xff]  }
 0x11b   :  { %2621 = vmatprep.subr.bf16.mxu0 %v6559_v55  ;;  %2661 = vmatpush1.bf16.msra.mxu1 %v6629_v47  ;;  %v318_v47 = vlaneseq }
 0x11c   :  { %2662 = vmatprep.subr.bf16.mxu1 %v6637_v2 }
 0x11e   :  { %2622 = vmatpush1.bf16.msra.mxu0 %v6557_v56  ;;  %v6686_v56 = vld [vmem:[#allocation4 + $0x340] ss:$16 sps:$4 sm:$0xff]  }
 0x11f   :  { %2623 = vmatprep.subr.bf16.mxu0 %v6562_v57  ;;  %2663 = vmatpush1.bf16.msra.mxu1 %v6635_v1  ;;  %v7034_v1 = vld [vmem:[%s7183_s2] sm:$0xf] }
 0x120   :  { %2664 = vmatprep.subr.bf16.mxu1 %v6643_v5 }
 0x122   :  { %2624 = vmatpush1.bf16.msra.mxu0 %v6560_v58  ;;  %v6691_v58 = vld [vmem:[#allocation4 + $0x324] ss:$16 sps:$4 sm:$0xff]  }
 0x123   :  { %2625 = vmatprep.subr.bf16.mxu0 %v6565_v59  ;;  %2665 = vmatpush1.bf16.msra.mxu1 %v6641_v35 }
 0x124   :  { %2666 = vmatprep.subr.bf16.mxu1 %v6649_v11 }
 0x126   :  { %2626 = vmatpush1.bf16.msra.mxu0 %v6563_v15  ;;  %v6694_v15 = vld [vmem:[#allocation4 + $0x304] ss:$16 sps:$4 sm:$0xff]  }
 0x127   :  { %2627 = vmatprep.subr.bf16.mxu0 %v6568_v62  ;;  %2667 = vmatpush1.bf16.msra.mxu1 %v6647_v10  ;;  %v6692_v62 = vld [vmem:[#allocation4 + $0x300] ss:$16 sps:$4 sm:$0xff]  }
 0x128   :  { %2668 = vmatprep.subr.bf16.mxu1 %v6655_v14 }
 0x12a   :  { %2628 = vmatpush1.bf16.msra.mxu0 %v6566_v63  ;;  %v7026_v63 = vshrl.u32 %v318_v47, 7  ;;  %v6668_v47 = vld [vmem:[#allocation4 + $0x108] ss:$16 sps:$4 sm:$0xff]  }
 0x12b   :  { %2629 = vmatprep.subr.bf16.mxu0 %v6571_v0  ;;  %2669 = vmatpush1.bf16.msra.mxu1 %v6653_v20 }
 0x12c   :  { %2670 = vmatprep.subr.bf16.mxu1 %v6661_v24  ;;  %v7029_v0 = vsub.s32 0, %v7026_v63  ;;  %v7037_v2 = vsub.s32 1, %v7026_v63 }
 0x12e   :  { %2630 = vmatpush1.bf16.msra.mxu0 %v6569_v3  ;;  %v321_v3 = vrot.slane %v7034_v1, %v7029_v0 }
 0x12f   :  { %2631 = vmatprep.subr.bf16.mxu0 %v6574_v4  ;;  %2671 = vmatpush1.bf16.msra.mxu1 %v6659_v27  ;;  %v325_v4 = vrot.slane %v7034_v1, %v7037_v2 }
 0x130   :  { %2672 = vmatprep.subr.bf16.mxu1 %v6667_v33  ;;  %v6613_v33 = vld [vmem:[#allocation4 + $0x6c] ss:$16 sps:$4 sm:$0xff]  }
 0x132   :  { %2632 = vmatpush1.bf16.msra.mxu0 %v6572_v8 }
 0x133   :  { %2633 = vmatprep.subr.bf16.mxu0 %v6577_v9  ;;  %2673 = vmatpush1.bf16.msra.mxu1 %v6665_v32  ;;  %v6608_v32 = vld [vmem:[#allocation4 + $0x88] ss:$16 sps:$4 sm:$0xff]  }
 0x134   :  { %2674 = vmatprep.subr.bf16.mxu1 %v6673_v36  ;;  %v6619_v36 = vld [vmem:[#allocation4 + $0x2c] ss:$16 sps:$4 sm:$0xff]  }
 0x135   :  { %v7018_v17 = vpop.f32.mrf.mxu0 }
 0x136   :  { %v7020_v18 = vpop.f32.mrf.mxu1  ;;  %2634 = vmatpush2.bf16.msra.mxu0 %v6575_v12  ;;  %v1518_v35 = vadd.f32 %v7018_v17, %v321_v3  ;;  %v2857_v3 = vld [vmem:[#allocation6 + $0x1e0] sm:$0xff] }
 0x137   :  { %v7022_v21 = vpop.f32.mrf.mxu0  ;;  %2635 = vmatprep.subr.bf16.mxu0 %v6580_v13  ;;  %2675 = vmatpush2.bf16.msra.mxu1 %v6671_v34  ;;  %v6614_v34 = vld [vmem:[#allocation4 + $0x48] ss:$16 sps:$4 sm:$0xff]  }
 0x138   :  { %v7024_v22 = vpop.f32.mrf.mxu1  ;;  %2676 = vmatprep.subr.bf16.mxu1 %v6676_v37  ;;  %v1520_v5 = vadd.f32 %v7022_v21, %v325_v4  ;;  %v1559_v8 = vadd.f32 %v7020_v18, %v1518_v35  ;;  %v6599_v21 = vld [vmem:[#allocation4 + $0xe8] ss:$16 sps:$4 sm:$0xff]   ;;  %v6604_v18 = vld [vmem:[#allocation4 + $0xcc] ss:$16 sps:$4 sm:$0xff]   ;;  %v2845_v4 = vld [vmem:[#allocation6 + $0x180] sm:$0xff] }
 0x139   :  { %v1521_v25 = vpop.f32.mrf.mxu0 }
 0x13a   :  { %v1562_v26 = vpop.f32.mrf.mxu1  ;;  %2636 = vmatpush2.bf16.msra.mxu0 %v6578_v19  ;;  %v1561_v10 = vadd.f32 %v7024_v22, %v1520_v5  ;;  %v6602_v22 = vld [vmem:[#allocation4 + $0xc8] ss:$16 sps:$4 sm:$0xff]  }
 0x13b   :  { %v1522_v29 = vpop.f32.mrf.mxu0  ;;  %2637 = vmatprep.subr.bf16.mxu0 %v6583_v23  ;;  %2677 = vmatpush2.bf16.msra.mxu1 %v6674_v39  ;;  %v6622_v39 = vld [vmem:[#allocation4 + $0xc] ss:$16 sps:$4 sm:$0xff]  }
 0x13c   :  { %v1563_v30 = vpop.f32.mrf.mxu1  ;;  %2678 = vmatprep.subr.bf16.mxu1 %v6679_v40  ;;  %v6607_v29 = vld [vmem:[#allocation4 + $0xac] ss:$16 sps:$4 sm:$0xff]  }
 0x13d   :  { %v6605_v30 = vld [vmem:[#allocation4 + $0xa8] ss:$16 sps:$4 sm:$0xff]  }
 0x13e   :  { %2638 = vmatpush2.bf16.msra.mxu0 %v6581_v28 }
 0x13f   :  { %2639 = vmatprep.subr.bf16.mxu0 %v6586_v31  ;;  %2679 = vmatpush2.bf16.msra.mxu1 %v6677_v43  ;;  %v6610_v31 = vld [vmem:[#allocation4 + $0x8c] ss:$16 sps:$4 sm:$0xff]  }
 0x140   :  { %2680 = vmatprep.subr.bf16.mxu1 %v6682_v44  ;;  %v6628_v43 = vld [vmem:[#allocation4 + $0x1ec] ss:$16 sps:$4 sm:$0xff]   ;;  %v6626_v44 = vld [vmem:[#allocation4 + $0x1e8] ss:$16 sps:$4 sm:$0xff]  }
 0x142   :  { %2640 = vmatpush2.bf16.msra.mxu0 %v6584_v51  ;;  %v6611_v51 = vld [vmem:[#allocation4 + $0x68] ss:$16 sps:$4 sm:$0xff]  }
 0x143   :  { %2641 = vmatprep.subr.bf16.mxu0 %v6589_v7  ;;  %2681 = vmatpush2.bf16.msra.mxu1 %v6680_v48  ;;  %v6616_v7 = vld [vmem:[#allocation4 + $0x4c] ss:$16 sps:$4 sm:$0xff]  }
 0x144   :  { %2682 = vmatprep.subr.bf16.mxu1 %v6685_v49  ;;  %v6640_v48 = vld [vmem:[#allocation4 + $0x1ac] ss:$16 sps:$4 sm:$0xff]   ;;  %v6638_v49 = vld [vmem:[#allocation4 + $0x1a8] ss:$16 sps:$4 sm:$0xff]  }
 0x146   :  { %2642 = vmatpush2.bf16.msra.mxu0 %v6587_v16 }
 0x147   :  { %2643 = vmatprep.subr.bf16.mxu0 %v6592_v38  ;;  %2683 = vmatpush2.bf16.msra.mxu1 %v6683_v53  ;;  %v6617_v38 = vld [vmem:[#allocation4 + $0x28] ss:$16 sps:$4 sm:$0xff]   ;;  %v6652_v53 = vld [vmem:[#allocation4 + $0x16c] ss:$16 sps:$4 sm:$0xff]  }
 0x148   :  { %2684 = vmatprep.subr.bf16.mxu1 %v6688_v54  ;;  %v6650_v54 = vld [vmem:[#allocation4 + $0x168] ss:$16 sps:$4 sm:$0xff]  }
 0x14a   :  { %2644 = vmatpush2.bf16.msra.mxu0 %v6590_v41 }
 0x14b   :  { %2645 = vmatprep.subr.bf16.mxu0 %v6595_v42  ;;  %2685 = vmatpush2.bf16.msra.mxu1 %v6686_v56  ;;  %v6620_v42 = vld [vmem:[#allocation4 + $0x8] ss:$16 sps:$4 sm:$0xff]  }
 0x14c   :  { %2686 = vmatprep.subr.bf16.mxu1 %v6691_v58  ;;  %v6656_v56 = vld [vmem:[#allocation4 + $0x148] ss:$16 sps:$4 sm:$0xff]  }
 0x14e   :  { %2646 = vmatpush2.bf16.msra.mxu0 %v6593_v45  ;;  %v6634_v45 = vld [vmem:[#allocation4 + $0x1cc] ss:$16 sps:$4 sm:$0xff]  }
 0x14f   :  { %2647 = vmatprep.subr.bf16.mxu0 %v6598_v46  ;;  %2687 = vmatpush2.bf16.msra.mxu1 %v6689_v60  ;;  %v6632_v46 = vld [vmem:[#allocation4 + $0x1c8] ss:$16 sps:$4 sm:$0xff]  }
 0x150   :  { %2688 = vmatprep.subr.bf16.mxu1 %v6694_v15  ;;  %v6662_v60 = vld [vmem:[#allocation4 + $0x128] ss:$16 sps:$4 sm:$0xff]  }
 0x152   :  { %2648 = vmatpush2.bf16.msra.mxu0 %v6596_v50  ;;  %v6646_v50 = vld [vmem:[#allocation4 + $0x18c] ss:$16 sps:$4 sm:$0xff]  }
 0x153   :  { %2699 = vmatprep.subr.bf16.mxu0 %v6601_v52  ;;  %2689 = vmatpush2.bf16.msra.mxu1 %v6692_v62  ;;  %v6644_v52 = vld [vmem:[#allocation4 + $0x188] ss:$16 sps:$4 sm:$0xff]  }
 0x154   :  { %2740 = vmatprep.subr.bf16.mxu1 %v6697_v6  ;;  %v2853_v6 = vld [vmem:[#allocation6 + $0x1c0] sm:$0xff] }
 0x155   :  { %v5843_v35 = vcombine.low %v2853_v6, %v2857_v3  ;;  %v5844_v5 = vcombine.high %v2853_v6, %v2857_v3  ;;  %v6715_v6 = vld [vmem:[#allocation4 + $0x22c] ss:$16 sps:$4 sm:$0xff]   ;;  %v6713_v3 = vld [vmem:[#allocation4 + $0x228] ss:$16 sps:$4 sm:$0xff]  }
 0x156   :  { %v1640_v55 = vpop.f32.mrf.mxu1 }
 0x158   :  { %v1642_v57 = vpop.f32.mrf.mxu1 }
 0x15a   :  { %v1644_v59 = vpop.f32.mrf.mxu1 }
 0x15c   :  { %v1645_v61 = vpop.f32.mrf.mxu1 }
 0x15d   :  { %v6670_v61 = vld [vmem:[#allocation4 + $0x10c] ss:$16 sps:$4 sm:$0xff]  }
 0x175   :  { %v1599_v9 = vpop.f32.mrf.mxu0 }
 0x176   :  { %v1600_v11 = vadd.f32 %v1599_v9, %v1559_v8  ;;  %v2849_v8 = vld [vmem:[#allocation6 + $0x1a0] sm:$0xff]  ;;  %v7056_v9 = vsub.s32 2, %v7026_v63 }
 0x177   :  { %v1601_v12 = vpop.f32.mrf.mxu0 }
 0x178   :  { %v1641_v13 = vadd.f32 %v1640_v55, %v1600_v11  ;;  %v1602_v14 = vadd.f32 %v1601_v12, %v1561_v10  ;;  %v6658_v55 = vld [vmem:[#allocation4 + $0x14c] ss:$16 sps:$4 sm:$0xff]   ;;  %v5836_v10 = vcombine.high %v2845_v4, %v2849_v8  ;;  %v2837_v11 = vld [vmem:[#allocation6 + $0x140] sm:$0xff] }
 0x179   :  { %v1603_v19 = vpop.f32.mrf.mxu0  ;;  %v2841_v12 = vld [vmem:[#allocation6 + $0x160] sm:$0xff] }
 0x17a   :  { %vm1811_vm0 = vcmp.gt.f32.partialorder %v1641_v13, 0.0  ;;  %v1815_v20 = vmul.f32 0.2, %v1641_v13  ;;  %v1643_v23 = vadd.f32 %v1642_v57, %v1602_v14  ;;  %v6664_v57 = vld [vmem:[#allocation4 + $0x12c] ss:$16 sps:$4 sm:$0xff]   ;;  %v5835_v14 = vcombine.low %v2845_v4, %v2849_v8 }
 0x17b   :  { %v1604_v24 = vpop.f32.mrf.mxu0  ;;  %v5828_v19 = vcombine.high %v2837_v11, %v2841_v12  ;;  %v6718_v4 = vld [vmem:[#allocation4 + $0x20c] ss:$16 sps:$4 sm:$0xff]   ;;  %v6719_v8 = vld [vmem:[#allocation4 + $0x3e8] ss:$16 sps:$4 sm:$0xff]  }
 0x17c   :  { %v1816_v25 = vmul.f32 0.2, %v1643_v23  ;;  %vm1812_vm1 = vcmp.gt.f32.partialorder %v1643_v23, 0.0  ;;  %v1819_v26 = vsel %vm1811_vm0, %v1641_v13, %v1815_v20  ;;  %v7059_v13 = vsub.s32 3, %v7026_v63  ;;  %v2833_v24 = vld [vmem:[#allocation6 + $0x120] sm:$0xff] }
 0x17d   :  { %v7047_v28 = vpack.c.bf16 %v1819_v26, %v1819_v26  ;;  %v329_v20 = vrot.slane %v7034_v1, %v7056_v9  ;;  %v5827_v26 = vcombine.low %v2837_v11, %v2841_v12  ;;  %v2805_v11 = vld [vmem:[#allocation6 + $0x40] sm:$0xff] }
 0x17e   :  { %v1820_v17 = vsel %vm1812_vm1, %v1643_v23, %v1816_v25  ;;  %v2829_v23 = vld [vmem:[#allocation6 + $0x100] sm:$0xff]  ;;  %v333_v25 = vrot.slane %v7034_v1, %v7059_v13 }
 0x17f   :  { %v1824_v27 = vpack.c.bf16 %v1820_v17, %v1820_v17  ;;  %v5820_v17 = vcombine.high %v2829_v23, %v2833_v24  ;;  %v2813_v1 = vld [vmem:[#allocation6 + $0x80] sm:$0xff] }
 0x180   :  { %v2809_v12 = vld [vmem:[#allocation6 + $0x60] sm:$0xff] }
 0x181   :  { %2649 = vmatprep.mubr.bf16.mxu0 %v1824_v27 }
 0x182   :  { %2650 = vmatmul.mubr.bf16.vlgmr.msra.gmra.mxu0 %v7047_v28 }
 0x183   :  { %2700 = vmatpush1.bf16.msra.mxu0 %v6599_v21  ;;  %2731 = vmatprep.mubr.bf16.mxu0 %v1824_v27  ;;  %v2821_v21 = vld [vmem:[#allocation6 + $0xc0] sm:$0xff] }
 0x184   :  { %2701 = vmatprep.subr.bf16.mxu0 %v6604_v18 }
 0x187   :  { %2702 = vmatpush1.bf16.msra.mxu0 %v6602_v22 }
 0x188   :  { %2703 = vmatprep.subr.bf16.mxu0 %v6607_v29  ;;  %v5819_v29 = vcombine.low %v2829_v23, %v2833_v24  ;;  %v5795_v23 = vcombine.low %v2805_v11, %v2809_v12  ;;  %v2797_v24 = vld [vmem:[#allocation6] sm:$0xff] }
 0x18b   :  { %2704 = vmatpush1.bf16.msra.mxu0 %v6605_v30 }
 0x18c   :  { %2705 = vmatprep.subr.bf16.mxu0 %v6610_v31 }
 0x18f   :  { %2706 = vmatpush1.bf16.msra.mxu0 %v6608_v32 }
 0x190   :  { %2707 = vmatprep.subr.bf16.mxu0 %v6613_v33 }
 0x193   :  { %2708 = vmatpush1.bf16.msra.mxu0 %v6611_v51 }
 0x194   :  { %2709 = vmatprep.subr.bf16.mxu0 %v6616_v7  ;;  %v2817_v7 = vld [vmem:[#allocation6 + $0xa0] sm:$0xff] }
 0x196   :  { %v7050_v16 = vpop.f32.mrf.mxu1 }
 0x197   :  { %2710 = vmatpush1.bf16.msra.mxu0 %v6614_v34  ;;  %v1682_v27 = vadd.f32 %v7050_v16, %v329_v20  ;;  %v6727_v20 = vld [vmem:[#allocation4 + $0x3ac] ss:$16 sps:$4 sm:$0xff]  }
 0x198   :  { %v7052_v37 = vpop.f32.mrf.mxu1  ;;  %2711 = vmatprep.subr.bf16.mxu0 %v6619_v36 }
 0x199   :  { %v1684_v18 = vadd.f32 %v7052_v37, %v333_v25  ;;  %v5804_v37 = vcombine.high %v2813_v1, %v2817_v7  ;;  %v2801_v25 = vld [vmem:[#allocation6 + $0x20] sm:$0xff] }
 0x19a   :  { %v1685_v40 = vpop.f32.mrf.mxu1 }
 0x19b   :  { %2712 = vmatpush1.bf16.msra.mxu0 %v6617_v38 }
 0x19c   :  { %v1686_v41 = vpop.f32.mrf.mxu1  ;;  %2713 = vmatprep.subr.bf16.mxu0 %v6622_v39 }
 0x19f   :  { %2714 = vmatpush1.bf16.msra.mxu0 %v6620_v42 }
 0x1a0   :  { %2715 = vmatprep.subr.bf16.mxu0 %v6628_v43 }
 0x1a3   :  { %2716 = vmatpush2.bf16.msra.mxu0 %v6626_v44 }
 0x1a4   :  { %2717 = vmatprep.subr.bf16.mxu0 %v6634_v45 }
 0x1a7   :  { %2718 = vmatpush2.bf16.msra.mxu0 %v6632_v46 }
 0x1a8   :  { %2719 = vmatprep.subr.bf16.mxu0 %v6640_v48  ;;  %v5803_v48 = vcombine.low %v2813_v1, %v2817_v7  ;;  %v2901_v1 = vld [vmem:[#allocation6 + $0x340] sm:$0xff] }
 0x1a9   :  { %v2905_v7 = vld [vmem:[#allocation6 + $0x360] sm:$0xff] }
 0x1ab   :  { %2720 = vmatpush2.bf16.msra.mxu0 %v6638_v49 }
 0x1ac   :  { %2721 = vmatprep.subr.bf16.mxu0 %v6646_v50 }
 0x1af   :  { %2722 = vmatpush2.bf16.msra.mxu0 %v6644_v52 }
 0x1b0   :  { %2723 = vmatprep.subr.bf16.mxu0 %v6652_v53  ;;  %v6695_v53 = vld [vmem:[#allocation4 + $0x2e8] ss:$16 sps:$4 sm:$0xff]  }
 0x1b3   :  { %2724 = vmatpush2.bf16.msra.mxu0 %v6650_v54 }
 0x1b4   :  { %2725 = vmatprep.subr.bf16.mxu0 %v6658_v55  ;;  %v6700_v55 = vld [vmem:[#allocation4 + $0x2cc] ss:$16 sps:$4 sm:$0xff]  }
 0x1b5   :  { %v1722_v58 = vpop.f32.mrf.mxu0 }
 0x1b6   :  { %v1723_v22 = vadd.f32 %v1722_v58, %v1682_v27  ;;  %v6701_v58 = vld [vmem:[#allocation4 + $0x2a8] ss:$16 sps:$4 sm:$0xff]   ;;  %v5788_v27 = vcombine.high %v2797_v24, %v2801_v25 }
 0x1b7   :  { %2726 = vmatpush2.bf16.msra.mxu0 %v6656_v56  ;;  %v1724_v59 = vpop.f32.mrf.mxu0  ;;  %v6698_v56 = vld [vmem:[#allocation4 + $0x2c8] ss:$16 sps:$4 sm:$0xff]  }
 0x1b8   :  { %2727 = vmatprep.subr.bf16.mxu0 %v6664_v57  ;;  %v1725_v33 = vadd.f32 %v1724_v59, %v1684_v18  ;;  %v6703_v57 = vld [vmem:[#allocation4 + $0x2ac] ss:$16 sps:$4 sm:$0xff]   ;;  %v2921_v18 = vld [vmem:[#allocation6 + $0x3e0] sm:$0xff] }
 0x1b9   :  { %v1726_v15 = vpop.f32.mrf.mxu0  ;;  %v6706_v59 = vld [vmem:[#allocation4 + $0x28c] ss:$16 sps:$4 sm:$0xff]  }
 0x1ba   :  { %v6707_v15 = vld [vmem:[#allocation4 + $0x268] ss:$16 sps:$4 sm:$0xff]  }
 0x1bb   :  { %2728 = vmatpush2.bf16.msra.mxu0 %v6662_v60  ;;  %v1727_v62 = vpop.f32.mrf.mxu0  ;;  %v6704_v60 = vld [vmem:[#allocation4 + $0x288] ss:$16 sps:$4 sm:$0xff]  }
 0x1bc   :  { %2729 = vmatprep.subr.bf16.mxu0 %v6670_v61  ;;  %v6709_v61 = vld [vmem:[#allocation4 + $0x26c] ss:$16 sps:$4 sm:$0xff]  }
 0x1bd   :  { %v6712_v62 = vld [vmem:[#allocation4 + $0x24c] ss:$16 sps:$4 sm:$0xff]  }
 0x1bf   :  { %2730 = vmatpush2.bf16.msra.mxu0 %v6668_v47  ;;  %v6710_v47 = vld [vmem:[#allocation4 + $0x248] ss:$16 sps:$4 sm:$0xff]  }
 0x1c0   :  { %4375 = vmatprep.subr.bf16.mxu0 %v5844_v5  ;;  %v6721_v5 = vld [vmem:[#allocation4 + $0x3ec] ss:$16 sps:$4 sm:$0xff]  }
 0x1c2   :  { %2732 = vmatmul.mubr.bf16.vlgmr.msra.gmra.mxu0 %v7047_v28  ;;  %v2825_v28 = vld [vmem:[#allocation6 + $0xe0] sm:$0xff] }
 0x1c3   :  { %4376 = vmatpush1.bf16.msra.mxu0 %v5843_v35  ;;  %v5812_v32 = vcombine.high %v2821_v21, %v2825_v28  ;;  %v5811_v16 = vcombine.low %v2821_v21, %v2825_v28  ;;  %v6716_v35 = vld [vmem:[#allocation4 + $0x208] ss:$16 sps:$4 sm:$0xff]   ;;  %v5787_v21 = vcombine.low %v2797_v24, %v2801_v25  ;;  %v2917_v28 = vld [vmem:[#allocation6 + $0x3c0] sm:$0xff] }
 0x1c4   :  { %4377 = vmatprep.subr.bf16.mxu0 %v5836_v10  ;;  %v6724_v10 = vld [vmem:[#allocation4 + $0x3cc] ss:$16 sps:$4 sm:$0xff]   ;;  %v2965_v24 = vld [vmem:[#allocation6 + $0x540] sm:$0xff] }
 0x1c5   :  { %v2969_v25 = vld [vmem:[#allocation6 + $0x560] sm:$0xff] }
 0x1c7   :  { %4378 = vmatpush1.bf16.msra.mxu0 %v5835_v14  ;;  %v6722_v14 = vld [vmem:[#allocation4 + $0x3c8] ss:$16 sps:$4 sm:$0xff]  }
 0x1c8   :  { %4379 = vmatprep.subr.bf16.mxu0 %v5828_v19  ;;  %v5796_v19 = vcombine.high %v2805_v11, %v2809_v12 }
 0x1cb   :  { %4380 = vmatpush1.bf16.msra.mxu0 %v5827_v26  ;;  %v6725_v26 = vld [vmem:[#allocation4 + $0x3a8] ss:$16 sps:$4 sm:$0xff]  }
 0x1cc   :  { %4381 = vmatprep.subr.bf16.mxu0 %v5820_v17  ;;  %v6730_v17 = vld [vmem:[#allocation4 + $0x38c] ss:$16 sps:$4 sm:$0xff]  }
 0x1cf   :  { %4382 = vmatpush1.bf16.msra.mxu0 %v5819_v29  ;;  %v5908_v29 = vcombine.high %v2917_v28, %v2921_v18 }
 0x1d0   :  { %4383 = vmatprep.subr.bf16.mxu0 %v5812_v32  ;;  %v6728_v32 = vld [vmem:[#allocation4 + $0x388] ss:$16 sps:$4 sm:$0xff]  }
 0x1d3   :  { %4384 = vmatpush1.bf16.msra.mxu0 %v5811_v16  ;;  %v2893_v16 = vld [vmem:[#allocation6 + $0x300] sm:$0xff] }
 0x1d4   :  { %4385 = vmatprep.subr.bf16.mxu0 %v5804_v37  ;;  %v6734_v37 = vld [vmem:[#allocation4 + $0x348] ss:$16 sps:$4 sm:$0xff]  }
 0x1d5   :  { %v1804_v31 = vpop.f32.mrf.mxu0 }
 0x1d6   :  { %v1763_v30 = vpop.f32.mrf.mxu1 }
 0x1d7   :  { %v1764_v51 = vadd.f32 %v1763_v30, %v1723_v22  ;;  %v1806_v36 = vpop.f32.mrf.mxu0  ;;  %4386 = vmatpush1.bf16.msra.mxu0 %v5803_v48  ;;  %v2909_v22 = vld [vmem:[#allocation6 + $0x380] sm:$0xff]  ;;  %v6737_v48 = vld [vmem:[#allocation4 + $0x328] ss:$16 sps:$4 sm:$0xff]  }
 0x1d8   :  { %v1765_v34 = vpop.f32.mrf.mxu1  ;;  %4387 = vmatprep.subr.bf16.mxu0 %v5796_v19  ;;  %v2913_v30 = vld [vmem:[#allocation6 + $0x3a0] sm:$0xff] }
 0x1d9   :  { %v1805_v38 = vadd.f32 %v1804_v31, %v1764_v51  ;;  %v1766_v39 = vadd.f32 %v1765_v34, %v1725_v33  ;;  %v1808_v41 = vpop.f32.mrf.mxu0  ;;  %v5907_v31 = vcombine.low %v2917_v28, %v2921_v18  ;;  %v5900_v33 = vcombine.high %v2909_v22, %v2913_v30  ;;  %v6733_v51 = vld [vmem:[#allocation4 + $0x36c] ss:$16 sps:$4 sm:$0xff]   ;;  %v2977_v19 = vld [vmem:[#allocation6 + $0x5a0] sm:$0xff] }
 0x1da   :  { %v1767_v40 = vpop.f32.mrf.mxu1  ;;  %v5899_v34 = vcombine.low %v2909_v22, %v2913_v30  ;;  %v5891_v41 = vcombine.low %v2901_v1, %v2905_v7  ;;  %v2949_v22 = vld [vmem:[#allocation6 + $0x4c0] sm:$0xff] }
 0x1db   :  { %vm1813_vm2 = vcmp.gt.f32.partialorder %v1805_v38, 0.0  ;;  %v1817_v42 = vmul.f32 0.2, %v1805_v38  ;;  %v1807_v43 = vadd.f32 %v1806_v36, %v1766_v39  ;;  %v1809_v45 = vpop.f32.mrf.mxu0  ;;  %4388 = vmatpush1.bf16.msra.mxu0 %v5795_v23  ;;  %v6731_v36 = vld [vmem:[#allocation4 + $0x368] ss:$16 sps:$4 sm:$0xff]   ;;  %v2897_v40 = vld [vmem:[#allocation6 + $0x320] sm:$0xff] }
 0x1dc   :  { %v1768_v44 = vpop.f32.mrf.mxu1  ;;  %4389 = vmatprep.subr.bf16.mxu0 %v5788_v27  ;;  %v6736_v39 = vld [vmem:[#allocation4 + $0x34c] ss:$16 sps:$4 sm:$0xff]   ;;  %v2889_v45 = vld [vmem:[#allocation6 + $0x2e0] sm:$0xff] }
 0x1dd   :  { %vm1814_vm3 = vcmp.gt.f32.partialorder %v1807_v43, 0.0  ;;  %v1818_v46 = vmul.f32 0.2, %v1807_v43  ;;  %v1821_v49 = vsel %vm1813_vm2, %v1805_v38, %v1817_v42  ;;  %v5892_v38 = vcombine.high %v2901_v1, %v2905_v7  ;;  %v2885_v44 = vld [vmem:[#allocation6 + $0x2c0] sm:$0xff] }
 0x1de   :  { %v7067_v54 = vpack.c.bf16 %v1821_v49, %v1821_v49  ;;  %v5884_v42 = vcombine.high %v2893_v16, %v2897_v40  ;;  %v5876_v49 = vcombine.high %v2885_v44, %v2889_v45  ;;  %v2957_v27 = vld [vmem:[#allocation6 + $0x500] sm:$0xff] }
 0x1df   :  { %v1822_v50 = vsel %vm1814_vm3, %v1807_v43, %v1818_v46  ;;  %4390 = vmatpush1.bf16.msra.mxu0 %v5787_v21  ;;  %v6739_v43 = vld [vmem:[#allocation4 + $0x32c] ss:$16 sps:$4 sm:$0xff]   ;;  %v5883_v46 = vcombine.low %v2893_v16, %v2897_v40  ;;  %v2961_v21 = vld [vmem:[#allocation6 + $0x520] sm:$0xff] }
 0x1e0   :  { %v1826_v52 = vpack.c.bf16 %v1822_v50, %v1822_v50  ;;  %4391 = vmatprep.subr.bf16.mxu0 %v5908_v29  ;;  %v6742_v50 = vld [vmem:[#allocation4 + $0x30c] ss:$16 sps:$4 sm:$0xff]   ;;  %v5947_v28 = vcombine.low %v2957_v27, %v2961_v21  ;;  %v5948_v18 = vcombine.high %v2957_v27, %v2961_v21  ;;  %v2953_v29 = vld [vmem:[#allocation6 + $0x4e0] sm:$0xff] }
 0x1e1   :  { %v5939_v30 = vcombine.low %v2949_v22, %v2953_v29  ;;  %v2933_v7 = vld [vmem:[#allocation6 + $0x440] sm:$0xff]  ;;  %v7083_v27 = vld [vmem:[#allocation6 + $0x5c8] sm:$0xff] }
 0x1e2   :  { %2690 = vmatprep.mubr.bf16.mxu1 %v1826_v52  ;;  %v2925_v40 = vld [vmem:[#allocation6 + $0x400] sm:$0xff]  ;;  %v7085_v21 = vld [vmem:[#allocation6 + $0x5e8] sm:$0xff] }
 0x1e3   :  { %2691 = vmatmul.mubr.bf16.vlgmr.msra.gmra.mxu1 %v7067_v54  ;;  %4392 = vmatpush2.bf16.msra.mxu0 %v5907_v31  ;;  %v5940_v31 = vcombine.high %v2949_v22, %v2953_v29 }
 0x1e4   :  { %2741 = vmatpush1.bf16.msra.mxu1 %v6695_v53  ;;  %2772 = vmatprep.mubr.bf16.mxu1 %v1826_v52  ;;  %v2877_v52 = vld [vmem:[#allocation6 + $0x280] sm:$0xff] }
 0x1e5   :  { %2742 = vmatprep.subr.bf16.mxu1 %v6700_v55  ;;  %4393 = vmatprep.subr.bf16.mxu0 %v5900_v33  ;;  %v2881_v53 = vld [vmem:[#allocation6 + $0x2a0] sm:$0xff]  ;;  %v5875_v55 = vcombine.low %v2885_v44, %v2889_v45 }
 0x1e6   :  { %v2945_v33 = vld [vmem:[#allocation6 + $0x4a0] sm:$0xff] }
 0x1e7   :  { %4394 = vmatpush2.bf16.msra.mxu0 %v5899_v34  ;;  %v2937_v34 = vld [vmem:[#allocation6 + $0x460] sm:$0xff] }
 0x1e8   :  { %2743 = vmatpush1.bf16.msra.mxu1 %v6698_v56  ;;  %4395 = vmatprep.subr.bf16.mxu0 %v5892_v38  ;;  %v6740_v56 = vld [vmem:[#allocation4 + $0x308] ss:$16 sps:$4 sm:$0xff]   ;;  %v5923_v38 = vcombine.low %v2933_v7, %v2937_v34  ;;  %v3045_v45 = vld [vmem:[#allocation6 + $0x7c0] sm:$0xff] }
 0x1e9   :  { %2744 = vmatprep.subr.bf16.mxu1 %v6703_v57  ;;  %v5868_v57 = vcombine.high %v2877_v52, %v2881_v53 }
 0x1eb   :  { %4396 = vmatpush2.bf16.msra.mxu0 %v5891_v41  ;;  %v2929_v41 = vld [vmem:[#allocation6 + $0x420] sm:$0xff] }
 0x1ec   :  { %2745 = vmatpush1.bf16.msra.mxu1 %v6701_v58  ;;  %4397 = vmatprep.subr.bf16.mxu0 %v5884_v42  ;;  %v5867_v58 = vcombine.low %v2877_v52, %v2881_v53  ;;  %v5915_v42 = vcombine.low %v2925_v40, %v2929_v41  ;;  %v3041_v52 = vld [vmem:[#allocation6 + $0x7a0] sm:$0xff] }
 0x1ed   :  { %2746 = vmatprep.subr.bf16.mxu1 %v6706_v59  ;;  %v2869_v59 = vld [vmem:[#allocation6 + $0x240] sm:$0xff] }
 0x1ef   :  { %4398 = vmatpush2.bf16.msra.mxu0 %v5883_v46  ;;  %v3049_v46 = vld [vmem:[#allocation6 + $0x7e0] sm:$0xff] }
 0x1f0   :  { %2747 = vmatpush1.bf16.msra.mxu1 %v6704_v60  ;;  %4399 = vmatprep.subr.bf16.mxu0 %v5876_v49  ;;  %v2873_v60 = vld [vmem:[#allocation6 + $0x260] sm:$0xff]  ;;  %v6036_v49 = vcombine.high %v3045_v45, %v3049_v46 }
 0x1f1   :  { %2748 = vmatprep.subr.bf16.mxu1 %v6709_v61  ;;  %v5860_v61 = vcombine.high %v2869_v59, %v2873_v60 }
 0x1f3   :  { %4400 = vmatpush2.bf16.msra.mxu0 %v5875_v55 }
 0x1f4   :  { %2749 = vmatpush1.bf16.msra.mxu1 %v6707_v15  ;;  %4401 = vmatprep.subr.bf16.mxu0 %v5868_v57  ;;  %v5859_v15 = vcombine.low %v2869_v59, %v2873_v60  ;;  %v3033_v57 = vld [vmem:[#allocation6 + $0x760] sm:$0xff] }
 0x1f5   :  { %2750 = vmatprep.subr.bf16.mxu1 %v6712_v62  ;;  %v2861_v62 = vld [vmem:[#allocation6 + $0x200] sm:$0xff] }
 0x1f6   :  { %v3021_v60 = vld [vmem:[#allocation6 + $0x700] sm:$0xff] }
 0x1f7   :  { %4402 = vmatpush2.bf16.msra.mxu0 %v5867_v58 }
 0x1f8   :  { %2751 = vmatpush1.bf16.msra.mxu1 %v6710_v47  ;;  %4403 = vmatprep.subr.bf16.mxu0 %v5860_v61  ;;  %v2865_v47 = vld [vmem:[#allocation6 + $0x220] sm:$0xff] }
 0x1f9   :  { %2752 = vmatprep.subr.bf16.mxu1 %v6715_v6  ;;  %v5852_v6 = vcombine.high %v2861_v62, %v2865_v47  ;;  %v3025_v61 = vld [vmem:[#allocation6 + $0x720] sm:$0xff] }
 0x1fb   :  { %4404 = vmatpush2.bf16.msra.mxu0 %v5859_v15  ;;  %v6011_v15 = vcombine.low %v3021_v60, %v3025_v61 }
 0x1fc   :  { %2753 = vmatpush1.bf16.msra.mxu1 %v6713_v3  ;;  %v5851_v3 = vcombine.low %v2861_v62, %v2865_v47  ;;  %4405 = vmatprep.subr.bf16.mxu0 %v5852_v6  ;;  %v6012_v62 = vcombine.high %v3021_v60, %v3025_v61  ;;  %v3013_v47 = vld [vmem:[#allocation6 + $0x6c0] sm:$0xff]  ;;  %v2822_v60 = vld [vmem:[#allocation6 + $0xc8] sm:$0xff] }
 0x1fd   :  { %2754 = vmatprep.subr.bf16.mxu1 %v6718_v4  ;;  %v2981_v4 = vld [vmem:[#allocation6 + $0x5c0] sm:$0xff]  ;;  %v2826_v61 = vld [vmem:[#allocation6 + $0xe8] sm:$0xff] }
 0x1fe   :  { %v3017_v6 = vld [vmem:[#allocation6 + $0x6e0] sm:$0xff] }
 0x1ff   :  { %4406 = vmatpush2.bf16.msra.mxu0 %v5851_v3  ;;  %v6003_v3 = vcombine.low %v3013_v47, %v3017_v6 }
 0x200   :  { %2755 = vmatpush1.bf16.msra.mxu1 %v6716_v35  ;;  %v2985_v35 = vld [vmem:[#allocation6 + $0x5e0] sm:$0xff] }
 0x201   :  { %2756 = vmatprep.subr.bf16.mxu1 %v6721_v5  ;;  %v5971_v5 = vcombine.low %v2981_v4, %v2985_v35 }
 0x204   :  { %2757 = vmatpush2.bf16.msra.mxu1 %v6719_v8  ;;  %v5972_v8 = vcombine.high %v2981_v4, %v2985_v35  ;;  %v6004_v4 = vcombine.high %v3013_v47, %v3017_v6  ;;  %v3005_v35 = vld [vmem:[#allocation6 + $0x680] sm:$0xff]  ;;  %v2814_v47 = vld [vmem:[#allocation6 + $0x88] sm:$0xff] }
 0x205   :  { %2758 = vmatprep.subr.bf16.mxu1 %v6724_v10  ;;  %v7071_v10 = vld [vmem:[#allocation6 + $0x1c8] sm:$0xff] }
 0x206   :  { %v2806_v6 = vld [vmem:[#allocation6 + $0x48] sm:$0xff] }
 0x208   :  { %2759 = vmatpush2.bf16.msra.mxu1 %v6722_v14  ;;  %v2973_v14 = vld [vmem:[#allocation6 + $0x580] sm:$0xff] }
 0x209   :  { %2760 = vmatprep.subr.bf16.mxu1 %v6727_v20  ;;  %v5963_v20 = vcombine.low %v2973_v14, %v2977_v19  ;;  %v5964_v23 = vcombine.high %v2973_v14, %v2977_v19  ;;  %v2997_v14 = vld [vmem:[#allocation6 + $0x640] sm:$0xff] }
 0x20a   :  { %v3001_v19 = vld [vmem:[#allocation6 + $0x660] sm:$0xff] }
 0x20c   :  { %2761 = vmatpush2.bf16.msra.mxu1 %v6725_v26  ;;  %v5955_v26 = vcombine.low %v2965_v24, %v2969_v25 }
 0x20d   :  { %2762 = vmatprep.subr.bf16.mxu1 %v6730_v17  ;;  %v5956_v17 = vcombine.high %v2965_v24, %v2969_v25  ;;  %v2989_v24 = vld [vmem:[#allocation6 + $0x600] sm:$0xff] }
 0x20e   :  { %v2993_v25 = vld [vmem:[#allocation6 + $0x620] sm:$0xff] }
 0x210   :  { %2763 = vmatpush2.bf16.msra.mxu1 %v6728_v32  ;;  %v2941_v32 = vld [vmem:[#allocation6 + $0x480] sm:$0xff] }
 0x211   :  { %2764 = vmatprep.subr.bf16.mxu1 %v6733_v51  ;;  %v5931_v51 = vcombine.low %v2941_v32, %v2945_v33  ;;  %v5932_v1 = vcombine.high %v2941_v32, %v2945_v33  ;;  %v7098_v32 = vld [vmem:[%s7185_s4] sm:$0xf] }
 0x212   :  { %v1960_v33 = vrot.slane %v7098_v32, %v7029_v0 }
 0x214   :  { %2765 = vmatpush2.bf16.msra.mxu1 %v6731_v36 }
 0x215   :  { %2766 = vmatprep.subr.bf16.mxu1 %v6736_v39  ;;  %v5924_v39 = vcombine.high %v2933_v7, %v2937_v34 }
 0x218   :  { %2767 = vmatpush2.bf16.msra.mxu1 %v6734_v37 }
 0x219   :  { %2768 = vmatprep.subr.bf16.mxu1 %v6739_v43  ;;  %v5916_v43 = vcombine.high %v2925_v40, %v2929_v41 }
 0x21c   :  { %2769 = vmatpush2.bf16.msra.mxu1 %v6737_v48  ;;  %v6035_v48 = vcombine.low %v3045_v45, %v3049_v46  ;;  %v2846_v45 = vld [vmem:[#allocation6 + $0x188] sm:$0xff] }
 0x21d   :  { %2770 = vmatprep.subr.bf16.mxu1 %v6742_v50  ;;  %v3037_v50 = vld [vmem:[#allocation6 + $0x780] sm:$0xff]  ;;  %v2850_v46 = vld [vmem:[#allocation6 + $0x1a8] sm:$0xff] }
 0x21e   :  { %v6027_v53 = vcombine.low %v3037_v50, %v3041_v52  ;;  %v6028_v55 = vcombine.high %v3037_v50, %v3041_v52  ;;  %v2842_v52 = vld [vmem:[#allocation6 + $0x168] sm:$0xff] }
 0x220   :  { %2771 = vmatpush2.bf16.msra.mxu1 %v6740_v56  ;;  %v3029_v56 = vld [vmem:[#allocation6 + $0x740] sm:$0xff] }
 0x221   :  { %4416 = vmatprep.subr.bf16.mxu1 %v5972_v8  ;;  %v6019_v58 = vcombine.low %v3029_v56, %v3033_v57  ;;  %v6020_v59 = vcombine.high %v3029_v56, %v3033_v57  ;;  %v2830_v56 = vld [vmem:[#allocation6 + $0x108] sm:$0xff] }
 0x222   :  { %v2834_v57 = vld [vmem:[#allocation6 + $0x128] sm:$0xff] }
 0x223   :  { %2773 = vmatmul.mubr.bf16.vlgmr.msra.gmra.mxu1 %v7067_v54  ;;  %v7073_v54 = vld [vmem:[#allocation6 + $0x1e8] sm:$0xff] }
 0x224   :  { %v5846_v11 = vcombine.high %v7071_v10, %v7073_v54  ;;  %v5845_v12 = vcombine.low %v7071_v10, %v7073_v54  ;;  %4417 = vmatpush1.bf16.msra.mxu1 %v5971_v5  ;;  %v3009_v5 = vld [vmem:[#allocation6 + $0x6a0] sm:$0xff]  ;;  %v2818_v10 = vld [vmem:[#allocation6 + $0xa8] sm:$0xff]  ;;  %v5813_v54 = vcombine.low %v2822_v60, %v2826_v61 }
 0x225   :  { %4418 = vmatprep.subr.bf16.mxu1 %v5964_v23  ;;  %v5995_v8 = vcombine.low %v3005_v35, %v3009_v5  ;;  %v5987_v23 = vcombine.low %v2997_v14, %v3001_v19 }
 0x226   :  { %4457 = vmatprep.subr.bf16.mxu0 %v5846_v11  ;;  %v5996_v11 = vcombine.high %v3005_v35, %v3009_v5  ;;  %v2798_v5 = vld [vmem:[#allocation6 + $0x8] sm:$0xff] }
 0x228   :  { %4419 = vmatpush1.bf16.msra.mxu1 %v5963_v20  ;;  %v5988_v20 = vcombine.high %v2997_v14, %v3001_v19  ;;  %v2918_v19 = vld [vmem:[#allocation6 + $0x3c8] sm:$0xff] }
 0x229   :  { %4420 = vmatprep.subr.bf16.mxu1 %v5956_v17  ;;  %v5979_v17 = vcombine.low %v2989_v24, %v2993_v25 }
 0x22c   :  { %4421 = vmatpush1.bf16.msra.mxu1 %v5955_v26  ;;  %v5980_v26 = vcombine.high %v2989_v24, %v2993_v25  ;;  %v2910_v25 = vld [vmem:[#allocation6 + $0x388] sm:$0xff] }
 0x22d   :  { %4422 = vmatprep.subr.bf16.mxu1 %v5948_v18  ;;  %v5973_v18 = vcombine.low %v7083_v27, %v7085_v21 }
 0x230   :  { %4423 = vmatpush1.bf16.msra.mxu1 %v5947_v28  ;;  %v5974_v28 = vcombine.high %v7083_v27, %v7085_v21 }
 0x231   :  { %4424 = vmatprep.subr.bf16.mxu1 %v5940_v31 }
 0x234   :  { %4425 = vmatpush1.bf16.msra.mxu1 %v5939_v30 }
 0x235   :  { %4426 = vmatprep.subr.bf16.mxu1 %v5932_v1 }
 0x238   :  { %4427 = vmatpush1.bf16.msra.mxu1 %v5931_v51  ;;  %v1964_v51 = vrot.slane %v7098_v32, %v7037_v2 }
 0x239   :  { %4428 = vmatprep.subr.bf16.mxu1 %v5924_v39 }
 0x23c   :  { %4429 = vmatpush1.bf16.msra.mxu1 %v5923_v38 }
 0x23d   :  { %4430 = vmatprep.subr.bf16.mxu1 %v5916_v43 }
 0x240   :  { %4431 = vmatpush1.bf16.msra.mxu1 %v5915_v42 }
 0x241   :  { %4432 = vmatprep.subr.bf16.mxu1 %v6036_v49 }
 0x242   :  { %v7079_v36 = vpop.f32.mrf.mxu0 }
 0x243   :  { %v2652_v1 = vadd.f32 %v7079_v36, %v1960_v33  ;;  %v5838_v36 = vcombine.high %v2846_v45, %v2850_v46 }
 0x244   :  { %v7081_v16 = vpop.f32.mrf.mxu0  ;;  %4433 = vmatpush2.bf16.msra.mxu1 %v6035_v48 }
 0x245   :  { %4434 = vmatprep.subr.bf16.mxu1 %v6028_v55  ;;  %v2654_v34 = vadd.f32 %v7081_v16, %v1964_v51  ;;  %v2838_v16 = vld [vmem:[#allocation6 + $0x148] sm:$0xff] }
 0x246   :  { %v2655_v37 = vpop.f32.mrf.mxu0  ;;  %v5830_v55 = vcombine.high %v2838_v16, %v2842_v52 }
 0x248   :  { %v2656_v44 = vpop.f32.mrf.mxu0  ;;  %4435 = vmatpush2.bf16.msra.mxu1 %v6027_v53  ;;  %v5837_v53 = vcombine.low %v2846_v45, %v2850_v46  ;;  %v2870_v46 = vld [vmem:[#allocation6 + $0x248] sm:$0xff] }
 0x249   :  { %4436 = vmatprep.subr.bf16.mxu1 %v6020_v59  ;;  %v5822_v59 = vcombine.high %v2830_v56, %v2834_v57 }
 0x24c   :  { %4437 = vmatpush2.bf16.msra.mxu1 %v6019_v58  ;;  %v5829_v58 = vcombine.low %v2838_v16, %v2842_v52  ;;  %v1972_v52 = vrot.slane %v7098_v32, %v7059_v13 }
 0x24d   :  { %4438 = vmatprep.subr.bf16.mxu1 %v6012_v62  ;;  %v5814_v62 = vcombine.high %v2822_v60, %v2826_v61 }
 0x250   :  { %4439 = vmatpush2.bf16.msra.mxu1 %v6011_v15  ;;  %v5821_v15 = vcombine.low %v2830_v56, %v2834_v57  ;;  %v2866_v56 = vld [vmem:[#allocation6 + $0x228] sm:$0xff] }
 0x251   :  { %4440 = vmatprep.subr.bf16.mxu1 %v6004_v4  ;;  %v5805_v4 = vcombine.low %v2814_v47, %v2818_v10 }
 0x254   :  { %4441 = vmatpush2.bf16.msra.mxu1 %v6003_v3  ;;  %v2810_v3 = vld [vmem:[#allocation6 + $0x68] sm:$0xff] }
 0x255   :  { %4442 = vmatprep.subr.bf16.mxu1 %v5996_v11  ;;  %v5798_v35 = vcombine.high %v2806_v6, %v2810_v3  ;;  %v5797_v11 = vcombine.low %v2806_v6, %v2810_v3 }
 0x258   :  { %4443 = vmatpush2.bf16.msra.mxu1 %v5995_v8  ;;  %v2802_v8 = vld [vmem:[#allocation6 + $0x28] sm:$0xff] }
 0x259   :  { %4444 = vmatprep.subr.bf16.mxu1 %v5988_v20  ;;  %v5790_v14 = vcombine.high %v2798_v5, %v2802_v8  ;;  %v2922_v20 = vld [vmem:[#allocation6 + $0x3e8] sm:$0xff] }
 0x25a   :  { %v5910_v24 = vcombine.high %v2918_v19, %v2922_v20 }
 0x25c   :  { %4445 = vmatpush2.bf16.msra.mxu1 %v5987_v23  ;;  %v5789_v23 = vcombine.low %v2798_v5, %v2802_v8  ;;  %v2974_v5 = vld [vmem:[#allocation6 + $0x588] sm:$0xff] }
 0x25d   :  { %4446 = vmatprep.subr.bf16.mxu1 %v5980_v26  ;;  %v2914_v26 = vld [vmem:[#allocation6 + $0x3a8] sm:$0xff] }
 0x25e   :  { %v5901_v33 = vcombine.low %v2910_v25, %v2914_v26  ;;  %v2978_v8 = vld [vmem:[#allocation6 + $0x5a8] sm:$0xff] }
 0x260   :  { %4447 = vmatpush2.bf16.msra.mxu1 %v5979_v17  ;;  %v5909_v17 = vcombine.low %v2918_v19, %v2922_v20 }
 0x261   :  { %4498 = vmatprep.subr.bf16.mxu1 %v5974_v28  ;;  %v5902_v28 = vcombine.high %v2910_v25, %v2914_v26  ;;  %v2966_v26 = vld [vmem:[#allocation6 + $0x548] sm:$0xff] }
 0x282   :  { %v7091_v22 = vpop.f32.mrf.mxu0 }
 0x284   :  { %v7093_v29 = vpop.f32.mrf.mxu0 }
 0x285   :  { %v2736_v60 = vadd.f32 %v7093_v29, %v1972_v52  ;;  %v2815_v52 = vld [vmem:[#allocation6 + $0x90] sm:$0xff] }
 0x286   :  { %v2737_v30 = vpop.f32.mrf.mxu0 }
 0x287   :  { %v2902_v30 = vld [vmem:[#allocation6 + $0x348] sm:$0xff] }
 0x288   :  { %v2738_v31 = vpop.f32.mrf.mxu0 }
 0x289   :  { %v2906_v31 = vld [vmem:[#allocation6 + $0x368] sm:$0xff] }
 0x28a   :  { %v5894_v51 = vcombine.high %v2902_v30, %v2906_v31 }
 0x2a3   :  { %v2692_v7 = vpop.f32.mrf.mxu1 }
 0x2a4   :  { %v2693_v38 = vadd.f32 %v2692_v7, %v2652_v1  ;;  %v2894_v1 = vld [vmem:[#allocation6 + $0x308] sm:$0xff] }
 0x2a5   :  { %v2694_v39 = vpop.f32.mrf.mxu1  ;;  %v2898_v7 = vld [vmem:[#allocation6 + $0x328] sm:$0xff] }
 0x2a6   :  { %vm2781_vm4 = vcmp.gt.f32.partialorder %v2693_v38, 0.0  ;;  %v2785_v40 = vmul.f32 0.2, %v2693_v38  ;;  %v2695_v41 = vadd.f32 %v2694_v39, %v2654_v34  ;;  %v5893_v34 = vcombine.low %v2902_v30, %v2906_v31  ;;  %v2886_v39 = vld [vmem:[#allocation6 + $0x2c8] sm:$0xff]  ;;  %v2843_v30 = vld [vmem:[#allocation6 + $0x170] sm:$0xff] }
 0x2a7   :  { %v2696_v37 = vpop.f32.mrf.mxu1  ;;  %v5965_v31 = vcombine.low %v2974_v5, %v2978_v8 }
 0x2a8   :  { %vm2782_vm5 = vcmp.gt.f32.partialorder %v2695_v41, 0.0  ;;  %v2786_v42 = vmul.f32 0.2, %v2695_v41  ;;  %v2789_v43 = vsel %vm2781_vm4, %v2693_v38, %v2785_v40  ;;  %v5886_v38 = vcombine.high %v2894_v1, %v2898_v7  ;;  %v2890_v40 = vld [vmem:[#allocation6 + $0x2e8] sm:$0xff] }
 0x2a9   :  { %v2697_v44 = vpop.f32.mrf.mxu1  ;;  %v7108_v50 = vpack.c.bf16 %v2789_v43, %v2789_v43  ;;  %v5878_v37 = vcombine.high %v2886_v39, %v2890_v40  ;;  %v2882_v43 = vld [vmem:[#allocation6 + $0x2a8] sm:$0xff] }
 0x2aa   :  { %v2790_v48 = vsel %vm2782_vm5, %v2695_v41, %v2786_v42  ;;  %v5885_v41 = vcombine.low %v2894_v1, %v2898_v7  ;;  %v2878_v42 = vld [vmem:[#allocation6 + $0x288] sm:$0xff]  ;;  %v5877_v44 = vcombine.low %v2886_v39, %v2890_v40  ;;  %v2835_v39 = vld [vmem:[#allocation6 + $0x130] sm:$0xff] }
 0x2ab   :  { %v7106_v49 = vpack.c.bf16 %v2790_v48, %v2790_v48  ;;  %v5870_v45 = vcombine.high %v2878_v42, %v2882_v43  ;;  %v2874_v48 = vld [vmem:[#allocation6 + $0x268] sm:$0xff]  ;;  %v5869_v16 = vcombine.low %v2878_v42, %v2882_v43  ;;  %v2823_v42 = vld [vmem:[#allocation6 + $0xd0] sm:$0xff] }
 0x2ac   :  { %v2958_v7 = vld [vmem:[#allocation6 + $0x508] sm:$0xff]  ;;  %v2827_v43 = vld [vmem:[#allocation6 + $0xf0] sm:$0xff] }
 0x2ad   :  { %4407 = vmatprep.mubr.bf16.mxu0 %v7106_v49 }
 0x2ae   :  { %4408 = vmatmul.mubr.bf16.vlgmr.msra.gmra.mxu0 %v7108_v50 }
 0x2af   :  { %4458 = vmatpush1.bf16.msra.mxu0 %v5845_v12  ;;  %4489 = vmatprep.mubr.bf16.mxu0 %v7106_v49  ;;  %v5806_v12 = vcombine.high %v2814_v47, %v2818_v10  ;;  %v2855_v47 = vld [vmem:[#allocation6 + $0x1d0] sm:$0xff] }
 0x2b0   :  { %4459 = vmatprep.subr.bf16.mxu0 %v5838_v36  ;;  %v1968_v36 = vrot.slane %v7098_v32, %v7056_v9  ;;  %v2859_v10 = vld [vmem:[#allocation6 + $0x1f0] sm:$0xff] }
 0x2b2   :  { %v2734_v57 = vadd.f32 %v7091_v22, %v1968_v36  ;;  %v5848_v22 = vcombine.high %v2855_v47, %v2859_v10  ;;  %v2942_v36 = vld [vmem:[#allocation6 + $0x488] sm:$0xff] }
 0x2b3   :  { %4460 = vmatpush1.bf16.msra.mxu0 %v5837_v53  ;;  %v5862_v53 = vcombine.high %v2870_v46, %v2874_v48 }
 0x2b4   :  { %4461 = vmatprep.subr.bf16.mxu0 %v5830_v55  ;;  %v2862_v55 = vld [vmem:[#allocation6 + $0x208] sm:$0xff] }
 0x2b5   :  { %v5853_v6 = vcombine.low %v2862_v55, %v2866_v56 }
 0x2b7   :  { %4462 = vmatpush1.bf16.msra.mxu0 %v5829_v58 }
 0x2b8   :  { %4463 = vmatprep.subr.bf16.mxu0 %v5822_v59  ;;  %v5861_v59 = vcombine.low %v2870_v46, %v2874_v48  ;;  %v5816_v48 = vcombine.high %v2823_v42, %v2827_v43 }
 0x2bb   :  { %4464 = vmatpush1.bf16.msra.mxu0 %v5821_v15  ;;  %v5854_v15 = vcombine.high %v2862_v55, %v2866_v56  ;;  %v5815_v56 = vcombine.low %v2823_v42, %v2827_v43  ;;  %v3026_v42 = vld [vmem:[#allocation6 + $0x728] sm:$0xff]  ;;  %v2895_v43 = vld [vmem:[#allocation6 + $0x310] sm:$0xff] }
 0x2bc   :  { %4465 = vmatprep.subr.bf16.mxu0 %v5814_v62 }
 0x2bf   :  { %4466 = vmatpush1.bf16.msra.mxu0 %v5813_v54 }
 0x2c0   :  { %4467 = vmatprep.subr.bf16.mxu0 %v5806_v12 }
 0x2c3   :  { %4468 = vmatpush1.bf16.msra.mxu0 %v5805_v4 }
 0x2c4   :  { %4469 = vmatprep.subr.bf16.mxu0 %v5798_v35 }
 0x2c7   :  { %4470 = vmatpush1.bf16.msra.mxu0 %v5797_v11  ;;  %v2847_v11 = vld [vmem:[#allocation6 + $0x190] sm:$0xff] }
 0x2c8   :  { %4471 = vmatprep.subr.bf16.mxu0 %v5790_v14  ;;  %v2851_v14 = vld [vmem:[#allocation6 + $0x1b0] sm:$0xff] }
 0x2c9   :  { %v5840_v25 = vcombine.high %v2847_v11, %v2851_v14 }
 0x2cb   :  { %4472 = vmatpush1.bf16.msra.mxu0 %v5789_v23  ;;  %v5847_v23 = vcombine.low %v2855_v47, %v2859_v10 }
 0x2cc   :  { %4473 = vmatprep.subr.bf16.mxu0 %v5910_v24  ;;  %v5966_v24 = vcombine.high %v2974_v5, %v2978_v8  ;;  %v3050_v8 = vld [vmem:[#allocation6 + $0x7e8] sm:$0xff] }
 0x2cf   :  { %4474 = vmatpush2.bf16.msra.mxu0 %v5909_v17  ;;  %v2970_v17 = vld [vmem:[#allocation6 + $0x568] sm:$0xff] }
 0x2d0   :  { %4475 = vmatprep.subr.bf16.mxu0 %v5902_v28  ;;  %v2839_v28 = vld [vmem:[#allocation6 + $0x150] sm:$0xff]  ;;  %v5957_v40 = vcombine.low %v2966_v26, %v2970_v17 }
 0x2d1   :  { %v5832_v1 = vcombine.high %v2839_v28, %v2843_v30  ;;  %v5831_v27 = vcombine.low %v2839_v28, %v2843_v30  ;;  %v3042_v28 = vld [vmem:[#allocation6 + $0x7a8] sm:$0xff]  ;;  %v2911_v30 = vld [vmem:[#allocation6 + $0x390] sm:$0xff] }
 0x2d3   :  { %4476 = vmatpush2.bf16.msra.mxu0 %v5901_v33  ;;  %v5839_v33 = vcombine.low %v2847_v11, %v2851_v14  ;;  %v2919_v11 = vld [vmem:[#allocation6 + $0x3d0] sm:$0xff] }
 0x2d4   :  { %4477 = vmatprep.subr.bf16.mxu0 %v5894_v51  ;;  %v5958_v51 = vcombine.high %v2966_v26, %v2970_v17  ;;  %v2923_v14 = vld [vmem:[#allocation6 + $0x3f0] sm:$0xff]  ;;  %v3038_v17 = vld [vmem:[#allocation6 + $0x788] sm:$0xff] }
 0x2d5   :  { %v5912_v26 = vcombine.high %v2919_v11, %v2923_v14 }
 0x2d7   :  { %4478 = vmatpush2.bf16.msra.mxu0 %v5893_v34  ;;  %v2962_v34 = vld [vmem:[#allocation6 + $0x528] sm:$0xff] }
 0x2d8   :  { %4479 = vmatprep.subr.bf16.mxu0 %v5886_v38  ;;  %v2831_v38 = vld [vmem:[#allocation6 + $0x110] sm:$0xff]  ;;  %v5950_v21 = vcombine.high %v2958_v7, %v2962_v34 }
 0x2db   :  { %4480 = vmatpush2.bf16.msra.mxu0 %v5885_v41  ;;  %v2950_v41 = vld [vmem:[#allocation6 + $0x4c8] sm:$0xff] }
 0x2dc   :  { %4481 = vmatprep.subr.bf16.mxu0 %v5878_v37  ;;  %v2954_v37 = vld [vmem:[#allocation6 + $0x4e8] sm:$0xff] }
 0x2dd   :  { %v5942_v46 = vcombine.high %v2950_v41, %v2954_v37  ;;  %v5941_v55 = vcombine.low %v2950_v41, %v2954_v37  ;;  %v3022_v37 = vld [vmem:[#allocation6 + $0x708] sm:$0xff] }
 0x2df   :  { %4482 = vmatpush2.bf16.msra.mxu0 %v5877_v44  ;;  %v5949_v44 = vcombine.low %v2958_v7, %v2962_v34  ;;  %v3030_v34 = vld [vmem:[#allocation6 + $0x748] sm:$0xff] }
 0x2e0   :  { %4483 = vmatprep.subr.bf16.mxu0 %v5870_v45  ;;  %v5823_v45 = vcombine.low %v2831_v38, %v2835_v39 }
 0x2e3   :  { %v2774_v58 = vpop.f32.mrf.mxu1  ;;  %4484 = vmatpush2.bf16.msra.mxu0 %v5869_v16  ;;  %v2946_v16 = vld [vmem:[#allocation6 + $0x4a8] sm:$0xff] }
 0x2e4   :  { %v2775_v61 = vadd.f32 %v2774_v58, %v2734_v57  ;;  %4485 = vmatprep.subr.bf16.mxu0 %v5862_v53  ;;  %v2819_v53 = vld [vmem:[#allocation6 + $0xb0] sm:$0xff]  ;;  %v5934_v57 = vcombine.high %v2942_v36, %v2946_v16 }
 0x2e5   :  { %v2776_v62 = vpop.f32.mrf.mxu1  ;;  %v5808_v58 = vcombine.high %v2815_v52, %v2819_v53  ;;  %v5807_v47 = vcombine.low %v2815_v52, %v2819_v53  ;;  %v3018_v52 = vld [vmem:[#allocation6 + $0x6e8] sm:$0xff]  ;;  %v2887_v53 = vld [vmem:[#allocation6 + $0x2d0] sm:$0xff] }
 0x2e6   :  { %vm2783_vm6 = vcmp.gt.f32.partialorder %v2775_v61, 0.0  ;;  %v2787_v54 = vmul.f32 0.2, %v2775_v61  ;;  %v2777_v32 = vadd.f32 %v2776_v62, %v2736_v60  ;;  %v2938_v60 = vld [vmem:[#allocation6 + $0x468] sm:$0xff]  ;;  %v5933_v62 = vcombine.low %v2942_v36, %v2946_v16 }
 0x2e7   :  { %v2778_v12 = vpop.f32.mrf.mxu1  ;;  %4486 = vmatpush2.bf16.msra.mxu0 %v5861_v59  ;;  %v2934_v59 = vld [vmem:[#allocation6 + $0x448] sm:$0xff] }
 0x2e8   :  { %vm2784_vm7 = vcmp.gt.f32.partialorder %v2777_v32, 0.0  ;;  %v2788_v3 = vmul.f32 0.2, %v2777_v32  ;;  %4487 = vmatprep.subr.bf16.mxu0 %v5854_v15  ;;  %v2791_v4 = vsel %vm2783_vm6, %v2775_v61, %v2787_v54  ;;  %v2807_v61 = vld [vmem:[#allocation6 + $0x50] sm:$0xff]  ;;  %v5926_v10 = vcombine.high %v2934_v59, %v2938_v60  ;;  %v2930_v12 = vld [vmem:[#allocation6 + $0x428] sm:$0xff] }
 0x2e9   :  { %v2779_v35 = vpop.f32.mrf.mxu1  ;;  %v7124_v20 = vpack.c.bf16 %v2791_v4, %v2791_v4  ;;  %v2811_v15 = vld [vmem:[#allocation6 + $0x70] sm:$0xff]  ;;  %v3014_v16 = vld [vmem:[#allocation6 + $0x6c8] sm:$0xff] }
 0x2ea   :  { %v2792_v29 = vsel %vm2784_vm7, %v2777_v32, %v2788_v3  ;;  %v5800_v54 = vcombine.high %v2807_v61, %v2811_v15  ;;  %v2926_v32 = vld [vmem:[#allocation6 + $0x408] sm:$0xff]  ;;  %v2803_v3 = vld [vmem:[#allocation6 + $0x30] sm:$0xff]  ;;  %v5799_v4 = vcombine.low %v2807_v61, %v2811_v15 }
 0x2eb   :  { %v7122_v19 = vpack.c.bf16 %v2792_v29, %v2792_v29  ;;  %4488 = vmatpush2.bf16.msra.mxu0 %v5853_v6  ;;  %v2799_v6 = vld [vmem:[#allocation6 + $0x10] sm:$0xff]  ;;  %v5918_v35 = vcombine.high %v2926_v32, %v2930_v12  ;;  %v3046_v29 = vld [vmem:[#allocation6 + $0x7c8] sm:$0xff] }
 0x2ec   :  { %4539 = vmatprep.subr.bf16.mxu0 %v5848_v22  ;;  %v5925_v22 = vcombine.low %v2934_v59, %v2938_v60  ;;  %v5792_v5 = vcombine.high %v2799_v6, %v2803_v3  ;;  %v3006_v60 = vld [vmem:[#allocation6 + $0x688] sm:$0xff]  ;;  %v2879_v15 = vld [vmem:[#allocation6 + $0x290] sm:$0xff] }
 0x2ed   :  { %4448 = vmatprep.mubr.bf16.mxu1 %v7122_v19  ;;  %v3010_v61 = vld [vmem:[#allocation6 + $0x6a8] sm:$0xff] }
 0x2ee   :  { %4449 = vmatmul.mubr.bf16.vlgmr.msra.gmra.mxu1 %v7124_v20  ;;  %4490 = vmatmul.mubr.bf16.vlgmr.msra.gmra.mxu0 %v7108_v50 }
 0x2ef   :  { %4499 = vmatpush1.bf16.msra.mxu1 %v5973_v18  ;;  %4530 = vmatprep.mubr.bf16.mxu1 %v7122_v19  ;;  %v5824_v18 = vcombine.high %v2831_v38, %v2835_v39  ;;  %v3034_v38 = vld [vmem:[#allocation6 + $0x768] sm:$0xff]  ;;  %v2903_v39 = vld [vmem:[#allocation6 + $0x350] sm:$0xff] }
 0x2f0   :  { %4540 = vmatpush1.bf16.msra.mxu0 %v5847_v23  ;;  %4571 = vmatprep.mubr.bf16.mxu0 %v7106_v49  ;;  %v5917_v23 = vcombine.low %v2926_v32, %v2930_v12  ;;  %v2998_v12 = vld [vmem:[#allocation6 + $0x648] sm:$0xff] }
 0x2f1   :  { %4500 = vmatprep.subr.bf16.mxu1 %v5966_v24  ;;  %4541 = vmatprep.subr.bf16.mxu0 %v5840_v25  ;;  %v5791_v24 = vcombine.low %v2799_v6, %v2803_v3  ;;  %v6038_v25 = vcombine.high %v3046_v29, %v3050_v8  ;;  %v3002_v6 = vld [vmem:[#allocation6 + $0x668] sm:$0xff]  ;;  %v2871_v3 = vld [vmem:[#allocation6 + $0x250] sm:$0xff] }
 0x2f3   :  { %4501 = vmatpush1.bf16.msra.mxu1 %v5965_v31  ;;  %v2915_v31 = vld [vmem:[#allocation6 + $0x3b0] sm:$0xff] }
 0x2f4   :  { %4542 = vmatpush1.bf16.msra.mxu0 %v5839_v33  ;;  %4502 = vmatprep.subr.bf16.mxu1 %v5958_v51  ;;  %v6037_v33 = vcombine.low %v3046_v29, %v3050_v8  ;;  %v5911_v51 = vcombine.low %v2919_v11, %v2923_v14  ;;  %v5904_v7 = vcombine.high %v2911_v30, %v2915_v31  ;;  %v2990_v8 = vld [vmem:[#allocation6 + $0x608] sm:$0xff]  ;;  %v2863_v14 = vld [vmem:[#allocation6 + $0x210] sm:$0xff] }
 0x2f5   :  { %4543 = vmatprep.subr.bf16.mxu0 %v5832_v1  ;;  %v6030_v1 = vcombine.high %v3038_v17, %v3042_v28  ;;  %v2994_v11 = vld [vmem:[#allocation6 + $0x628] sm:$0xff] }
 0x2f7   :  { %4503 = vmatpush1.bf16.msra.mxu1 %v5957_v40  ;;  %v2907_v40 = vld [vmem:[#allocation6 + $0x370] sm:$0xff] }
 0x2f8   :  { %4544 = vmatpush1.bf16.msra.mxu0 %v5831_v27  ;;  %4504 = vmatprep.subr.bf16.mxu1 %v5950_v21  ;;  %v6029_v27 = vcombine.low %v3038_v17, %v3042_v28  ;;  %v5903_v21 = vcombine.low %v2911_v30, %v2915_v31  ;;  %v5896_v41 = vcombine.high %v2903_v39, %v2907_v40  ;;  %v2983_v28 = vld [vmem:[#allocation6 + $0x5d0] sm:$0xff]  ;;  %v2856_v31 = vld [vmem:[#allocation6 + $0x1d8] sm:$0xff] }
 0x2f9   :  { %4545 = vmatprep.subr.bf16.mxu0 %v5824_v18  ;;  %v6022_v18 = vcombine.high %v3030_v34, %v3034_v38  ;;  %v2987_v30 = vld [vmem:[#allocation6 + $0x5f0] sm:$0xff] }
 0x2fb   :  { %4505 = vmatpush1.bf16.msra.mxu1 %v5949_v44  ;;  %v2899_v44 = vld [vmem:[#allocation6 + $0x330] sm:$0xff] }
 0x2fc   :  { %4546 = vmatpush1.bf16.msra.mxu0 %v5823_v45  ;;  %4506 = vmatprep.subr.bf16.mxu1 %v5942_v46  ;;  %v6021_v45 = vcombine.low %v3030_v34, %v3034_v38  ;;  %v5895_v46 = vcombine.low %v2903_v39, %v2907_v40  ;;  %v5888_v36 = vcombine.high %v2895_v43, %v2899_v44  ;;  %v2975_v38 = vld [vmem:[#allocation6 + $0x590] sm:$0xff] }
 0x2fd   :  { %4547 = vmatprep.subr.bf16.mxu0 %v5816_v48  ;;  %v6014_v48 = vcombine.high %v3022_v37, %v3026_v42  ;;  %v2979_v39 = vld [vmem:[#allocation6 + $0x5b0] sm:$0xff]  ;;  %v5975_v40 = vcombine.low %v2983_v28, %v2987_v30 }
 0x2ff   :  { %4507 = vmatpush1.bf16.msra.mxu1 %v5941_v55  ;;  %v2891_v55 = vld [vmem:[#allocation6 + $0x2f0] sm:$0xff] }
 0x300   :  { %4548 = vmatpush1.bf16.msra.mxu0 %v5815_v56  ;;  %4508 = vmatprep.subr.bf16.mxu1 %v5934_v57  ;;  %v6013_v56 = vcombine.low %v3022_v37, %v3026_v42  ;;  %v5887_v57 = vcombine.low %v2895_v43, %v2899_v44  ;;  %v5880_v59 = vcombine.high %v2887_v53, %v2891_v55  ;;  %v2967_v37 = vld [vmem:[#allocation6 + $0x550] sm:$0xff]  ;;  %v2840_v44 = vld [vmem:[#allocation6 + $0x158] sm:$0xff] }
 0x301   :  { %4549 = vmatprep.subr.bf16.mxu0 %v5808_v58  ;;  %v6006_v58 = vcombine.high %v3014_v16, %v3018_v52  ;;  %v2971_v42 = vld [vmem:[#allocation6 + $0x570] sm:$0xff] }
 0x303   :  { %4509 = vmatpush1.bf16.msra.mxu1 %v5933_v62  ;;  %v2883_v62 = vld [vmem:[#allocation6 + $0x2b0] sm:$0xff] }
 0x304   :  { %4550 = vmatpush1.bf16.msra.mxu0 %v5807_v47  ;;  %4510 = vmatprep.subr.bf16.mxu1 %v5926_v10  ;;  %v6005_v47 = vcombine.low %v3014_v16, %v3018_v52  ;;  %v5879_v10 = vcombine.low %v2887_v53, %v2891_v55  ;;  %v5872_v32 = vcombine.high %v2879_v15, %v2883_v62  ;;  %v2959_v52 = vld [vmem:[#allocation6 + $0x510] sm:$0xff]  ;;  %v2832_v55 = vld [vmem:[#allocation6 + $0x118] sm:$0xff] }
 0x305   :  { %4551 = vmatprep.subr.bf16.mxu0 %v5800_v54  ;;  %v5998_v54 = vcombine.high %v3006_v60, %v3010_v61  ;;  %v2963_v53 = vld [vmem:[#allocation6 + $0x530] sm:$0xff] }
 0x307   :  { %4511 = vmatpush1.bf16.msra.mxu1 %v5925_v22  ;;  %v2875_v22 = vld [vmem:[#allocation6 + $0x270] sm:$0xff] }
 0x308   :  { %4552 = vmatpush1.bf16.msra.mxu0 %v5799_v4  ;;  %4512 = vmatprep.subr.bf16.mxu1 %v5918_v35  ;;  %v5997_v4 = vcombine.low %v3006_v60, %v3010_v61  ;;  %v5871_v35 = vcombine.low %v2879_v15, %v2883_v62  ;;  %v5864_v29 = vcombine.high %v2871_v3, %v2875_v22  ;;  %v2951_v61 = vld [vmem:[#allocation6 + $0x4d0] sm:$0xff]  ;;  %v2824_v62 = vld [vmem:[#allocation6 + $0xd8] sm:$0xff] }
 0x309   :  { %4553 = vmatprep.subr.bf16.mxu0 %v5792_v5  ;;  %v5990_v5 = vcombine.high %v2998_v12, %v3002_v6  ;;  %v2955_v15 = vld [vmem:[#allocation6 + $0x4f0] sm:$0xff] }
 0x30b   :  { %4513 = vmatpush1.bf16.msra.mxu1 %v5917_v23  ;;  %v2867_v23 = vld [vmem:[#allocation6 + $0x230] sm:$0xff] }
 0x30c   :  { %4554 = vmatpush1.bf16.msra.mxu0 %v5791_v24  ;;  %4514 = vmatprep.subr.bf16.mxu1 %v6038_v25  ;;  %v5989_v24 = vcombine.low %v2998_v12, %v3002_v6  ;;  %v5863_v25 = vcombine.low %v2871_v3, %v2875_v22  ;;  %v5856_v17 = vcombine.high %v2863_v14, %v2867_v23  ;;  %v2943_v12 = vld [vmem:[#allocation6 + $0x490] sm:$0xff]  ;;  %v2816_v3 = vld [vmem:[#allocation6 + $0x98] sm:$0xff] }
 0x30d   :  { %4555 = vmatprep.subr.bf16.mxu0 %v5912_v26  ;;  %v5982_v26 = vcombine.high %v2990_v8, %v2994_v11  ;;  %v2947_v6 = vld [vmem:[#allocation6 + $0x4b0] sm:$0xff]  ;;  %v2820_v22 = vld [vmem:[#allocation6 + $0xb8] sm:$0xff] }
 0x30f   :  { %4515 = vmatpush2.bf16.msra.mxu1 %v6037_v33  ;;  %v2860_v33 = vld [vmem:[#allocation6 + $0x1f8] sm:$0xff] }
 0x310   :  { %4556 = vmatpush2.bf16.msra.mxu0 %v5911_v51  ;;  %4516 = vmatprep.subr.bf16.mxu1 %v6030_v1  ;;  %v5981_v51 = vcombine.low %v2990_v8, %v2994_v11  ;;  %v5855_v1 = vcombine.low %v2863_v14, %v2867_v23  ;;  %v5850_v34 = vcombine.high %v2856_v31, %v2860_v33  ;;  %v2935_v8 = vld [vmem:[#allocation6 + $0x450] sm:$0xff]  ;;  %v2808_v14 = vld [vmem:[#allocation6 + $0x58] sm:$0xff] }
 0x311   :  { %4557 = vmatprep.subr.bf16.mxu0 %v5904_v7  ;;  %v5976_v7 = vcombine.high %v2983_v28, %v2987_v30  ;;  %v2939_v11 = vld [vmem:[#allocation6 + $0x470] sm:$0xff]  ;;  %v2812_v23 = vld [vmem:[#allocation6 + $0x78] sm:$0xff] }
 0x312   :  { %v2927_v28 = vld [vmem:[#allocation6 + $0x410] sm:$0xff] }
 0x313   :  { %4517 = vmatpush2.bf16.msra.mxu1 %v6029_v27  ;;  %v2848_v27 = vld [vmem:[#allocation6 + $0x198] sm:$0xff]  ;;  %v2931_v30 = vld [vmem:[#allocation6 + $0x430] sm:$0xff] }
 0x314   :  { %4558 = vmatpush2.bf16.msra.mxu0 %v5903_v21  ;;  %4518 = vmatprep.subr.bf16.mxu1 %v6022_v18  ;;  %v2852_v21 = vld [vmem:[#allocation6 + $0x1b8] sm:$0xff]  ;;  %v5849_v18 = vcombine.low %v2856_v31, %v2860_v33 }
 0x315   :  { %4559 = vmatprep.subr.bf16.mxu0 %v5896_v41  ;;  %v5968_v41 = vcombine.high %v2975_v38, %v2979_v39  ;;  %v5842_v43 = vcombine.high %v2848_v27, %v2852_v21  ;;  %v2800_v31 = vld [vmem:[#allocation6 + $0x18] sm:$0xff] }
 0x316   :  { %v2804_v33 = vld [vmem:[#allocation6 + $0x38] sm:$0xff] }
 0x317   :  { %4519 = vmatpush2.bf16.msra.mxu1 %v6021_v45  ;;  %v2844_v45 = vld [vmem:[#allocation6 + $0x178] sm:$0xff] }
 0x318   :  { %4560 = vmatpush2.bf16.msra.mxu0 %v5895_v46  ;;  %4520 = vmatprep.subr.bf16.mxu1 %v6014_v48  ;;  %v5967_v46 = vcombine.low %v2975_v38, %v2979_v39  ;;  %v5841_v48 = vcombine.low %v2848_v27, %v2852_v21  ;;  %v5834_v16 = vcombine.high %v2840_v44, %v2844_v45  ;;  %v3047_v38 = vld [vmem:[#allocation6 + $0x7d0] sm:$0xff]  ;;  %v2924_v27 = vld [vmem:[#allocation6 + $0x3f8] sm:$0xff] }
 0x319   :  { %4561 = vmatprep.subr.bf16.mxu0 %v5888_v36  ;;  %v5960_v36 = vcombine.high %v2967_v37, %v2971_v42  ;;  %v3051_v39 = vld [vmem:[#allocation6 + $0x7f0] sm:$0xff]  ;;  %v5919_v21 = vcombine.low %v2927_v28, %v2931_v30 }
 0x31b   :  { %4521 = vmatpush2.bf16.msra.mxu1 %v6013_v56  ;;  %v2836_v56 = vld [vmem:[#allocation6 + $0x138] sm:$0xff] }
 0x31c   :  { %4562 = vmatpush2.bf16.msra.mxu0 %v5887_v57  ;;  %4522 = vmatprep.subr.bf16.mxu1 %v6006_v58  ;;  %v5959_v57 = vcombine.low %v2967_v37, %v2971_v42  ;;  %v5833_v58 = vcombine.low %v2840_v44, %v2844_v45  ;;  %v5826_v60 = vcombine.high %v2832_v55, %v2836_v56  ;;  %v3039_v42 = vld [vmem:[#allocation6 + $0x790] sm:$0xff]  ;;  %v2912_v44 = vld [vmem:[#allocation6 + $0x398] sm:$0xff] }
 0x31d   :  { %4563 = vmatprep.subr.bf16.mxu0 %v5880_v59  ;;  %v5952_v59 = vcombine.high %v2959_v52, %v2963_v53  ;;  %v2916_v45 = vld [vmem:[#allocation6 + $0x3b8] sm:$0xff] }
 0x31f   :  { %4523 = vmatpush2.bf16.msra.mxu1 %v6005_v47  ;;  %v2828_v47 = vld [vmem:[#allocation6 + $0xf8] sm:$0xff] }
 0x320   :  { %4564 = vmatpush2.bf16.msra.mxu0 %v5879_v10  ;;  %4524 = vmatprep.subr.bf16.mxu1 %v5998_v54  ;;  %v5825_v10 = vcombine.low %v2832_v55, %v2836_v56  ;;  %v5944_v54 = vcombine.high %v2951_v61, %v2955_v15  ;;  %v2904_v55 = vld [vmem:[#allocation6 + $0x358] sm:$0xff] }
 0x321   :  { %4565 = vmatprep.subr.bf16.mxu0 %v5872_v32  ;;  %v5818_v32 = vcombine.high %v2824_v62, %v2828_v47  ;;  %v2908_v56 = vld [vmem:[#allocation6 + $0x378] sm:$0xff] }
 0x323   :  { %4525 = vmatpush2.bf16.msra.mxu1 %v5997_v4  ;;  %v5943_v4 = vcombine.low %v2951_v61, %v2955_v15  ;;  %v3023_v61 = vld [vmem:[#allocation6 + $0x710] sm:$0xff] }
 0x324   :  { %4566 = vmatpush2.bf16.msra.mxu0 %v5871_v35  ;;  %4526 = vmatprep.subr.bf16.mxu1 %v5990_v5  ;;  %v5817_v35 = vcombine.low %v2824_v62, %v2828_v47  ;;  %v5936_v5 = vcombine.high %v2943_v12, %v2947_v6  ;;  %v3027_v15 = vld [vmem:[#allocation6 + $0x730] sm:$0xff]  ;;  %v2896_v62 = vld [vmem:[#allocation6 + $0x318] sm:$0xff] }
 0x325   :  { %4567 = vmatprep.subr.bf16.mxu0 %v5864_v29  ;;  %v5810_v29 = vcombine.high %v2816_v3, %v2820_v22  ;;  %v2900_v47 = vld [vmem:[#allocation6 + $0x338] sm:$0xff] }
 0x327   :  { %4527 = vmatpush2.bf16.msra.mxu1 %v5989_v24  ;;  %v5935_v24 = vcombine.low %v2943_v12, %v2947_v6  ;;  %v3015_v12 = vld [vmem:[#allocation6 + $0x6d0] sm:$0xff] }
 0x328   :  { %4568 = vmatpush2.bf16.msra.mxu0 %v5863_v25  ;;  %4528 = vmatprep.subr.bf16.mxu1 %v5982_v26  ;;  %v5809_v25 = vcombine.low %v2816_v3, %v2820_v22  ;;  %v5928_v26 = vcombine.high %v2935_v8, %v2939_v11  ;;  %v3019_v6 = vld [vmem:[#allocation6 + $0x6f0] sm:$0xff]  ;;  %v2888_v3 = vld [vmem:[#allocation6 + $0x2d8] sm:$0xff] }
 0x329   :  { %4569 = vmatprep.subr.bf16.mxu0 %v5856_v17  ;;  %v5802_v17 = vcombine.high %v2808_v14, %v2812_v23  ;;  %v2892_v22 = vld [vmem:[#allocation6 + $0x2f8] sm:$0xff] }
 0x32b   :  { %4529 = vmatpush2.bf16.msra.mxu1 %v5981_v51  ;;  %v5927_v51 = vcombine.low %v2935_v8, %v2939_v11  ;;  %v3007_v8 = vld [vmem:[#allocation6 + $0x690] sm:$0xff] }
 0x32c   :  { %4570 = vmatpush2.bf16.msra.mxu0 %v5855_v1  ;;  %4580 = vmatprep.subr.bf16.mxu1 %v5976_v7  ;;  %v5801_v1 = vcombine.low %v2808_v14, %v2812_v23  ;;  %v5920_v7 = vcombine.high %v2927_v28, %v2931_v30  ;;  %v3011_v11 = vld [vmem:[#allocation6 + $0x6b0] sm:$0xff]  ;;  %v2880_v14 = vld [vmem:[#allocation6 + $0x298] sm:$0xff] }
 0x32d   :  { %4621 = vmatprep.subr.bf16.mxu0 %v5850_v34  ;;  %v5794_v34 = vcombine.high %v2800_v31, %v2804_v33  ;;  %v2884_v23 = vld [vmem:[#allocation6 + $0x2b8] sm:$0xff]  ;;  %v2999_v28 = vld [vmem:[#allocation6 + $0x650] sm:$0xff] }
 0x32e   :  { %4531 = vmatmul.mubr.bf16.vlgmr.msra.gmra.mxu1 %v7124_v20  ;;  %v3003_v30 = vld [vmem:[#allocation6 + $0x670] sm:$0xff] }
 0x32f   :  { %4572 = vmatmul.mubr.bf16.vlgmr.msra.gmra.mxu0 %v7108_v50  ;;  %4581 = vmatpush1.bf16.msra.mxu1 %v5975_v40  ;;  %v2920_v40 = vld [vmem:[#allocation6 + $0x3d8] sm:$0xff] }
 0x330   :  { %4612 = vmatprep.mubr.bf16.mxu1 %v7122_v19  ;;  %4622 = vmatpush1.bf16.msra.mxu0 %v5849_v18  ;;  %v5793_v18 = vcombine.low %v2800_v31, %v2804_v33  ;;  %v5914_v37 = vcombine.high %v2920_v40, %v2924_v27  ;;  %v2872_v31 = vld [vmem:[#allocation6 + $0x258] sm:$0xff] }
 0x331   :  { %4653 = vmatprep.mubr.bf16.mxu0 %v7106_v49  ;;  %4582 = vmatprep.subr.bf16.mxu1 %v5968_v41  ;;  %v5951_v49 = vcombine.low %v2959_v52, %v2963_v53  ;;  %v6040_v41 = vcombine.high %v3047_v38, %v3051_v39  ;;  %v3031_v52 = vld [vmem:[#allocation6 + $0x750] sm:$0xff]  ;;  %v2876_v33 = vld [vmem:[#allocation6 + $0x278] sm:$0xff] }
 0x332   :  { %4623 = vmatprep.subr.bf16.mxu0 %v5842_v43  ;;  %v3043_v43 = vld [vmem:[#allocation6 + $0x7b0] sm:$0xff] }
 0x333   :  { %4583 = vmatpush1.bf16.msra.mxu1 %v5967_v46  ;;  %v6039_v46 = vcombine.low %v3047_v38, %v3051_v39  ;;  %v3035_v53 = vld [vmem:[#allocation6 + $0x770] sm:$0xff] }
 0x334   :  { %4624 = vmatpush1.bf16.msra.mxu0 %v5841_v48  ;;  %4584 = vmatprep.subr.bf16.mxu1 %v5960_v36  ;;  %v5913_v48 = vcombine.low %v2920_v40, %v2924_v27  ;;  %v6032_v36 = vcombine.high %v3039_v42, %v3043_v43  ;;  %v2991_v38 = vld [vmem:[#allocation6 + $0x610] sm:$0xff]  ;;  %v2864_v40 = vld [vmem:[#allocation6 + $0x218] sm:$0xff] }
 0x335   :  { %4625 = vmatprep.subr.bf16.mxu0 %v5834_v16  ;;  %v5906_v16 = vcombine.high %v2912_v44, %v2916_v45  ;;  %v2995_v39 = vld [vmem:[#allocation6 + $0x630] sm:$0xff]  ;;  %v2868_v27 = vld [vmem:[#allocation6 + $0x238] sm:$0xff] }
 0x337   :  { %4585 = vmatpush1.bf16.msra.mxu1 %v5959_v57  ;;  %v6031_v57 = vcombine.low %v3039_v42, %v3043_v43  ;;  %v2984_v42 = vld [vmem:[#allocation6 + $0x5d8] sm:$0xff] }
 0x338   :  { %4626 = vmatpush1.bf16.msra.mxu0 %v5833_v58  ;;  %4586 = vmatprep.subr.bf16.mxu1 %v5952_v59  ;;  %v5905_v58 = vcombine.low %v2912_v44, %v2916_v45  ;;  %v6024_v59 = vcombine.high %v3031_v52, %v3035_v53  ;;  %v2988_v43 = vld [vmem:[#allocation6 + $0x5f8] sm:$0xff]  ;;  %v5983_v44 = vcombine.low %v2991_v38, %v2995_v39 }
 0x339   :  { %4627 = vmatprep.subr.bf16.mxu0 %v5826_v60  ;;  %v5898_v60 = vcombine.high %v2904_v55, %v2908_v56  ;;  %v5857_v45 = vcombine.low %v2864_v40, %v2868_v27 }
 0x33b   :  { %4587 = vmatpush1.bf16.msra.mxu1 %v5951_v49  ;;  %v6023_v49 = vcombine.low %v3031_v52, %v3035_v53  ;;  %v5977_v52 = vcombine.low %v2984_v42, %v2988_v43 }
 0x33c   :  { %4628 = vmatpush1.bf16.msra.mxu0 %v5825_v10  ;;  %4588 = vmatprep.subr.bf16.mxu1 %v5944_v54  ;;  %v5897_v10 = vcombine.low %v2904_v55, %v2908_v56  ;;  %v6016_v54 = vcombine.high %v3023_v61, %v3027_v15  ;;  %v2968_v55 = vld [vmem:[#allocation6 + $0x558] sm:$0xff] }
 0x33d   :  { %4629 = vmatprep.subr.bf16.mxu0 %v5818_v32  ;;  %v5890_v32 = vcombine.high %v2896_v62, %v2900_v47  ;;  %v2972_v56 = vld [vmem:[#allocation6 + $0x578] sm:$0xff] }
 0x33f   :  { %4589 = vmatpush1.bf16.msra.mxu1 %v5943_v4  ;;  %v6015_v4 = vcombine.low %v3023_v61, %v3027_v15  ;;  %v5962_v15 = vcombine.high %v2968_v55, %v2972_v56 }
 0x340   :  { %4630 = vmatpush1.bf16.msra.mxu0 %v5817_v35  ;;  %4590 = vmatprep.subr.bf16.mxu1 %v5936_v5  ;;  %v5889_v35 = vcombine.low %v2896_v62, %v2900_v47  ;;  %v6008_v5 = vcombine.high %v3015_v12, %v3019_v6  ;;  %v2960_v62 = vld [vmem:[#allocation6 + $0x518] sm:$0xff] }
 0x341   :  { %4631 = vmatprep.subr.bf16.mxu0 %v5810_v29  ;;  %v5882_v29 = vcombine.high %v2888_v3, %v2892_v22  ;;  %v2964_v47 = vld [vmem:[#allocation6 + $0x538] sm:$0xff] }
 0x343   :  { %4591 = vmatpush1.bf16.msra.mxu1 %v5935_v24  ;;  %v6007_v24 = vcombine.low %v3015_v12, %v3019_v6  ;;  %v2952_v6 = vld [vmem:[#allocation6 + $0x4d8] sm:$0xff] }
 0x344   :  { %4632 = vmatpush1.bf16.msra.mxu0 %v5809_v25  ;;  %4592 = vmatprep.subr.bf16.mxu1 %v5928_v26  ;;  %v5881_v25 = vcombine.low %v2888_v3, %v2892_v22  ;;  %v6000_v26 = vcombine.high %v3007_v8, %v3011_v11  ;;  %v2956_v3 = vld [vmem:[#allocation6 + $0x4f8] sm:$0xff]  ;;  %v6749_v22 = vld [vmem:[#allocation7 + $0x60] sm:$0xff]  }
 0x345   :  { %4633 = vmatprep.subr.bf16.mxu0 %v5802_v17  ;;  %v5874_v17 = vcombine.high %v2880_v14, %v2884_v23 }
 0x347   :  { %4593 = vmatpush1.bf16.msra.mxu1 %v5927_v51  ;;  %v5999_v51 = vcombine.low %v3007_v8, %v3011_v11  ;;  %v6750_v8 = vld [vmem:[#allocation7 + $0x20] sm:$0xff]   ;;  %v6751_v11 = vld [vmem:[#allocation7 + $0x58] sm:$0xff]  }
 0x348   :  { %4634 = vmatpush1.bf16.msra.mxu0 %v5801_v1  ;;  %4594 = vmatprep.subr.bf16.mxu1 %v5920_v7  ;;  %v5873_v1 = vcombine.low %v2880_v14, %v2884_v23  ;;  %v5992_v7 = vcombine.high %v2999_v28, %v3003_v30  ;;  %v5945_v14 = vcombine.low %v2952_v6, %v2956_v3 }
 0x349   :  { %4635 = vmatprep.subr.bf16.mxu0 %v5794_v34  ;;  %v5866_v34 = vcombine.high %v2872_v31, %v2876_v33 }
 0x34b   :  { %4595 = vmatpush1.bf16.msra.mxu1 %v5919_v21  ;;  %v5991_v21 = vcombine.low %v2999_v28, %v3003_v30 }
 0x34c   :  { %4636 = vmatpush1.bf16.msra.mxu0 %v5793_v18  ;;  %4596 = vmatprep.subr.bf16.mxu1 %v6040_v41  ;;  %v5865_v18 = vcombine.low %v2872_v31, %v2876_v33  ;;  %v5984_v41 = vcombine.high %v2991_v38, %v2995_v39  ;;  %v2928_v31 = vld [vmem:[#allocation6 + $0x418] sm:$0xff] }
 0x34d   :  { %4637 = vmatprep.subr.bf16.mxu0 %v5914_v37  ;;  %v5858_v37 = vcombine.high %v2864_v40, %v2868_v27  ;;  %v2932_v33 = vld [vmem:[#allocation6 + $0x438] sm:$0xff]  ;;  %v6756_v40 = vld [vmem:[#allocation7 + $0x8] sm:$0xff]   ;;  %v6757_v27 = vld [vmem:[#allocation7 + $0x40] sm:$0xff]  }
 0x34e   :  { %v3048_v38 = vld [vmem:[#allocation6 + $0x7d8] sm:$0xff] }
 0x34f   :  { %4597 = vmatpush2.bf16.msra.mxu1 %v6039_v46  ;;  %v5978_v46 = vcombine.high %v2984_v42, %v2988_v43  ;;  %v3052_v39 = vld [vmem:[#allocation6 + $0x7f8] sm:$0xff]  ;;  %v6758_v42 = vld [vmem:[#allocation7] sm:$0xff]  }
 0x350   :  { %4638 = vmatpush2.bf16.msra.mxu0 %v5913_v48  ;;  %4598 = vmatprep.subr.bf16.mxu1 %v6032_v36  ;;  %v2976_v48 = vld [vmem:[#allocation6 + $0x598] sm:$0xff] }
 0x351   :  { %4639 = vmatprep.subr.bf16.mxu0 %v5906_v16  ;;  %v2980_v36 = vld [vmem:[#allocation6 + $0x5b8] sm:$0xff] }
 0x352   :  { %v6743_v16 = vld [vmem:[#allocation7 + $0x78] sm:$0xff]   ;;  %v5970_v53 = vcombine.high %v2976_v48, %v2980_v36 }
 0x353   :  { %4599 = vmatpush2.bf16.msra.mxu1 %v6031_v57  ;;  %v6744_v57 = vld [vmem:[#allocation7 + $0x38] sm:$0xff]  }
 0x354   :  { %4640 = vmatpush2.bf16.msra.mxu0 %v5905_v58  ;;  %4600 = vmatprep.subr.bf16.mxu1 %v6024_v59  ;;  %v6745_v59 = vld [vmem:[#allocation7 + $0x70] sm:$0xff]   ;;  %v6775_v43 = vld [vmem:[#allocation7 + $0x178] sm:$0xff]  }
 0x355   :  { %4641 = vmatprep.subr.bf16.mxu0 %v5898_v60  ;;  %v5969_v60 = vcombine.low %v2976_v48, %v2980_v36  ;;  %v3036_v48 = vld [vmem:[#allocation6 + $0x778] sm:$0xff] }
 0x357   :  { %4601 = vmatpush2.bf16.msra.mxu1 %v6023_v49  ;;  %v6746_v49 = vld [vmem:[#allocation7 + $0x30] sm:$0xff]  }
 0x358   :  { %4642 = vmatpush2.bf16.msra.mxu0 %v5897_v10  ;;  %4602 = vmatprep.subr.bf16.mxu1 %v6016_v54  ;;  %v6747_v54 = vld [vmem:[#allocation7 + $0x68] sm:$0xff]  }
 0x359   :  { %4643 = vmatprep.subr.bf16.mxu0 %v5890_v32  ;;  %v5961_v32 = vcombine.low %v2968_v55, %v2972_v56 }
 0x35b   :  { %4603 = vmatpush2.bf16.msra.mxu1 %v6015_v4  ;;  %v5953_v4 = vcombine.low %v2960_v62, %v2964_v47 }
 0x35c   :  { %4644 = vmatpush2.bf16.msra.mxu0 %v5889_v35  ;;  %4604 = vmatprep.subr.bf16.mxu1 %v6008_v5  ;;  %v5946_v35 = vcombine.high %v2952_v6, %v2956_v3  ;;  %v2944_v5 = vld [vmem:[#allocation6 + $0x498] sm:$0xff] }
 0x35d   :  { %4645 = vmatprep.subr.bf16.mxu0 %v5882_v29  ;;  %v2948_v29 = vld [vmem:[#allocation6 + $0x4b8] sm:$0xff] }
 0x35e   :  { %v5938_v23 = vcombine.high %v2944_v5, %v2948_v29  ;;  %v5937_v28 = vcombine.low %v2944_v5, %v2948_v29  ;;  %v2992_v6 = vld [vmem:[#allocation6 + $0x618] sm:$0xff] }
 0x35f   :  { %4605 = vmatpush2.bf16.msra.mxu1 %v6007_v24  ;;  %v2936_v24 = vld [vmem:[#allocation6 + $0x458] sm:$0xff] }
 0x360   :  { %4646 = vmatpush2.bf16.msra.mxu0 %v5881_v25  ;;  %4606 = vmatprep.subr.bf16.mxu1 %v6000_v26  ;;  %v2940_v25 = vld [vmem:[#allocation6 + $0x478] sm:$0xff] }
 0x361   :  { %4647 = vmatprep.subr.bf16.mxu0 %v5874_v17  ;;  %v6752_v26 = vld [vmem:[#allocation7 + $0x18] sm:$0xff]   ;;  %v6753_v17 = vld [vmem:[#allocation7 + $0x50] sm:$0xff]   ;;  %v5930_v30 = vcombine.high %v2936_v24, %v2940_v25 }
 0x362   :  { %v2996_v3 = vld [vmem:[#allocation6 + $0x638] sm:$0xff] }
 0x363   :  { %4607 = vmatpush2.bf16.msra.mxu1 %v5999_v51  ;;  %v6754_v51 = vld [vmem:[#allocation7 + $0x10] sm:$0xff]   ;;  %v6759_v5 = vld [vmem:[#allocation7 + $0xf8] sm:$0xff]  }
 0x364   :  { %4648 = vmatpush2.bf16.msra.mxu0 %v5873_v1  ;;  %4608 = vmatprep.subr.bf16.mxu1 %v5992_v7  ;;  %v6755_v1 = vld [vmem:[#allocation7 + $0x48] sm:$0xff]   ;;  %v5929_v7 = vcombine.low %v2936_v24, %v2940_v25 }
 0x365   :  { %4649 = vmatprep.subr.bf16.mxu0 %v5866_v34  ;;  %v5922_v34 = vcombine.high %v2928_v31, %v2932_v33 }
 0x367   :  { %4609 = vmatpush2.bf16.msra.mxu1 %v5991_v21  ;;  %v5921_v21 = vcombine.low %v2928_v31, %v2932_v33 }
 0x368   :  { %4650 = vmatpush2.bf16.msra.mxu0 %v5865_v18  ;;  %4610 = vmatprep.subr.bf16.mxu1 %v5984_v41  ;;  %v6042_v18 = vcombine.high %v3048_v38, %v3052_v39  ;;  %v3040_v41 = vld [vmem:[#allocation6 + $0x798] sm:$0xff] }
 0x369   :  { %4651 = vmatprep.subr.bf16.mxu0 %v5858_v37  ;;  %v3044_v37 = vld [vmem:[#allocation6 + $0x7b8] sm:$0xff] }
 0x36a   :  { %v6033_v36 = vcombine.low %v3040_v41, %v3044_v37 }
 0x36b   :  { %4611 = vmatpush2.bf16.msra.mxu1 %v5983_v44  ;;  %v6041_v44 = vcombine.low %v3048_v38, %v3052_v39  ;;  %v6765_v38 = vld [vmem:[#allocation7 + $0xe0] sm:$0xff]  }
 0x36c   :  { %4652 = vmatpush2.bf16.msra.mxu0 %v5857_v45  ;;  %4662 = vmatprep.subr.bf16.mxu1 %v5978_v46  ;;  %v6034_v45 = vcombine.high %v3040_v41, %v3044_v37  ;;  %v3032_v46 = vld [vmem:[#allocation6 + $0x758] sm:$0xff]  ;;  %v6777_v41 = vld [vmem:[#allocation7 + $0x170] sm:$0xff]  }
 0x36d   :  { %6109 = vmatprep.subr.bf16.mxu0 %v6743_v16  ;;  %v6026_v16 = vcombine.high %v3032_v46, %v3036_v48  ;;  %v6025_v55 = vcombine.low %v3032_v46, %v3036_v48  ;;  %v6767_v37 = vld [vmem:[#allocation7 + $0xd8] sm:$0xff]   ;;  %v6780_v46 = vld [vmem:[#allocation7 + $0x128] sm:$0xff]   ;;  %v6770_v48 = vld [vmem:[#allocation7 + $0x90] sm:$0xff]  }
 0x36e   :  { %4613 = vmatmul.mubr.bf16.vlgmr.msra.gmra.mxu1 %v7124_v20  ;;  %v7139_v58 = vpop.f32.mrf.mxu0 }
 0x36f   :  { %4654 = vmatmul.mubr.bf16.vlgmr.msra.gmra.mxu0 %v7108_v50  ;;  %4663 = vmatpush1.bf16.msra.mxu1 %v5977_v52  ;;  %v5954_v50 = vcombine.high %v2960_v62, %v2964_v47  ;;  %v3024_v52 = vld [vmem:[#allocation6 + $0x718] sm:$0xff] }
 0x370   :  { %4694 = vmatprep.mubr.bf16.mxu1 %v7122_v19  ;;  %v7143_v61 = vpop.f32.mrf.mxu0  ;;  %4664 = vmatprep.subr.bf16.mxu1 %v5970_v53  ;;  %v6748_v19 = vld [vmem:[#allocation7 + $0x28] sm:$0xff]   ;;  %v3028_v53 = vld [vmem:[#allocation6 + $0x738] sm:$0xff] }
 0x371   :  { %6110 = vmatpush3.bf16.msra.mxu0 %v6744_v57  ;;  %v6018_v56 = vcombine.high %v3024_v52, %v3028_v53  ;;  %v3016_v57 = vld [vmem:[#allocation6 + $0x6d8] sm:$0xff] }
 0x372   :  { %v4413_v10 = vpop.f32.mrf.mxu0  ;;  %6111 = vmatprep.subr.bf16.mxu0 %v6745_v59  ;;  %v3020_v59 = vld [vmem:[#allocation6 + $0x6f8] sm:$0xff] }
 0x373   :  { %4665 = vmatpush1.bf16.msra.mxu1 %v5969_v60  ;;  %v6017_v60 = vcombine.low %v3024_v52, %v3028_v53  ;;  %v3008_v62 = vld [vmem:[#allocation6 + $0x698] sm:$0xff]  ;;  %v6782_v52 = vld [vmem:[#allocation7 + $0x120] sm:$0xff]   ;;  %v6772_v53 = vld [vmem:[#allocation7 + $0x88] sm:$0xff]  }
 0x374   :  { %v4414_v12 = vpop.f32.mrf.mxu0  ;;  %4666 = vmatprep.subr.bf16.mxu1 %v5962_v15  ;;  %v6010_v15 = vcombine.high %v3016_v57, %v3020_v59  ;;  %v3012_v47 = vld [vmem:[#allocation6 + $0x6b8] sm:$0xff] }
 0x375   :  { %6112 = vmatpush3.bf16.msra.mxu0 %v6746_v49  ;;  %v6009_v49 = vcombine.low %v3016_v57, %v3020_v59  ;;  %v6002_v10 = vcombine.high %v3008_v62, %v3012_v47  ;;  %v6001_v12 = vcombine.low %v3008_v62, %v3012_v47  ;;  %v6784_v57 = vld [vmem:[#allocation7 + $0x118] sm:$0xff]   ;;  %v6774_v59 = vld [vmem:[#allocation7 + $0x80] sm:$0xff]   ;;  %v6786_v62 = vld [vmem:[#allocation7 + $0x110] sm:$0xff]  }
 0x376   :  { %6113 = vmatprep.subr.bf16.mxu0 %v6747_v54  ;;  %v3000_v54 = vld [vmem:[#allocation6 + $0x658] sm:$0xff]  ;;  %v6787_v47 = vld [vmem:[#allocation7 + $0x148] sm:$0xff]  }
 0x377   :  { %4667 = vmatpush1.bf16.msra.mxu1 %v5961_v32  ;;  %v3004_v32 = vld [vmem:[#allocation6 + $0x678] sm:$0xff] }
 0x378   :  { %4668 = vmatprep.subr.bf16.mxu1 %v5954_v50  ;;  %v5994_v50 = vcombine.high %v3000_v54, %v3004_v32 }
 0x379   :  { %6114 = vmatpush3.bf16.msra.mxu0 %v6748_v19  ;;  %v5993_v19 = vcombine.low %v3000_v54, %v3004_v32  ;;  %v6790_v54 = vld [vmem:[#allocation7 + $0x100] sm:$0xff]  }
 0x37a   :  { %6115 = vmatprep.subr.bf16.mxu0 %v6749_v22  ;;  %v5986_v22 = vcombine.high %v2992_v6, %v2996_v3 }
 0x37b   :  { %4669 = vmatpush1.bf16.msra.mxu1 %v5953_v4  ;;  %v7148_v4 = vld [vmem:[%s7187_s6] sm:$0xff] }
 0x37c   :  { %4670 = vmatprep.subr.bf16.mxu1 %v5946_v35  ;;  %v5985_v35 = vcombine.low %v2992_v6, %v2996_v3  ;;  %v3058_v29 = vrot.slane %v7148_v4, %v7029_v0  ;;  %v3066_v32 = vrot.slane %v7148_v4, %v7056_v9 }
 0x37d   :  { %6116 = vmatpush3.bf16.msra.mxu0 %v6750_v8  ;;  %v3062_v8 = vrot.slane %v7148_v4, %v7037_v2  ;;  %v6763_v2 = vld [vmem:[#allocation7 + $0xe8] sm:$0xff]  }
 0x37e   :  { %6117 = vmatprep.subr.bf16.mxu0 %v6751_v11  ;;  %v6760_v11 = vld [vmem:[#allocation7 + $0xb8] sm:$0xff]  }
 0x37f   :  { %4671 = vmatpush1.bf16.msra.mxu1 %v5945_v14  ;;  %v6761_v14 = vld [vmem:[#allocation7 + $0xf0] sm:$0xff]  }
 0x380   :  { %4672 = vmatprep.subr.bf16.mxu1 %v5938_v23  ;;  %v4410_v23 = vadd.f32 %v7139_v58, %v3058_v29 }
 0x381   :  { %6118 = vmatpush3.bf16.msra.mxu0 %v6752_v26  ;;  %v4412_v26 = vadd.f32 %v7143_v61, %v3062_v8 }
 0x382   :  { %6119 = vmatprep.subr.bf16.mxu0 %v6753_v17 }
 0x383   :  { %4673 = vmatpush1.bf16.msra.mxu1 %v5937_v28  ;;  %v6762_v28 = vld [vmem:[#allocation7 + $0xb0] sm:$0xff]  }
 0x384   :  { %4674 = vmatprep.subr.bf16.mxu1 %v5930_v30 }
 0x385   :  { %6120 = vmatpush3.bf16.msra.mxu0 %v6754_v51 }
 0x386   :  { %6121 = vmatprep.subr.bf16.mxu0 %v6755_v1  ;;  %v6764_v1 = vld [vmem:[#allocation7 + $0xa8] sm:$0xff]  }
 0x387   :  { %4675 = vmatpush1.bf16.msra.mxu1 %v5929_v7 }
 0x388   :  { %4676 = vmatprep.subr.bf16.mxu1 %v5922_v34 }
 0x389   :  { %6122 = vmatpush3.bf16.msra.mxu0 %v6756_v40 }
 0x38a   :  { %6123 = vmatprep.subr.bf16.mxu0 %v6757_v27  ;;  %v6776_v27 = vld [vmem:[#allocation7 + $0x138] sm:$0xff]  }
 0x38b   :  { %4677 = vmatpush1.bf16.msra.mxu1 %v5921_v21 }
 0x38c   :  { %4678 = vmatprep.subr.bf16.mxu1 %v6042_v18  ;;  %v6766_v18 = vld [vmem:[#allocation7 + $0xa0] sm:$0xff]  }
 0x38d   :  { %6124 = vmatpush3.bf16.msra.mxu0 %v6758_v42  ;;  %v6778_v42 = vld [vmem:[#allocation7 + $0x130] sm:$0xff]  }
 0x38e   :  { %6153 = vmatprep.subr.bf16.mxu0 %v6775_v43  ;;  %v6768_v43 = vld [vmem:[#allocation7 + $0x98] sm:$0xff]  }
 0x38f   :  { %4679 = vmatpush2.bf16.msra.mxu1 %v6041_v44  ;;  %v6779_v44 = vld [vmem:[#allocation7 + $0x168] sm:$0xff]  }
 0x390   :  { %4680 = vmatprep.subr.bf16.mxu1 %v6034_v45  ;;  %v6769_v45 = vld [vmem:[#allocation7 + $0xd0] sm:$0xff]  }
 0x393   :  { %4681 = vmatpush2.bf16.msra.mxu1 %v6033_v36  ;;  %v6781_v36 = vld [vmem:[#allocation7 + $0x160] sm:$0xff]  }
 0x394   :  { %4682 = vmatprep.subr.bf16.mxu1 %v6026_v16  ;;  %v6771_v16 = vld [vmem:[#allocation7 + $0xc8] sm:$0xff]  }
 0x397   :  { %4683 = vmatpush2.bf16.msra.mxu1 %v6025_v55  ;;  %v6783_v55 = vld [vmem:[#allocation7 + $0x158] sm:$0xff]  }
 0x398   :  { %4684 = vmatprep.subr.bf16.mxu1 %v6018_v56  ;;  %v6773_v56 = vld [vmem:[#allocation7 + $0xc0] sm:$0xff]  }
 0x39b   :  { %4685 = vmatpush2.bf16.msra.mxu1 %v6017_v60  ;;  %v6785_v60 = vld [vmem:[#allocation7 + $0x150] sm:$0xff]  }
 0x39c   :  { %4686 = vmatprep.subr.bf16.mxu1 %v6010_v15  ;;  %v6791_v15 = vld [vmem:[#allocation7 + $0x1f8] sm:$0xff]  }
 0x39f   :  { %4687 = vmatpush2.bf16.msra.mxu1 %v6009_v49  ;;  %v6788_v49 = vld [vmem:[#allocation7 + $0x108] sm:$0xff]  }
 0x3a0   :  { %4688 = vmatprep.subr.bf16.mxu1 %v6002_v10  ;;  %v6789_v10 = vld [vmem:[#allocation7 + $0x140] sm:$0xff]  }
 0x3a3   :  { %4689 = vmatpush2.bf16.msra.mxu1 %v6001_v12  ;;  %v3070_v12 = vrot.slane %v7148_v4, %v7059_v13 }
 0x3a4   :  { %4690 = vmatprep.subr.bf16.mxu1 %v5994_v50 }
 0x3a7   :  { %4691 = vmatpush2.bf16.msra.mxu1 %v5993_v19 }
 0x3a8   :  { %4692 = vmatprep.subr.bf16.mxu1 %v5986_v22 }
 0x3ab   :  { %4693 = vmatpush2.bf16.msra.mxu1 %v5985_v35 }
 0x3ac   :  { %6131 = vmatprep.subr.bf16.mxu1 %v6759_v5 }
 0x3ae   :  { %4695 = vmatmul.mubr.bf16.vlgmr.msra.gmra.mxu1 %v7124_v20  ;;  %v4450_v24 = vpop.f32.mrf.mxu1  ;;  %v7156_v25 = vpop.f32.mrf.mxu0 }
 0x3af   :  { %v4451_v17 = vadd.f32 %v4450_v24, %v4410_v23  ;;  %6132 = vmatpush3.bf16.msra.mxu1 %v6760_v11  ;;  %v4492_v50 = vadd.f32 %v7156_v25, %v3066_v32  ;;  %v6792_v25 = vld [vmem:[#allocation7 + $0x1b8] sm:$0xff]  }
 0x3b0   :  { %v4452_v0 = vpop.f32.mrf.mxu1  ;;  %v7159_v30 = vpop.f32.mrf.mxu0  ;;  %6133 = vmatprep.subr.bf16.mxu1 %v6761_v14 }
 0x3b1   :  { %vm4703_vm8 = vcmp.gt.f32.partialorder %v4451_v17, 0.0  ;;  %v4711_v31 = vmul.f32 0.2, %v4451_v17  ;;  %v4453_v33 = vadd.f32 %v4452_v0, %v4412_v26  ;;  %v4494_v3 = vadd.f32 %v7159_v30, %v3070_v12  ;;  %v6793_v0 = vld [vmem:[#allocation7 + $0x1f0] sm:$0xff]  }
 0x3b2   :  { %v4454_v51 = vpop.f32.mrf.mxu1  ;;  %v4495_v58 = vpop.f32.mrf.mxu0  ;;  %v6794_v30 = vld [vmem:[#allocation7 + $0x1b0] sm:$0xff]  }
 0x3b3   :  { %vm4704_vm9 = vcmp.gt.f32.partialorder %v4453_v33, 0.0  ;;  %v4712_v20 = vmul.f32 0.2, %v4453_v33  ;;  %6134 = vmatpush3.bf16.msra.mxu1 %v6762_v28  ;;  %v4719_v7 = vsel %vm4703_vm8, %v4451_v17, %v4711_v31  ;;  %v6796_v31 = vld [vmem:[#allocation7 + $0x1a8] sm:$0xff]   ;;  %v6798_v51 = vld [vmem:[#allocation7 + $0x1a0] sm:$0xff]   ;;  %v6799_v58 = vld [vmem:[#allocation7 + $0x1d8] sm:$0xff]  }
 0x3b4   :  { %v4455_v34 = vpop.f32.mrf.mxu1  ;;  %v4496_v61 = vpop.f32.mrf.mxu0  ;;  %6135 = vmatprep.subr.bf16.mxu1 %v6763_v2  ;;  %v4727_v21 = vpack.c.bf16 %v4719_v7, %v4719_v7  ;;  %v6795_v2 = vld [vmem:[#allocation7 + $0x1e8] sm:$0xff]   ;;  %v6802_v7 = vld [vmem:[#allocation7 + $0x190] sm:$0xff]  }
 0x3b5   :  { %v4720_v39 = vsel %vm4704_vm9, %v4453_v33, %v4712_v20  ;;  %v6797_v33 = vld [vmem:[#allocation7 + $0x1e0] sm:$0xff]   ;;  %v6800_v20 = vld [vmem:[#allocation7 + $0x198] sm:$0xff]   ;;  %v6803_v34 = vld [vmem:[#allocation7 + $0x1c8] sm:$0xff]  }
 0x3b6   :  { %v4728_v40 = vpack.c.bf16 %v4720_v39, %v4720_v39  ;;  %v6804_v61 = vld [vmem:[#allocation7 + $0x188] sm:$0xff]   ;;  %v6806_v39 = vld [vmem:[#allocation7 + $0x180] sm:$0xff]  }
 0x3b7   :  { %6136 = vmatpush3.bf16.msra.mxu1 %v6764_v1  ;;  %v6801_v1 = vld [vmem:[#allocation7 + $0x1d0] sm:$0xff]  }
 0x3b8   :  { %5286 = vmatprep.mubr.bf16.mxu0 %v4728_v40  ;;  %6137 = vmatprep.subr.bf16.mxu1 %v6765_v38  ;;  %v6805_v38 = vld [vmem:[#allocation7 + $0x1c0] sm:$0xff]   ;;  %v3073_v40 = vsub.s32 4, %v7026_v63 }
 0x3b9   :  { %5287 = vmatmul.mubr.bf16.vlgmr.msra.gmra.mxu0 %v4727_v21 }
 0x3ba   :  { %6154 = vmatpush3.bf16.msra.mxu0 %v6776_v27  ;;  %v3077_v27 = vsub.s32 5, %v7026_v63  ;;  %v3074_v21 = vrot.slane %v7148_v4, %v3073_v40 }
 0x3bb   :  { %6138 = vmatpush3.bf16.msra.mxu1 %v6766_v18  ;;  %6155 = vmatprep.subr.bf16.mxu0 %v6777_v41 }
 0x3bc   :  { %6139 = vmatprep.subr.bf16.mxu1 %v6767_v37  ;;  %v3078_v18 = vrot.slane %v7148_v4, %v3077_v27 }
 0x3be   :  { %6156 = vmatpush3.bf16.msra.mxu0 %v6778_v42 }
 0x3bf   :  { %6140 = vmatpush3.bf16.msra.mxu1 %v6768_v43  ;;  %6157 = vmatprep.subr.bf16.mxu0 %v6779_v44 }
 0x3c0   :  { %6141 = vmatprep.subr.bf16.mxu1 %v6769_v45 }
 0x3c2   :  { %6158 = vmatpush3.bf16.msra.mxu0 %v6780_v46 }
 0x3c3   :  { %6142 = vmatpush3.bf16.msra.mxu1 %v6770_v48  ;;  %6159 = vmatprep.subr.bf16.mxu0 %v6781_v36 }
 0x3c4   :  { %6143 = vmatprep.subr.bf16.mxu1 %v6771_v16 }
 0x3c6   :  { %6160 = vmatpush3.bf16.msra.mxu0 %v6782_v52 }
 0x3c7   :  { %6144 = vmatpush3.bf16.msra.mxu1 %v6772_v53  ;;  %6161 = vmatprep.subr.bf16.mxu0 %v6783_v55 }
 0x3c8   :  { %6145 = vmatprep.subr.bf16.mxu1 %v6773_v56 }
 0x3ca   :  { %6162 = vmatpush3.bf16.msra.mxu0 %v6784_v57 }
 0x3cb   :  { %6146 = vmatpush3.bf16.msra.mxu1 %v6774_v59  ;;  %6163 = vmatprep.subr.bf16.mxu0 %v6785_v60 }
 0x3cc   :  { %6175 = vmatprep.subr.bf16.mxu1 %v6791_v15 }
 0x3ce   :  { %6164 = vmatpush3.bf16.msra.mxu0 %v6786_v62  ;;  %v3081_v62 = vsub.s32 6, %v7026_v63 }
 0x3cf   :  { %6165 = vmatprep.subr.bf16.mxu0 %v6787_v47  ;;  %v3085_v47 = vsub.s32 7, %v7026_v63 }
 0x3d2   :  { %6166 = vmatpush3.bf16.msra.mxu0 %v6788_v49  ;;  %v3082_v49 = vrot.slane %v7148_v4, %v3081_v62 }
 0x3d3   :  { %6167 = vmatprep.subr.bf16.mxu0 %v6789_v10  ;;  %v3086_v10 = vrot.slane %v7148_v4, %v3085_v47 }
 0x3d6   :  { %6168 = vmatpush3.bf16.msra.mxu0 %v6790_v54 }
 0x3ee   :  { %v4532_v6 = vpop.f32.mrf.mxu1 }
 0x3ef   :  { %v4533_v19 = vadd.f32 %v4532_v6, %v4492_v50  ;;  %v4573_v22 = vpop.f32.mrf.mxu0 }
 0x3f0   :  { %v4534_v35 = vpop.f32.mrf.mxu1  ;;  %v4574_v41 = vadd.f32 %v4573_v22, %v3074_v21 }
 0x3f1   :  { %vm4705_vm10 = vcmp.gt.f32.partialorder %v4533_v19, 0.0  ;;  %v4713_v5 = vmul.f32 0.2, %v4533_v19  ;;  %v4535_v29 = vadd.f32 %v4534_v35, %v4494_v3  ;;  %v4575_v8 = vpop.f32.mrf.mxu0 }
 0x3f2   :  { %v4536_v11 = vpop.f32.mrf.mxu1  ;;  %v4576_v42 = vadd.f32 %v4575_v8, %v3078_v18 }
 0x3f3   :  { %vm4706_vm11 = vcmp.gt.f32.partialorder %v4535_v29, 0.0  ;;  %v4714_v14 = vmul.f32 0.2, %v4535_v29  ;;  %v4577_v23 = vpop.f32.mrf.mxu0  ;;  %v4721_v9 = vsel %vm4705_vm10, %v4533_v19, %v4713_v5 }
 0x3f4   :  { %v4537_v24 = vpop.f32.mrf.mxu1  ;;  %v4729_v28 = vpack.c.bf16 %v4721_v9, %v4721_v9 }
 0x3f5   :  { %v4578_v26 = vpop.f32.mrf.mxu0  ;;  %v4722_v13 = vsel %vm4706_vm11, %v4535_v29, %v4714_v14 }
 0x3f6   :  { %v4730_v17 = vpack.c.bf16 %v4722_v13, %v4722_v13  ;;  %v6043_v26 = vld [vmem:[%s7189_s8] ss:$0 sm:$0xff] }
 0x3f8   :  { %5326 = vmatprep.mubr.bf16.mxu1 %v4730_v17 }
 0x3f9   :  { %5327 = vmatmul.mubr.bf16.vlgmr.msra.gmra.mxu1 %v4729_v28 }
 0x3fa   :  { %6176 = vmatpush3.bf16.msra.mxu1 %v6792_v25 }
 0x3fb   :  { %6177 = vmatprep.subr.bf16.mxu1 %v6793_v0 }
 0x3fe   :  { %6178 = vmatpush3.bf16.msra.mxu1 %v6794_v30 }
 0x3ff   :  { %6179 = vmatprep.subr.bf16.mxu1 %v6795_v2 }
 0x402   :  { %6180 = vmatpush3.bf16.msra.mxu1 %v6796_v31 }
 0x403   :  { %6181 = vmatprep.subr.bf16.mxu1 %v6797_v33 }
 0x406   :  { %6182 = vmatpush3.bf16.msra.mxu1 %v6798_v51 }
 0x407   :  { %6183 = vmatprep.subr.bf16.mxu1 %v6799_v58 }
 0x40a   :  { %6184 = vmatpush3.bf16.msra.mxu1 %v6800_v20 }
 0x40b   :  { %6185 = vmatprep.subr.bf16.mxu1 %v6801_v1 }
 0x40e   :  { %6186 = vmatpush3.bf16.msra.mxu1 %v6802_v7 }
 0x40f   :  { %6187 = vmatprep.subr.bf16.mxu1 %v6803_v34 }
 0x412   :  { %6188 = vmatpush3.bf16.msra.mxu1 %v6804_v61 }
 0x413   :  { %6189 = vmatprep.subr.bf16.mxu1 %v6805_v38 }
 0x416   :  { %6190 = vmatpush3.bf16.msra.mxu1 %v6806_v39 }
 0x42e   :  { %v4614_v37 = vpop.f32.mrf.mxu1 }
 0x42f   :  { %v4615_v43 = vadd.f32 %v4614_v37, %v4574_v41  ;;  %v4655_v44 = vpop.f32.mrf.mxu0 }
 0x430   :  { %v4616_v45 = vpop.f32.mrf.mxu1  ;;  %v4656_v54 = vadd.f32 %v4655_v44, %v3082_v49 }
 0x431   :  { %vm4707_vm12 = vcmp.gt.f32.partialorder %v4615_v43, 0.0  ;;  %v4715_v46 = vmul.f32 0.2, %v4615_v43  ;;  %v4617_v48 = vadd.f32 %v4616_v45, %v4576_v42  ;;  %v4657_v36 = vpop.f32.mrf.mxu0 }
 0x432   :  { %v4618_v16 = vpop.f32.mrf.mxu1  ;;  %v4658_v12 = vadd.f32 %v4657_v36, %v3086_v10 }
 0x433   :  { %vm4708_vm13 = vcmp.gt.f32.partialorder %v4617_v48, 0.0  ;;  %v4716_v52 = vmul.f32 0.2, %v4617_v48  ;;  %v4659_v53 = vpop.f32.mrf.mxu0  ;;  %v4723_v55 = vsel %vm4707_vm12, %v4615_v43, %v4715_v46 }
 0x434   :  { %v4619_v56 = vpop.f32.mrf.mxu1  ;;  %v4731_v15 = vpack.c.bf16 %v4723_v55, %v4723_v55 }
 0x435   :  { %v4660_v57 = vpop.f32.mrf.mxu0  ;;  %v4724_v59 = vsel %vm4708_vm13, %v4617_v48, %v4716_v52 }
 0x436   :  { %v4732_v60 = vpack.c.bf16 %v4724_v59, %v4724_v59 }
 0x438   :  { %5366 = vmatprep.mubr.bf16.mxu0 %v4732_v60 }
 0x439   :  { %5367 = vmatmul.mubr.bf16.vlgmr.msra.gmra.mxu0 %v4731_v15 }
 0x46e   :  { %v4696_v32 = vpop.f32.mrf.mxu1 }
 0x46f   :  { %v4697_v50 = vadd.f32 %v4696_v32, %v4656_v54 }
 0x470   :  { %v4698_v6 = vpop.f32.mrf.mxu1 }
 0x471   :  { %vm4709_vm14 = vcmp.gt.f32.partialorder %v4697_v50, 0.0  ;;  %v4717_v3 = vmul.f32 0.2, %v4697_v50  ;;  %v4699_v19 = vadd.f32 %v4698_v6, %v4658_v12 }
 0x472   :  { %v4700_v22 = vpop.f32.mrf.mxu1 }
 0x473   :  { %vm4710_vm15 = vcmp.gt.f32.partialorder %v4699_v19, 0.0  ;;  %v4718_v35 = vmul.f32 0.2, %v4699_v19  ;;  %v4725_v5 = vsel %vm4709_vm14, %v4697_v50, %v4717_v3 }
 0x474   :  { %v4701_v29 = vpop.f32.mrf.mxu1  ;;  %v4733_v63 = vpack.c.bf16 %v4725_v5, %v4725_v5 }
 0x475   :  { %v4726_v8 = vsel %vm4710_vm15, %v4699_v19, %v4718_v35 }
 0x476   :  { %v4734_v11 = vpack.c.bf16 %v4726_v8, %v4726_v8 }
 0x478   :  { %5406 = vmatprep.mubr.bf16.mxu1 %v4734_v11 }
 0x479   :  { %5407 = vmatmul.mubr.bf16.vlgmr.msra.gmra.mxu1 %v4733_v63  ;;  %v6125_v14 = vpop.f32.mrf.mxu0 }
 0x47b   :  { %v6126_v4 = vpop.f32.mrf.mxu0 }
 0x47c   :  { %v6127_v23 = vadd.f32 %v6126_v4, %v6125_v14 }
 0x47d   :  { %v6128_v9 = vpop.f32.mrf.mxu0 }
 0x47e   :  { %v5289_v25 = vadd.f32 %v6127_v23, %v6043_v26 }
 0x47f   :  { %v6129_v24 = vpop.f32.mrf.mxu0 }
 0x4b9   :  { %v6147_v13 = vpop.f32.mrf.mxu1 }
 0x4bb   :  { %v6148_v17 = vpop.f32.mrf.mxu1 }
 0x4bc   :  { %v6149_v28 = vadd.f32 %v6148_v17, %v6147_v13 }
 0x4bd   :  { %v6150_v0 = vpop.f32.mrf.mxu1 }
 0x4be   :  { %v5329_v30 = vadd.f32 %v6149_v28, %v5289_v25 }
 0x4bf   :  { %v6151_v2 = vpop.f32.mrf.mxu1 }
 0x4f9   :  { %v6169_v31 = vpop.f32.mrf.mxu0 }
 0x4fb   :  { %v6170_v33 = vpop.f32.mrf.mxu0 }
 0x4fc   :  { %v6171_v51 = vadd.f32 %v6170_v33, %v6169_v31 }
 0x4fd   :  { %v6172_v58 = vpop.f32.mrf.mxu0 }
 0x4fe   :  { %v5369_v20 = vadd.f32 %v6171_v51, %v5329_v30 }
 0x4ff   :  { %v6173_v1 = vpop.f32.mrf.mxu0 }
 0x539   :  { %v6191_v7 = vpop.f32.mrf.mxu1 }
 0x53b   :  { %v6192_v34 = vpop.f32.mrf.mxu1 }
 0x53c   :  { %v6193_v61 = vadd.f32 %v6192_v34, %v6191_v7 }
 0x53d   :  { %v6194_v38 = vpop.f32.mrf.mxu1 }
 0x53e   :  { %v5409_v39 = vadd.f32 %v6193_v61, %v5369_v20 }
 0x53f   :  { %v6195_v40 = vpop.f32.mrf.mxu1 }
 0x540   :  { %v6108_v27 = vmul.f32 -1.442695, %v5409_v39 }
 0x542   :  { %6807 = vpow2.f32 %v6108_v27 }
 0x54f   :  { %v6808_v21 = vpop.eup %6807 }
 0x550   :  { %v5417_v18 = vadd.f32 1.0, %v6808_v21 }
 0x552   :  { %6809 = vrcp.f32 %v5417_v18 }
 0x55f   :  { %v6810_v41 = vpop.eup %6809 }
 0x560   :  { %5420 = vst [vmem:[%s7190_s9] sm:$0xff] %v6810_v41 }
 0x561   :  { %5425 = vsyncpa [#allocation3], 1 }
 0x562   :  { %5426 = vsyncpa [#allocation5], 1 }
 0x563   :  { %5427 = vsyncpa [#allocation8], 1 }

</bundles_post_ra>
